<compile_context>
chip_gen: v7x
topology: tpu7x:2x2x1
jax: 0.10.0
libtpu: 0.0.40
codegen_flags: <defaults>
</compile_context>

<pallas_src>
import functools
import math

import jax
import jax.numpy as jnp
from jax import lax
from jax.experimental import pallas as pl
from jax.experimental.pallas import tpu as pltpu

_BN_EPS = 1e-5            # bn_eps global in the reference code
_BN_MOMENTUM = 0.1        # bn_momentum (running stats only; unused for fwd output)
_LANE = 128
_ACT_DTYPE = jnp.bfloat16  # storage dtype of intermediate activations


# ---------------------------------------------------------------------------
# Small helpers
# ---------------------------------------------------------------------------
def _round_up(v, m):
    return ((v + m - 1) // m) * m


@functools.lru_cache(maxsize=None)
def _vmem_budget():
    # v5e/v6e: 128 MiB VMEM, v7x: 64 MiB. Use <= 3/4 of physical, capped at 96 MiB
    # (=> ~48 MiB on v7x) so large row tiles never OOM the double-buffered pipeline.
    try:
        cap = int(pltpu.get_tpu_info().vmem_capacity_bytes)
    except Exception:
        cap = 64 * 1024 * 1024
    return int(min(96 * 1024 * 1024, (cap * 3) // 4))


def _choose_row_tile(n, row_tile=None):
    if row_tile is None:
        row_tile = 512               # MXU-aligned default (multiple of 256)
    tn = max(8, _round_up(min(row_tile, _round_up(n, 8)), 8))
    return tn, _round_up(n, tn)


def _pad2(a, rows, cols):
    r, c = a.shape
    if r == rows and c == cols:
        return a
    return jnp.pad(a, ((0, rows - r), (0, cols - c)))


# ---------------------------------------------------------------------------
# Pallas kernels
# ---------------------------------------------------------------------------
def _stats_kernel(x_ref, s_ref, ss_ref):
    """Per-channel sum / sum-of-squares of the (zero-row-padded) input, accumulated
    across the N grid axis into resident (1, C) f32 outputs."""
    @pl.when(pl.program_id(0) == 0)
    def _init():
        s_ref[...] = jnp.zeros_like(s_ref)
        ss_ref[...] = jnp.zeros_like(ss_ref)

    x = x_ref[...].astype(jnp.float32)
    s_ref[...] += jnp.sum(x, axis=0, keepdims=True)
    ss_ref[...] += jnp.sum(x * x, axis=0, keepdims=True)


def _bn_apply_kernel(x_ref, scale_ref, shift_ref, o_ref, *, apply_silu):
    """y = x*scale + shift (scale/shift pre-folded from batch stats + gamma/beta),
    optionally fused with SiLU.  bf16 in/out, f32 math."""
    y = x_ref[...].astype(jnp.float32) * scale_ref[...] + shift_ref[...]
    if apply_silu:
        y = y * jax.nn.sigmoid(y)          # nonlinearity(x) = x * sigmoid(x)
    o_ref[...] = y.astype(o_ref.dtype)


def _matmul_stats_kernel(*refs, residual_mode, mask_last, n_true):
    """y = a @ w (+ residual; the shortcut BatchNorm is applied in-kernel when
    residual_mode == 'bn').  Also accumulates per-channel sum / sumsq of y with
    plain VALU column sums so the following BatchNorm never re-reads y from HBM."""
    if residual_mode == "bn":
        a_ref, w_ref, r_ref, rs_ref, rb_ref, o_ref, s_ref, ss_ref = refs
    elif residual_mode == "identity":
        a_ref, w_ref, r_ref, o_ref, s_ref, ss_ref = refs
    else:
        a_ref, w_ref, o_ref, s_ref, ss_ref = refs

    @pl.when(pl.program_id(0) == 0)
    def _init():
        s_ref[...] = jnp.zeros_like(s_ref)
        ss_ref[...] = jnp.zeros_like(ss_ref)

    y = jnp.dot(a_ref[...], w_ref[...], preferred_element_type=jnp.float32)
    if residual_mode == "identity":
        y = y + r_ref[...].astype(jnp.float32)
    elif residual_mode == "bn":
        r = r_ref[...].astype(jnp.float32) * rs_ref[...] + rb_ref[...]
        if mask_last:
            # keep zero-padded rows exactly zero (stats + next block rely on it)
            row0 = pl.program_id(0) * r.shape[0]
            rid = lax.broadcasted_iota(jnp.int32, r.shape, 0) + row0
            r = jnp.where(rid < n_true, r, 0.0)
        y = y + r
    o_ref[...] = y.astype(o_ref.dtype)

    # f32 stats of the f32 accumulator (before bf16 downcast) -> next BN statistics.
    s_ref[...] += jnp.sum(y, axis=0, keepdims=True)
    ss_ref[...] += jnp.sum(y * y, axis=0, keepdims=True)


# ---------------------------------------------------------------------------
# pallas_call wrappers
# ---------------------------------------------------------------------------
def _input_stats(x_pad, tn):
    n_pad, c_pad = x_pad.shape
    return pl.pallas_call(
        _stats_kernel,
        out_shape=(jax.ShapeDtypeStruct((1, c_pad), jnp.float32),
                   jax.ShapeDtypeStruct((1, c_pad), jnp.float32)),
        grid=(n_pad // tn,),
        in_specs=[pl.BlockSpec((tn, c_pad), lambda i: (i, 0))],
        out_specs=(pl.BlockSpec((1, c_pad), lambda i: (0, 0)),
                   pl.BlockSpec((1, c_pad), lambda i: (0, 0))),
        compiler_params=pltpu.CompilerParams(
            dimension_semantics=("arbitrary",),
            vmem_limit_bytes=_vmem_budget()),
    )(x_pad)


def _bn_apply(x_pad, scale, shift, tn, apply_silu):
    n_pad, c_pad = x_pad.shape
    kern = functools.partial(_bn_apply_kernel, apply_silu=apply_silu)
    return pl.pallas_call(
        kern,
        out_shape=jax.ShapeDtypeStruct((n_pad, c_pad), _ACT_DTYPE),
        grid=(n_pad // tn,),
        in_specs=[pl.BlockSpec((tn, c_pad), lambda i: (i, 0)),
                  pl.BlockSpec((1, c_pad), lambda i: (0, 0)),
                  pl.BlockSpec((1, c_pad), lambda i: (0, 0))],
        out_specs=pl.BlockSpec((tn, c_pad), lambda i: (i, 0)),
        compiler_params=pltpu.CompilerParams(
            dimension_semantics=("parallel",),      # no cross-tile dependency
            vmem_limit_bytes=_vmem_budget()),
    )(x_pad, scale, shift)


def _matmul_stats(a_pad, w_pad, tn, residual=None, residual_bn=None, n_true=0,
                  out_dtype=_ACT_DTYPE):
    n_pad, k_pad = a_pad.shape
    c_out_pad = w_pad.shape[1]

    args = [a_pad, w_pad]
    in_specs = [pl.BlockSpec((tn, k_pad), lambda i: (i, 0)),
                pl.BlockSpec((k_pad, c_out_pad), lambda i: (0, 0))]
    if residual is None:
        mode = None
    elif residual_bn is None:
        mode = "identity"
        args.append(residual)
        in_specs.append(pl.BlockSpec((tn, c_out_pad), lambda i: (i, 0)))
    else:
        mode = "bn"
        args += [residual, residual_bn[0], residual_bn[1]]
        in_specs += [pl.BlockSpec((tn, c_out_pad), lambda i: (i, 0)),
                     pl.BlockSpec((1, c_out_pad), lambda i: (0, 0)),
                     pl.BlockSpec((1, c_out_pad), lambda i: (0, 0))]
    mask_last = (mode == "bn") and (n_pad != n_true)

    kern = functools.partial(_matmul_stats_kernel, residual_mode=mode,
                             mask_last=mask_last, n_true=n_true)
    y, s, ss = pl.pallas_call(
        kern,
        out_shape=(jax.ShapeDtypeStruct((n_pad, c_out_pad), out_dtype),
                   jax.ShapeDtypeStruct((1, c_out_pad), jnp.float32),
                   jax.ShapeDtypeStruct((1, c_out_pad), jnp.float32)),
        grid=(n_pad // tn,),
        in_specs=in_specs,
        out_specs=(pl.BlockSpec((tn, c_out_pad), lambda i: (i, 0)),
                   pl.BlockSpec((1, c_out_pad), lambda i: (0, 0)),
                   pl.BlockSpec((1, c_out_pad), lambda i: (0, 0))),
        compiler_params=pltpu.CompilerParams(
            dimension_semantics=("arbitrary",),     # stats accumulated across tiles
            vmem_limit_bytes=_vmem_budget()),
    )(*args)
    return y, (s, ss)


# ---------------------------------------------------------------------------
# Tiny per-channel (O(C)) JAX pieces + graph aggregation
# ---------------------------------------------------------------------------
def _fold_bn(stats, gamma_p, beta_p, n_true):
    """Fold batch statistics + affine params into per-channel scale/shift once."""
    s, ss = stats
    inv_n = 1.0 / float(n_true)
    mean = s * inv_n
    var = jnp.maximum(ss * inv_n - mean * mean, 0.0)
    scale = gamma_p * lax.rsqrt(var + _BN_EPS)   # padded channels: gamma=0 -> scale=0
    shift = beta_p - mean * scale
    return scale, shift                          # each (1, c_pad) f32


def _aggregate(h, edge_index, edge_type, n_edge_type, c_true, k_pad):
    # TODO(synk): data-dependent gather + scatter_mean has no clean Pallas TPU
    # equivalent (no atomics); implemented with XLA gather / segment_sum here.
    n_pad = h.shape[0]
    row, col = edge_index[0], edge_index[1]
    seg = row * n_edge_type + edge_type
    feats = h[:, :c_true] if c_true != h.shape[1] else h     # true channels only
    gathered = feats[col].astype(jnp.float32)
    num_seg = n_pad * n_edge_type                            # padded rows -> zero rows
    sums = jax.ops.segment_sum(gathered, seg, num_segments=num_seg)
    cnt = jax.ops.segment_sum(jnp.ones((seg.shape[0],), jnp.float32), seg,
                              num_segments=num_seg)
    mean = sums / jnp.maximum(cnt, 1.0)[:, None]
    a = mean.reshape(n_pad, n_edge_type * c_true).astype(_ACT_DTYPE)
    k = n_edge_type * c_true
    if k != k_pad:                                           # joint E*C pad to 128
        a = jnp.pad(a, ((0, 0), (0, k_pad - k)))
    return a


# ---------------------------------------------------------------------------
# GraphResBlock / GraphResBlocks forward (kernel path)
# ---------------------------------------------------------------------------
def _prepare_block_params(p, n_edge_type, c_in_pad, c_out_pad):
    c_out = p['w1'].shape[1]
    c_in = p['w1'].shape[0] // n_edge_type
    k1_pad = _round_up(n_edge_type * c_in, _LANE)
    k2_pad = _round_up(n_edge_type * c_out, _LANE)
    pp = {
        'c_in': c_in, 'c_out': c_out, 'k1_pad': k1_pad, 'k2_pad': k2_pad,
        'g1': _pad2(p['g1'][None, :], 1, c_in_pad),
        'b1': _pad2(p['b1'][None, :], 1, c_in_pad),
        'g2': _pad2(p['g2'][None, :], 1, c_out_pad),
        'b2': _pad2(p['b2'][None, :], 1, c_out_pad),
        # contiguous [E*C_in, C_out] padding (matches the jointly-padded features)
        'w1': _pad2(p['w1'], k1_pad, c_out_pad).astype(_ACT_DTYPE),
        'w2': _pad2(p['w2'], k2_pad, c_out_pad).astype(_ACT_DTYPE),
    }
    if 'wsc' in p:
        pp['wsc'] = _pad2(p['wsc'].T, c_in_pad, c_out_pad).astype(_ACT_DTYPE)
        pp['gsc'] = _pad2(p['gsc'][None, :], 1, c_out_pad)
        pp['bsc'] = _pad2(p['bsc'][None, :], 1, c_out_pad)
    return pp


def _graph_res_block(x_pad, x_stats, pp, edge_index, edge_type, n_edge_type,
                     n_true, tn, out_dtype):
    # norm1 -> SiLU (input stats were produced by the previous block's fused conv2)
    scale1, shift1 = _fold_bn(x_stats, pp['g1'], pp['b1'], n_true)
    h = _bn_apply(x_pad, scale1, shift1, tn, apply_silu=True)

    # GraphConv1: scatter-mean aggregation (JAX) + fused matmul / output stats
    a1 = _aggregate(h, edge_index, edge_type, n_edge_type, pp['c_in'], pp['k1_pad'])
    y1, s1 = _matmul_stats(a1, pp['w1'], tn)

    # norm2 -> SiLU (dropout treated as identity)
    scale2, shift2 = _fold_bn(s1, pp['g2'], pp['b2'], n_true)
    h2 = _bn_apply(y1, scale2, shift2, tn, apply_silu=True)

    # shortcut: Conv1x1 (+ its BN fused into the conv2 kernel below) or identity
    if 'wsc' in pp:
        ysc, ssc = _matmul_stats(x_pad, pp['wsc'], tn)
        residual = ysc
        residual_bn = _fold_bn(ssc, pp['gsc'], pp['bsc'], n_true)
    else:
        residual, residual_bn = x_pad, None

    # GraphConv2 fused with the residual add (incl. shortcut BN) and with the stats
    # of the block output (feeds the next block's norm1 without re-reading HBM)
    a2 = _aggregate(h2, edge_index, edge_type, n_edge_type, pp['c_out'], pp['k2_pad'])
    out, out_stats = _matmul_stats(a2, pp['w2'], tn, residual=residual,
                                   residual_bn=residual_bn, n_true=n_true,
                                   out_dtype=out_dtype)
    return out, out_stats


def graph_res_blocks_forward(x, params, edge_index, edge_type, n_edge_type=5,
                             row_tile=None):
    """Forward pass of GraphResBlocks (train-mode BN batch stats, temb=None,
    n_node_type=0, dropout=identity). x: [N, C_in] f32 -> [N, C_out] f32."""
    n, c_in = x.shape
    c_out = params[0]['w1'].shape[1]
    tn, n_pad = _choose_row_tile(n, row_tile)
    c_in_pad = _round_up(c_in, _LANE)
    c_out_pad = _round_up(c_out, _LANE)

    padded_params = []
    for i, p in enumerate(params):
        cinp = c_in_pad if i == 0 else c_out_pad
        padded_params.append(_prepare_block_params(p, n_edge_type, cinp, c_out_pad))

    cur = _pad2(x, n_pad, c_in_pad).astype(_ACT_DTYPE)
    cur_stats = _input_stats(cur, tn)       # stats of the raw input for block 0 norm1
    for i, pp in enumerate(padded_params):
        last = i == len(padded_params) - 1
        cur, cur_stats = _graph_res_block(
            cur, cur_stats, pp, edge_index, edge_type, n_edge_type, n, tn,
            out_dtype=jnp.float32 if last else _ACT_DTYPE)
    return cur[:n, :c_out].astype(jnp.float32)


# ---------------------------------------------------------------------------
# Pure-JAX reference (mirrors the PyTorch forward, train-mode BN, f32)
# ---------------------------------------------------------------------------
def _reference_forward(x, params, edge_index, edge_type, n_edge_type=5):
    def bn(v, g, b):
        mean = jnp.mean(v, axis=0, keepdims=True)
        var = jnp.mean((v - mean) ** 2, axis=0, keepdims=True)
        return (v - mean) / jnp.sqrt(var + _BN_EPS) * g[None, :] + b[None, :]

    def silu(v):
        return v * jax.nn.sigmoid(v)

    def gconv(v, w):
        n = v.shape[0]
        row, col = edge_index[0], edge_index[1]
        seg = row * n_edge_type + edge_type
        sums = jax.ops.segment_sum(v[col], seg, num_segments=n * n_edge_type)
        cnt = jax.ops.segment_sum(jnp.ones((seg.shape[0],), v.dtype), seg,
                                  num_segments=n * n_edge_type)
        mean = sums / jnp.maximum(cnt, 1.0)[:, None]
        return mean.reshape(n, -1) @ w

    out = x
    for p in params:
        h = silu(bn(out, p['g1'], p['b1']))
        h = gconv(h, p['w1'])
        h = silu(bn(h, p['g2'], p['b2']))
        h = gconv(h, p['w2'])
        sc = bn(out @ p['wsc'].T, p['gsc'], p['bsc']) if 'wsc' in p else out
        out = h + sc
    return out


# ---------------------------------------------------------------------------
# Deterministic parameter init (mimics a fresh PyTorch module)
# ---------------------------------------------------------------------------
def _init_block_params(key, c_in, c_out, n_edge_type, avg_degree):
    ks = jax.random.split(key, 7)

    def gconv_w(k, ci, co):
        std = math.sqrt(2.0 / float(avg_degree * ci + avg_degree * co))
        a = math.sqrt(3.0) * std
        return jax.random.uniform(k, (n_edge_type * ci, co), dtype=jnp.float32,
                                  minval=-a, maxval=a)

    p = {
        'g1': 1.0 + 0.1 * jax.random.normal(ks[0], (c_in,), dtype=jnp.float32),
        'b1': 0.1 * jax.random.normal(ks[1], (c_in,), dtype=jnp.float32),
        'w1': gconv_w(ks[2], c_in, c_out),
        'g2': 1.0 + 0.1 * jax.random.normal(ks[3], (c_out,), dtype=jnp.float32),
        'b2': 0.1 * jax.random.normal(ks[4], (c_out,), dtype=jnp.float32),
        'w2': gconv_w(ks[5], c_out, c_out),
    }
    if c_in != c_out:
        bound = 1.0 / math.sqrt(c_in)
        p['wsc'] = jax.random.uniform(ks[6], (c_out, c_in), dtype=jnp.float32,
                                      minval=-bound, maxval=bound)
        p['gsc'] = jnp.ones((c_out,), dtype=jnp.float32)
        p['bsc'] = jnp.zeros((c_out,), dtype=jnp.float32)
    return p


if __name__ == "__main__":
    key = jax.random.PRNGKey(0)
    N, C_IN, C_OUT = 777, 16, 32           # N not a tile multiple -> exercises masking
    E_TYPES, AVG_DEG, RESBLK_NUM = 5, 5, 2
    NUM_EDGES = N * AVG_DEG
    ROW_TILE = 256                          # MXU-aligned tile; 4-step grid here

    keys = jax.random.split(key, 4 + RESBLK_NUM)
    x = jax.random.normal(keys[0], (N, C_IN), dtype=jnp.float32)
    row = jax.random.randint(keys[1], (NUM_EDGES,), 0, N)
    col = jax.random.randint(keys[2], (NUM_EDGES,), 0, N)
    edge_type = jax.random.randint(keys[3], (NUM_EDGES,), 0, E_TYPES)
    edge_index = jnp.stack([row, col], axis=0)

    channels = [C_IN] + [C_OUT] * RESBLK_NUM
    params = [_init_block_params(keys[4 + i], channels[i], channels[i + 1],
                                 E_TYPES, AVG_DEG) for i in range(RESBLK_NUM)]

    fwd = jax.jit(functools.partial(graph_res_blocks_forward,
                                    n_edge_type=E_TYPES, row_tile=ROW_TILE))
    out = jax.block_until_ready(fwd(x, params, edge_index, edge_type))

    ref = _reference_forward(x, params, edge_index, edge_type, n_edge_type=E_TYPES)
    assert out.shape == (N, C_OUT)
    # tolerance accounts for bfloat16 storage of intermediate activations/weights
    max_err = float(jnp.max(jnp.abs(out - ref)))
    assert jnp.allclose(out, ref, atol=4e-2, rtol=4e-2), (
        f"mismatch vs reference, max abs err = {max_err}")

    print("KERNEL_OK")
</pallas_src>

<mosaic_0001>
module attributes {stable_mosaic.version = 11 : i64} {
  func.func @_stats_kernel(%arg0: i32, %arg1: memref<256x128xbf16, #tpu.memory_space<vmem>>, %arg2: memref<1x128xf32, #tpu.memory_space<vmem>>, %arg3: memref<1x128xf32, #tpu.memory_space<vmem>>) attributes {dimension_semantics = [#tpu.dimension_semantics<arbitrary>], iteration_bounds = array<i64: 4>, scalar_prefetch = 0 : i64, scratch_operands = 0 : i64, tpu.core_type = #tpu.core_type<tc>, window_params = [{transform_indices = @transform_0, window_bounds = array<i64: 256, 128>}, {pipeline_mode = #tpu.pipeline_mode<synchronous>, transform_indices = @transform_1, window_bounds = array<i64: 1, 128>}, {pipeline_mode = #tpu.pipeline_mode<synchronous>, transform_indices = @transform_2, window_bounds = array<i64: 1, 128>}]} {
    %c0_i32 = arith.constant 0 : i32
    %0 = arith.cmpi eq, %arg0, %c0_i32 : i32
    %1 = arith.extui %0 : i1 to i32
    %c0_i32_0 = arith.constant 0 : i32
    %2 = arith.cmpi ne, %1, %c0_i32_0 : i32
    scf.if %2 {
      %cst_11 = arith.constant 0.000000e+00 : f32
      %16 = vector.broadcast %cst_11 : f32 to vector<1x128xf32>
      %c0_12 = arith.constant 0 : index
      %c0_13 = arith.constant 0 : index
      %17 = vector.load %arg2[%c0_12, %c0_13] : memref<1x128xf32, #tpu.memory_space<vmem>>, vector<1x128xf32>
      tpu.vector_store %arg2[%c0_12, %c0_13], %16 {strides = array<i32>} : memref<1x128xf32, #tpu.memory_space<vmem>>, vector<1x128xf32>,
      %cst_14 = arith.constant 0.000000e+00 : f32
      %18 = vector.broadcast %cst_14 : f32 to vector<1x128xf32>
      %c0_15 = arith.constant 0 : index
      %c0_16 = arith.constant 0 : index
      %19 = vector.load %arg3[%c0_15, %c0_16] : memref<1x128xf32, #tpu.memory_space<vmem>>, vector<1x128xf32>
      tpu.vector_store %arg3[%c0_15, %c0_16], %18 {strides = array<i32>} : memref<1x128xf32, #tpu.memory_space<vmem>>, vector<1x128xf32>,
    } else {
    }
    %c0 = arith.constant 0 : index
    %c0_1 = arith.constant 0 : index
    %3 = vector.load %arg1[%c0, %c0_1] : memref<256x128xbf16, #tpu.memory_space<vmem>>, vector<256x128xbf16>
    %4 = arith.extf %3 : vector<256x128xbf16> to vector<256x128xf32>
    %c0_2 = arith.constant 0 : index
    %c0_3 = arith.constant 0 : index
    %5 = vector.load %arg2[%c0_2, %c0_3] : memref<1x128xf32, #tpu.memory_space<vmem>>, vector<1x128xf32>
    %cst = arith.constant dense<0.000000e+00> : vector<128xf32>
    %6 = vector.multi_reduction <add>, %4, %cst [0] : vector<256x128xf32> to vector<128xf32>
    %7 = vector.shape_cast %6 : vector<128xf32> to vector<1x128xf32>
    %8 = arith.addf %5, %7 : vector<1x128xf32>
    %c0_4 = arith.constant 0 : index
    %c0_5 = arith.constant 0 : index
    %9 = vector.load %arg2[%c0_4, %c0_5] : memref<1x128xf32, #tpu.memory_space<vmem>>, vector<1x128xf32>
    tpu.vector_store %arg2[%c0_4, %c0_5], %8 {strides = array<i32>} : memref<1x128xf32, #tpu.memory_space<vmem>>, vector<1x128xf32>,
    %c0_6 = arith.constant 0 : index
    %c0_7 = arith.constant 0 : index
    %10 = vector.load %arg3[%c0_6, %c0_7] : memref<1x128xf32, #tpu.memory_space<vmem>>, vector<1x128xf32>
    %11 = arith.mulf %4, %4 : vector<256x128xf32>
    %cst_8 = arith.constant dense<0.000000e+00> : vector<128xf32>
    %12 = vector.multi_reduction <add>, %11, %cst_8 [0] : vector<256x128xf32> to vector<128xf32>
    %13 = vector.shape_cast %12 : vector<128xf32> to vector<1x128xf32>
    %14 = arith.addf %10, %13 : vector<1x128xf32>
    %c0_9 = arith.constant 0 : index
    %c0_10 = arith.constant 0 : index
    %15 = vector.load %arg3[%c0_9, %c0_10] : memref<1x128xf32, #tpu.memory_space<vmem>>, vector<1x128xf32>
    tpu.vector_store %arg3[%c0_9, %c0_10], %14 {strides = array<i32>} : memref<1x128xf32, #tpu.memory_space<vmem>>, vector<1x128xf32>,
    return
  }
  func.func @transform_0(%arg0: i32) -> (i32, i32) {
    %c0_i32 = arith.constant 0 : i32
    %c0_i32_0 = arith.constant 0 : i32
    return %arg0, %c0_i32 : i32, i32
  }
  func.func @transform_1(%arg0: i32) -> (i32, i32) {
    %c0_i32 = arith.constant 0 : i32
    %c0_i32_0 = arith.constant 0 : i32
    %c0_i32_1 = arith.constant 0 : i32
    return %c0_i32, %c0_i32_0 : i32, i32
  }
  func.func @transform_2(%arg0: i32) -> (i32, i32) {
    %c0_i32 = arith.constant 0 : i32
    %c0_i32_0 = arith.constant 0 : i32
    %c0_i32_1 = arith.constant 0 : i32
    return %c0_i32, %c0_i32_0 : i32, i32
  }
}

module attributes {stable_mosaic.version = 11 : i64} {
  func.func @_bn_apply_kernel(%arg0: i32, %arg1: memref<256x128xbf16, #tpu.memory_space<vmem>>, %arg2: memref<1x128xf32, #tpu.memory_space<vmem>>, %arg3: memref<1x128xf32, #tpu.memory_space<vmem>>, %arg4: memref<256x128xbf16, #tpu.memory_space<vmem>>) attributes {dimension_semantics = [#tpu.dimension_semantics<parallel>], iteration_bounds = array<i64: 4>, scalar_prefetch = 0 : i64, scratch_operands = 0 : i64, tpu.core_type = #tpu.core_type<tc>, window_params = [{transform_indices = @transform_0, window_bounds = array<i64: 256, 128>}, {pipeline_mode = #tpu.pipeline_mode<synchronous>, transform_indices = @transform_1, window_bounds = array<i64: 1, 128>}, {pipeline_mode = #tpu.pipeline_mode<synchronous>, transform_indices = @transform_2, window_bounds = array<i64: 1, 128>}, {transform_indices = @transform_3, window_bounds = array<i64: 256, 128>}]} {
    %c0 = arith.constant 0 : index
    %c0_0 = arith.constant 0 : index
    %0 = vector.load %arg1[%c0, %c0_0] : memref<256x128xbf16, #tpu.memory_space<vmem>>, vector<256x128xbf16>
    %1 = arith.extf %0 : vector<256x128xbf16> to vector<256x128xf32>
    %c0_1 = arith.constant 0 : index
    %c0_2 = arith.constant 0 : index
    %2 = vector.load %arg2[%c0_1, %c0_2] : memref<1x128xf32, #tpu.memory_space<vmem>>, vector<1x128xf32>
    %3 = vector.broadcast %2 : vector<1x128xf32> to vector<256x128xf32>
    %4 = arith.mulf %1, %3 : vector<256x128xf32>
    %c0_3 = arith.constant 0 : index
    %c0_4 = arith.constant 0 : index
    %5 = vector.load %arg3[%c0_3, %c0_4] : memref<1x128xf32, #tpu.memory_space<vmem>>, vector<1x128xf32>
    %6 = vector.broadcast %5 : vector<1x128xf32> to vector<256x128xf32>
    %7 = arith.addf %4, %6 : vector<256x128xf32>
    %8 = arith.negf %7 : vector<256x128xf32>
    %9 = math.exp %8 : vector<256x128xf32>
    %cst = arith.constant 1.000000e+00 : f32
    %10 = vector.broadcast %cst : f32 to vector<256x128xf32>
    %11 = arith.addf %10, %9 : vector<256x128xf32>
    %12 = arith.divf %10, %11 : vector<256x128xf32>
    %13 = arith.mulf %7, %12 : vector<256x128xf32>
    %14 = arith.truncf %13 : vector<256x128xf32> to vector<256x128xbf16>
    %c0_5 = arith.constant 0 : index
    %c0_6 = arith.constant 0 : index
    %15 = vector.load %arg4[%c0_5, %c0_6] : memref<256x128xbf16, #tpu.memory_space<vmem>>, vector<256x128xbf16>
    tpu.vector_store %arg4[%c0_5, %c0_6], %14 {strides = array<i32>} : memref<256x128xbf16, #tpu.memory_space<vmem>>, vector<256x128xbf16>,
    return
  }
  func.func @transform_0(%arg0: i32) -> (i32, i32) {
    %c0_i32 = arith.constant 0 : i32
    %c0_i32_0 = arith.constant 0 : i32
    return %arg0, %c0_i32 : i32, i32
  }
  func.func @transform_1(%arg0: i32) -> (i32, i32) {
    %c0_i32 = arith.constant 0 : i32
    %c0_i32_0 = arith.constant 0 : i32
    %c0_i32_1 = arith.constant 0 : i32
    return %c0_i32, %c0_i32_0 : i32, i32
  }
  func.func @transform_2(%arg0: i32) -> (i32, i32) {
    %c0_i32 = arith.constant 0 : i32
    %c0_i32_0 = arith.constant 0 : i32
    %c0_i32_1 = arith.constant 0 : i32
    return %c0_i32, %c0_i32_0 : i32, i32
  }
  func.func @transform_3(%arg0: i32) -> (i32, i32) {
    %c0_i32 = arith.constant 0 : i32
    %c0_i32_0 = arith.constant 0 : i32
    return %arg0, %c0_i32 : i32, i32
  }
}

module attributes {stable_mosaic.version = 11 : i64} {
  func.func @_matmul_stats_kernel(%arg0: i32, %arg1: memref<256x128xbf16, #tpu.memory_space<vmem>>, %arg2: memref<128x128xbf16, #tpu.memory_space<vmem>>, %arg3: memref<256x128xbf16, #tpu.memory_space<vmem>>, %arg4: memref<1x128xf32, #tpu.memory_space<vmem>>, %arg5: memref<1x128xf32, #tpu.memory_space<vmem>>) attributes {dimension_semantics = [#tpu.dimension_semantics<arbitrary>], iteration_bounds = array<i64: 4>, scalar_prefetch = 0 : i64, scratch_operands = 0 : i64, tpu.core_type = #tpu.core_type<tc>, window_params = [{transform_indices = @transform_0, window_bounds = array<i64: 256, 128>}, {pipeline_mode = #tpu.pipeline_mode<synchronous>, transform_indices = @transform_1, window_bounds = array<i64: 128, 128>}, {transform_indices = @transform_2, window_bounds = array<i64: 256, 128>}, {pipeline_mode = #tpu.pipeline_mode<synchronous>, transform_indices = @transform_3, window_bounds = array<i64: 1, 128>}, {pipeline_mode = #tpu.pipeline_mode<synchronous>, transform_indices = @transform_4, window_bounds = array<i64: 1, 128>}]} {
    %c0_i32 = arith.constant 0 : i32
    %0 = arith.cmpi eq, %arg0, %c0_i32 : i32
    %1 = arith.extui %0 : i1 to i32
    %c0_i32_0 = arith.constant 0 : i32
    %2 = arith.cmpi ne, %1, %c0_i32_0 : i32
    scf.if %2 {
      %cst_16 = arith.constant 0.000000e+00 : f32
      %19 = vector.broadcast %cst_16 : f32 to vector<1x128xf32>
      %c0_17 = arith.constant 0 : index
      %c0_18 = arith.constant 0 : index
      %20 = vector.load %arg4[%c0_17, %c0_18] : memref<1x128xf32, #tpu.memory_space<vmem>>, vector<1x128xf32>
      tpu.vector_store %arg4[%c0_17, %c0_18], %19 {strides = array<i32>} : memref<1x128xf32, #tpu.memory_space<vmem>>, vector<1x128xf32>,
      %cst_19 = arith.constant 0.000000e+00 : f32
      %21 = vector.broadcast %cst_19 : f32 to vector<1x128xf32>
      %c0_20 = arith.constant 0 : index
      %c0_21 = arith.constant 0 : index
      %22 = vector.load %arg5[%c0_20, %c0_21] : memref<1x128xf32, #tpu.memory_space<vmem>>, vector<1x128xf32>
      tpu.vector_store %arg5[%c0_20, %c0_21], %21 {strides = array<i32>} : memref<1x128xf32, #tpu.memory_space<vmem>>, vector<1x128xf32>,
    } else {
    }
    %c0 = arith.constant 0 : index
    %c0_1 = arith.constant 0 : index
    %3 = vector.load %arg1[%c0, %c0_1] : memref<256x128xbf16, #tpu.memory_space<vmem>>, vector<256x128xbf16>
    %c0_2 = arith.constant 0 : index
    %c0_3 = arith.constant 0 : index
    %4 = vector.load %arg2[%c0_2, %c0_3] : memref<128x128xbf16, #tpu.memory_space<vmem>>, vector<128x128xbf16>
    %cst = arith.constant dense<0.000000e+00> : vector<256x128xf32>
    %5 = tpu.matmul %3, %4, %cst {dimension_numbers = #tpu.dot_dimension_numbers<[1], [0], [0], [1], [0, 0, 1, 1], [], []>} : vector<256x128xbf16>, vector<128x128xbf16>, vector<256x128xf32> -> vector<256x128xf32>
    %6 = arith.truncf %5 : vector<256x128xf32> to vector<256x128xbf16>
    %c0_4 = arith.constant 0 : index
    %c0_5 = arith.constant 0 : index
    %7 = vector.load %arg3[%c0_4, %c0_5] : memref<256x128xbf16, #tpu.memory_space<vmem>>, vector<256x128xbf16>
    tpu.vector_store %arg3[%c0_4, %c0_5], %6 {strides = array<i32>} : memref<256x128xbf16, #tpu.memory_space<vmem>>, vector<256x128xbf16>,
    %c0_6 = arith.constant 0 : index
    %c0_7 = arith.constant 0 : index
    %8 = vector.load %arg4[%c0_6, %c0_7] : memref<1x128xf32, #tpu.memory_space<vmem>>, vector<1x128xf32>
    %cst_8 = arith.constant dense<0.000000e+00> : vector<128xf32>
    %9 = vector.multi_reduction <add>, %5, %cst_8 [0] : vector<256x128xf32> to vector<128xf32>
    %10 = vector.shape_cast %9 : vector<128xf32> to vector<1x128xf32>
    %11 = arith.addf %8, %10 : vector<1x128xf32>
    %c0_9 = arith.constant 0 : index
    %c0_10 = arith.constant 0 : index
    %12 = vector.load %arg4[%c0_9, %c0_10] : memref<1x128xf32, #tpu.memory_space<vmem>>, vector<1x128xf32>
    tpu.vector_store %arg4[%c0_9, %c0_10], %11 {strides = array<i32>} : memref<1x128xf32, #tpu.memory_space<vmem>>, vector<1x128xf32>,
    %c0_11 = arith.constant 0 : index
    %c0_12 = arith.constant 0 : index
    %13 = vector.load %arg5[%c0_11, %c0_12] : memref<1x128xf32, #tpu.memory_space<vmem>>, vector<1x128xf32>
    %14 = arith.mulf %5, %5 : vector<256x128xf32>
    %cst_13 = arith.constant dense<0.000000e+00> : vector<128xf32>
    %15 = vector.multi_reduction <add>, %14, %cst_13 [0] : vector<256x128xf32> to vector<128xf32>
    %16 = vector.shape_cast %15 : vector<128xf32> to vector<1x128xf32>
    %17 = arith.addf %13, %16 : vector<1x128xf32>
    %c0_14 = arith.constant 0 : index
    %c0_15 = arith.constant 0 : index
    %18 = vector.load %arg5[%c0_14, %c0_15] : memref<1x128xf32, #tpu.memory_space<vmem>>, vector<1x128xf32>
    tpu.vector_store %arg5[%c0_14, %c0_15], %17 {strides = array<i32>} : memref<1x128xf32, #tpu.memory_space<vmem>>, vector<1x128xf32>,
    return
  }
  func.func @transform_0(%arg0: i32) -> (i32, i32) {
    %c0_i32 = arith.constant 0 : i32
    %c0_i32_0 = arith.constant 0 : i32
    return %arg0, %c0_i32 : i32, i32
  }
  func.func @transform_1(%arg0: i32) -> (i32, i32) {
    %c0_i32 = arith.constant 0 : i32
    %c0_i32_0 = arith.constant 0 : i32
    %c0_i32_1 = arith.constant 0 : i32
    return %c0_i32, %c0_i32_0 : i32, i32
  }
  func.func @transform_2(%arg0: i32) -> (i32, i32) {
    %c0_i32 = arith.constant 0 : i32
    %c0_i32_0 = arith.constant 0 : i32
    return %arg0, %c0_i32 : i32, i32
  }
  func.func @transform_3(%arg0: i32) -> (i32, i32) {
    %c0_i32 = arith.constant 0 : i32
    %c0_i32_0 = arith.constant 0 : i32
    %c0_i32_1 = arith.constant 0 : i32
    return %c0_i32, %c0_i32_0 : i32, i32
  }
  func.func @transform_4(%arg0: i32) -> (i32, i32) {
    %c0_i32 = arith.constant 0 : i32
    %c0_i32_0 = arith.constant 0 : i32
    %c0_i32_1 = arith.constant 0 : i32
    return %c0_i32, %c0_i32_0 : i32, i32
  }
}

module attributes {stable_mosaic.version = 11 : i64} {
  func.func @_matmul_stats_kernel(%arg0: i32, %arg1: memref<256x256xbf16, #tpu.memory_space<vmem>>, %arg2: memref<256x128xbf16, #tpu.memory_space<vmem>>, %arg3: memref<256x128xbf16, #tpu.memory_space<vmem>>, %arg4: memref<1x128xf32, #tpu.memory_space<vmem>>, %arg5: memref<1x128xf32, #tpu.memory_space<vmem>>, %arg6: memref<256x128xbf16, #tpu.memory_space<vmem>>, %arg7: memref<1x128xf32, #tpu.memory_space<vmem>>, %arg8: memref<1x128xf32, #tpu.memory_space<vmem>>) attributes {dimension_semantics = [#tpu.dimension_semantics<arbitrary>], iteration_bounds = array<i64: 4>, scalar_prefetch = 0 : i64, scratch_operands = 0 : i64, tpu.core_type = #tpu.core_type<tc>, window_params = [{transform_indices = @transform_0, window_bounds = array<i64: 256, 256>}, {pipeline_mode = #tpu.pipeline_mode<synchronous>, transform_indices = @transform_1, window_bounds = array<i64: 256, 128>}, {transform_indices = @transform_2, window_bounds = array<i64: 256, 128>}, {pipeline_mode = #tpu.pipeline_mode<synchronous>, transform_indices = @transform_3, window_bounds = array<i64: 1, 128>}, {pipeline_mode = #tpu.pipeline_mode<synchronous>, transform_indices = @transform_4, window_bounds = array<i64: 1, 128>}, {transform_indices = @transform_5, window_bounds = array<i64: 256, 128>}, {pipeline_mode = #tpu.pipeline_mode<synchronous>, transform_indices = @transform_6, window_bounds = array<i64: 1, 128>}, {pipeline_mode = #tpu.pipeline_mode<synchronous>, transform_indices = @transform_7, window_bounds = array<i64: 1, 128>}]} {
    %c0_i32 = arith.constant 0 : i32
    %0 = arith.cmpi eq, %arg0, %c0_i32 : i32
    %1 = arith.extui %0 : i1 to i32
    %c0_i32_0 = arith.constant 0 : i32
    %2 = arith.cmpi ne, %1, %c0_i32_0 : i32
    scf.if %2 {
      %cst_23 = arith.constant 0.000000e+00 : f32
      %36 = vector.broadcast %cst_23 : f32 to vector<1x128xf32>
      %c0_24 = arith.constant 0 : index
      %c0_25 = arith.constant 0 : index
      %37 = vector.load %arg7[%c0_24, %c0_25] : memref<1x128xf32, #tpu.memory_space<vmem>>, vector<1x128xf32>
      tpu.vector_store %arg7[%c0_24, %c0_25], %36 {strides = array<i32>} : memref<1x128xf32, #tpu.memory_space<vmem>>, vector<1x128xf32>,
      %cst_26 = arith.constant 0.000000e+00 : f32
      %38 = vector.broadcast %cst_26 : f32 to vector<1x128xf32>
      %c0_27 = arith.constant 0 : index
      %c0_28 = arith.constant 0 : index
      %39 = vector.load %arg8[%c0_27, %c0_28] : memref<1x128xf32, #tpu.memory_space<vmem>>, vector<1x128xf32>
      tpu.vector_store %arg8[%c0_27, %c0_28], %38 {strides = array<i32>} : memref<1x128xf32, #tpu.memory_space<vmem>>, vector<1x128xf32>,
    } else {
    }
    %c0 = arith.constant 0 : index
    %c0_1 = arith.constant 0 : index
    %3 = vector.load %arg1[%c0, %c0_1] : memref<256x256xbf16, #tpu.memory_space<vmem>>, vector<256x256xbf16>
    %c0_2 = arith.constant 0 : index
    %c0_3 = arith.constant 0 : index
    %4 = vector.load %arg2[%c0_2, %c0_3] : memref<256x128xbf16, #tpu.memory_space<vmem>>, vector<256x128xbf16>
    %cst = arith.constant dense<0.000000e+00> : vector<256x128xf32>
    %5 = tpu.matmul %3, %4, %cst {dimension_numbers = #tpu.dot_dimension_numbers<[1], [0], [0], [1], [0, 0, 1, 1], [], []>} : vector<256x256xbf16>, vector<256x128xbf16>, vector<256x128xf32> -> vector<256x128xf32>
    %c0_4 = arith.constant 0 : index
    %c0_5 = arith.constant 0 : index
    %6 = vector.load %arg3[%c0_4, %c0_5] : memref<256x128xbf16, #tpu.memory_space<vmem>>, vector<256x128xbf16>
    %7 = arith.extf %6 : vector<256x128xbf16> to vector<256x128xf32>
    %c0_6 = arith.constant 0 : index
    %c0_7 = arith.constant 0 : index
    %8 = vector.load %arg4[%c0_6, %c0_7] : memref<1x128xf32, #tpu.memory_space<vmem>>, vector<1x128xf32>
    %9 = vector.broadcast %8 : vector<1x128xf32> to vector<256x128xf32>
    %10 = arith.mulf %7, %9 : vector<256x128xf32>
    %c0_8 = arith.constant 0 : index
    %c0_9 = arith.constant 0 : index
    %11 = vector.load %arg5[%c0_8, %c0_9] : memref<1x128xf32, #tpu.memory_space<vmem>>, vector<1x128xf32>
    %12 = vector.broadcast %11 : vector<1x128xf32> to vector<256x128xf32>
    %13 = arith.addf %10, %12 : vector<256x128xf32>
    %c256_i32 = arith.constant 256 : i32
    %14 = arith.muli %arg0, %c256_i32 : i32
    %15 = tpu.iota {dimensions = array<i32: 0>} : vector<256x128xi32>
    %16 = vector.broadcast %14 : i32 to vector<256x128xi32>
    %17 = arith.addi %15, %16 : vector<256x128xi32>
    %c777_i32 = arith.constant 777 : i32
    %18 = vector.broadcast %c777_i32 : i32 to vector<256x128xi32>
    %19 = arith.cmpi slt, %17, %18 : vector<256x128xi32>
    %cst_10 = arith.constant 0.000000e+00 : f32
    %20 = vector.broadcast %cst_10 : f32 to vector<256x128xf32>
    %21 = arith.select %19, %13, %20 : vector<256x128xi1>, vector<256x128xf32>
    %22 = arith.addf %5, %21 : vector<256x128xf32>
    %23 = arith.truncf %22 : vector<256x128xf32> to vector<256x128xbf16>
    %c0_11 = arith.constant 0 : index
    %c0_12 = arith.constant 0 : index
    %24 = vector.load %arg6[%c0_11, %c0_12] : memref<256x128xbf16, #tpu.memory_space<vmem>>, vector<256x128xbf16>
    tpu.vector_store %arg6[%c0_11, %c0_12], %23 {strides = array<i32>} : memref<256x128xbf16, #tpu.memory_space<vmem>>, vector<256x128xbf16>,
    %c0_13 = arith.constant 0 : index
    %c0_14 = arith.constant 0 : index
    %25 = vector.load %arg7[%c0_13, %c0_14] : memref<1x128xf32, #tpu.memory_space<vmem>>, vector<1x128xf32>
    %cst_15 = arith.constant dense<0.000000e+00> : vector<128xf32>
    %26 = vector.multi_reduction <add>, %22, %cst_15 [0] : vector<256x128xf32> to vector<128xf32>
    %27 = vector.shape_cast %26 : vector<128xf32> to vector<1x128xf32>
    %28 = arith.addf %25, %27 : vector<1x128xf32>
    %c0_16 = arith.constant 0 : index
    %c0_17 = arith.constant 0 : index
    %29 = vector.load %arg7[%c0_16, %c0_17] : memref<1x128xf32, #tpu.memory_space<vmem>>, vector<1x128xf32>
    tpu.vector_store %arg7[%c0_16, %c0_17], %28 {strides = array<i32>} : memref<1x128xf32, #tpu.memory_space<vmem>>, vector<1x128xf32>,
    %c0_18 = arith.constant 0 : index
    %c0_19 = arith.constant 0 : index
    %30 = vector.load %arg8[%c0_18, %c0_19] : memref<1x128xf32, #tpu.memory_space<vmem>>, vector<1x128xf32>
    %31 = arith.mulf %22, %22 : vector<256x128xf32>
    %cst_20 = arith.constant dense<0.000000e+00> : vector<128xf32>
    %32 = vector.multi_reduction <add>, %31, %cst_20 [0] : vector<256x128xf32> to vector<128xf32>
    %33 = vector.shape_cast %32 : vector<128xf32> to vector<1x128xf32>
    %34 = arith.addf %30, %33 : vector<1x128xf32>
    %c0_21 = arith.constant 0 : index
    %c0_22 = arith.constant 0 : index
    %35 = vector.load %arg8[%c0_21, %c0_22] : memref<1x128xf32, #tpu.memory_space<vmem>>, vector<1x128xf32>
    tpu.vector_store %arg8[%c0_21, %c0_22], %34 {strides = array<i32>} : memref<1x128xf32, #tpu.memory_space<vmem>>, vector<1x128xf32>,
    return
  }
  func.func @transform_0(%arg0: i32) -> (i32, i32) {
    %c0_i32 = arith.constant 0 : i32
    %c0_i32_0 = arith.constant 0 : i32
    return %arg0, %c0_i32 : i32, i32
  }
  func.func @transform_1(%arg0: i32) -> (i32, i32) {
    %c0_i32 = arith.constant 0 : i32
    %c0_i32_0 = arith.constant 0 : i32
    %c0_i32_1 = arith.constant 0 : i32
    return %c0_i32, %c0_i32_0 : i32, i32
  }
  func.func @transform_2(%arg0: i32) -> (i32, i32) {
    %c0_i32 = arith.constant 0 : i32
    %c0_i32_0 = arith.constant 0 : i32
    return %arg0, %c0_i32 : i32, i32
  }
  func.func @transform_3(%arg0: i32) -> (i32, i32) {
    %c0_i32 = arith.constant 0 : i32
    %c0_i32_0 = arith.constant 0 : i32
    %c0_i32_1 = arith.constant 0 : i32
    return %c0_i32, %c0_i32_0 : i32, i32
  }
  func.func @transform_4(%arg0: i32) -> (i32, i32) {
    %c0_i32 = arith.constant 0 : i32
    %c0_i32_0 = arith.constant 0 : i32
    %c0_i32_1 = arith.constant 0 : i32
    return %c0_i32, %c0_i32_0 : i32, i32
  }
  func.func @transform_5(%arg0: i32) -> (i32, i32) {
    %c0_i32 = arith.constant 0 : i32
    %c0_i32_0 = arith.constant 0 : i32
    return %arg0, %c0_i32 : i32, i32
  }
  func.func @transform_6(%arg0: i32) -> (i32, i32) {
    %c0_i32 = arith.constant 0 : i32
    %c0_i32_0 = arith.constant 0 : i32
    %c0_i32_1 = arith.constant 0 : i32
    return %c0_i32, %c0_i32_0 : i32, i32
  }
  func.func @transform_7(%arg0: i32) -> (i32, i32) {
    %c0_i32 = arith.constant 0 : i32
    %c0_i32_0 = arith.constant 0 : i32
    %c0_i32_1 = arith.constant 0 : i32
    return %c0_i32, %c0_i32_0 : i32, i32
  }
}

module attributes {stable_mosaic.version = 11 : i64} {
  func.func @_matmul_stats_kernel(%arg0: i32, %arg1: memref<256x256xbf16, #tpu.memory_space<vmem>>, %arg2: memref<256x128xbf16, #tpu.memory_space<vmem>>, %arg3: memref<256x128xbf16, #tpu.memory_space<vmem>>, %arg4: memref<1x128xf32, #tpu.memory_space<vmem>>, %arg5: memref<1x128xf32, #tpu.memory_space<vmem>>) attributes {dimension_semantics = [#tpu.dimension_semantics<arbitrary>], iteration_bounds = array<i64: 4>, scalar_prefetch = 0 : i64, scratch_operands = 0 : i64, tpu.core_type = #tpu.core_type<tc>, window_params = [{transform_indices = @transform_0, window_bounds = array<i64: 256, 256>}, {pipeline_mode = #tpu.pipeline_mode<synchronous>, transform_indices = @transform_1, window_bounds = array<i64: 256, 128>}, {transform_indices = @transform_2, window_bounds = array<i64: 256, 128>}, {pipeline_mode = #tpu.pipeline_mode<synchronous>, transform_indices = @transform_3, window_bounds = array<i64: 1, 128>}, {pipeline_mode = #tpu.pipeline_mode<synchronous>, transform_indices = @transform_4, window_bounds = array<i64: 1, 128>}]} {
    %c0_i32 = arith.constant 0 : i32
    %0 = arith.cmpi eq, %arg0, %c0_i32 : i32
    %1 = arith.extui %0 : i1 to i32
    %c0_i32_0 = arith.constant 0 : i32
    %2 = arith.cmpi ne, %1, %c0_i32_0 : i32
    scf.if %2 {
      %cst_16 = arith.constant 0.000000e+00 : f32
      %19 = vector.broadcast %cst_16 : f32 to vector<1x128xf32>
      %c0_17 = arith.constant 0 : index
      %c0_18 = arith.constant 0 : index
      %20 = vector.load %arg4[%c0_17, %c0_18] : memref<1x128xf32, #tpu.memory_space<vmem>>, vector<1x128xf32>
      tpu.vector_store %arg4[%c0_17, %c0_18], %19 {strides = array<i32>} : memref<1x128xf32, #tpu.memory_space<vmem>>, vector<1x128xf32>,
      %cst_19 = arith.constant 0.000000e+00 : f32
      %21 = vector.broadcast %cst_19 : f32 to vector<1x128xf32>
      %c0_20 = arith.constant 0 : index
      %c0_21 = arith.constant 0 : index
      %22 = vector.load %arg5[%c0_20, %c0_21] : memref<1x128xf32, #tpu.memory_space<vmem>>, vector<1x128xf32>
      tpu.vector_store %arg5[%c0_20, %c0_21], %21 {strides = array<i32>} : memref<1x128xf32, #tpu.memory_space<vmem>>, vector<1x128xf32>,
    } else {
    }
    %c0 = arith.constant 0 : index
    %c0_1 = arith.constant 0 : index
    %3 = vector.load %arg1[%c0, %c0_1] : memref<256x256xbf16, #tpu.memory_space<vmem>>, vector<256x256xbf16>
    %c0_2 = arith.constant 0 : index
    %c0_3 = arith.constant 0 : index
    %4 = vector.load %arg2[%c0_2, %c0_3] : memref<256x128xbf16, #tpu.memory_space<vmem>>, vector<256x128xbf16>
    %cst = arith.constant dense<0.000000e+00> : vector<256x128xf32>
    %5 = tpu.matmul %3, %4, %cst {dimension_numbers = #tpu.dot_dimension_numbers<[1], [0], [0], [1], [0, 0, 1, 1], [], []>} : vector<256x256xbf16>, vector<256x128xbf16>, vector<256x128xf32> -> vector<256x128xf32>
    %6 = arith.truncf %5 : vector<256x128xf32> to vector<256x128xbf16>
    %c0_4 = arith.constant 0 : index
    %c0_5 = arith.constant 0 : index
    %7 = vector.load %arg3[%c0_4, %c0_5] : memref<256x128xbf16, #tpu.memory_space<vmem>>, vector<256x128xbf16>
    tpu.vector_store %arg3[%c0_4, %c0_5], %6 {strides = array<i32>} : memref<256x128xbf16, #tpu.memory_space<vmem>>, vector<256x128xbf16>,
    %c0_6 = arith.constant 0 : index
    %c0_7 = arith.constant 0 : index
    %8 = vector.load %arg4[%c0_6, %c0_7] : memref<1x128xf32, #tpu.memory_space<vmem>>, vector<1x128xf32>
    %cst_8 = arith.constant dense<0.000000e+00> : vector<128xf32>
    %9 = vector.multi_reduction <add>, %5, %cst_8 [0] : vector<256x128xf32> to vector<128xf32>
    %10 = vector.shape_cast %9 : vector<128xf32> to vector<1x128xf32>
    %11 = arith.addf %8, %10 : vector<1x128xf32>
    %c0_9 = arith.constant 0 : index
    %c0_10 = arith.constant 0 : index
    %12 = vector.load %arg4[%c0_9, %c0_10] : memref<1x128xf32, #tpu.memory_space<vmem>>, vector<1x128xf32>
    tpu.vector_store %arg4[%c0_9, %c0_10], %11 {strides = array<i32>} : memref<1x128xf32, #tpu.memory_space<vmem>>, vector<1x128xf32>,
    %c0_11 = arith.constant 0 : index
    %c0_12 = arith.constant 0 : index
    %13 = vector.load %arg5[%c0_11, %c0_12] : memref<1x128xf32, #tpu.memory_space<vmem>>, vector<1x128xf32>
    %14 = arith.mulf %5, %5 : vector<256x128xf32>
    %cst_13 = arith.constant dense<0.000000e+00> : vector<128xf32>
    %15 = vector.multi_reduction <add>, %14, %cst_13 [0] : vector<256x128xf32> to vector<128xf32>
    %16 = vector.shape_cast %15 : vector<128xf32> to vector<1x128xf32>
    %17 = arith.addf %13, %16 : vector<1x128xf32>
    %c0_14 = arith.constant 0 : index
    %c0_15 = arith.constant 0 : index
    %18 = vector.load %arg5[%c0_14, %c0_15] : memref<1x128xf32, #tpu.memory_space<vmem>>, vector<1x128xf32>
    tpu.vector_store %arg5[%c0_14, %c0_15], %17 {strides = array<i32>} : memref<1x128xf32, #tpu.memory_space<vmem>>, vector<1x128xf32>,
    return
  }
  func.func @transform_0(%arg0: i32) -> (i32, i32) {
    %c0_i32 = arith.constant 0 : i32
    %c0_i32_0 = arith.constant 0 : i32
    return %arg0, %c0_i32 : i32, i32
  }
  func.func @transform_1(%arg0: i32) -> (i32, i32) {
    %c0_i32 = arith.constant 0 : i32
    %c0_i32_0 = arith.constant 0 : i32
    %c0_i32_1 = arith.constant 0 : i32
    return %c0_i32, %c0_i32_0 : i32, i32
  }
  func.func @transform_2(%arg0: i32) -> (i32, i32) {
    %c0_i32 = arith.constant 0 : i32
    %c0_i32_0 = arith.constant 0 : i32
    return %arg0, %c0_i32 : i32, i32
  }
  func.func @transform_3(%arg0: i32) -> (i32, i32) {
    %c0_i32 = arith.constant 0 : i32
    %c0_i32_0 = arith.constant 0 : i32
    %c0_i32_1 = arith.constant 0 : i32
    return %c0_i32, %c0_i32_0 : i32, i32
  }
  func.func @transform_4(%arg0: i32) -> (i32, i32) {
    %c0_i32 = arith.constant 0 : i32
    %c0_i32_0 = arith.constant 0 : i32
    %c0_i32_1 = arith.constant 0 : i32
    return %c0_i32, %c0_i32_0 : i32, i32
  }
}

module attributes {stable_mosaic.version = 11 : i64} {
  func.func @_matmul_stats_kernel(%arg0: i32, %arg1: memref<256x256xbf16, #tpu.memory_space<vmem>>, %arg2: memref<256x128xbf16, #tpu.memory_space<vmem>>, %arg3: memref<256x128xbf16, #tpu.memory_space<vmem>>, %arg4: memref<256x128xf32, #tpu.memory_space<vmem>>, %arg5: memref<1x128xf32, #tpu.memory_space<vmem>>, %arg6: memref<1x128xf32, #tpu.memory_space<vmem>>) attributes {dimension_semantics = [#tpu.dimension_semantics<arbitrary>], iteration_bounds = array<i64: 4>, scalar_prefetch = 0 : i64, scratch_operands = 0 : i64, tpu.core_type = #tpu.core_type<tc>, window_params = [{transform_indices = @transform_0, window_bounds = array<i64: 256, 256>}, {pipeline_mode = #tpu.pipeline_mode<synchronous>, transform_indices = @transform_1, window_bounds = array<i64: 256, 128>}, {transform_indices = @transform_2, window_bounds = array<i64: 256, 128>}, {transform_indices = @transform_3, window_bounds = array<i64: 256, 128>}, {pipeline_mode = #tpu.pipeline_mode<synchronous>, transform_indices = @transform_4, window_bounds = array<i64: 1, 128>}, {pipeline_mode = #tpu.pipeline_mode<synchronous>, transform_indices = @transform_5, window_bounds = array<i64: 1, 128>}]} {
    %c0_i32 = arith.constant 0 : i32
    %0 = arith.cmpi eq, %arg0, %c0_i32 : i32
    %1 = arith.extui %0 : i1 to i32
    %c0_i32_0 = arith.constant 0 : i32
    %2 = arith.cmpi ne, %1, %c0_i32_0 : i32
    scf.if %2 {
      %cst_18 = arith.constant 0.000000e+00 : f32
      %21 = vector.broadcast %cst_18 : f32 to vector<1x128xf32>
      %c0_19 = arith.constant 0 : index
      %c0_20 = arith.constant 0 : index
      %22 = vector.load %arg5[%c0_19, %c0_20] : memref<1x128xf32, #tpu.memory_space<vmem>>, vector<1x128xf32>
      tpu.vector_store %arg5[%c0_19, %c0_20], %21 {strides = array<i32>} : memref<1x128xf32, #tpu.memory_space<vmem>>, vector<1x128xf32>,
      %cst_21 = arith.constant 0.000000e+00 : f32
      %23 = vector.broadcast %cst_21 : f32 to vector<1x128xf32>
      %c0_22 = arith.constant 0 : index
      %c0_23 = arith.constant 0 : index
      %24 = vector.load %arg6[%c0_22, %c0_23] : memref<1x128xf32, #tpu.memory_space<vmem>>, vector<1x128xf32>
      tpu.vector_store %arg6[%c0_22, %c0_23], %23 {strides = array<i32>} : memref<1x128xf32, #tpu.memory_space<vmem>>, vector<1x128xf32>,
    } else {
    }
    %c0 = arith.constant 0 : index
    %c0_1 = arith.constant 0 : index
    %3 = vector.load %arg1[%c0, %c0_1] : memref<256x256xbf16, #tpu.memory_space<vmem>>, vector<256x256xbf16>
    %c0_2 = arith.constant 0 : index
    %c0_3 = arith.constant 0 : index
    %4 = vector.load %arg2[%c0_2, %c0_3] : memref<256x128xbf16, #tpu.memory_space<vmem>>, vector<256x128xbf16>
    %cst = arith.constant dense<0.000000e+00> : vector<256x128xf32>
    %5 = tpu.matmul %3, %4, %cst {dimension_numbers = #tpu.dot_dimension_numbers<[1], [0], [0], [1], [0, 0, 1, 1], [], []>} : vector<256x256xbf16>, vector<256x128xbf16>, vector<256x128xf32> -> vector<256x128xf32>
    %c0_4 = arith.constant 0 : index
    %c0_5 = arith.constant 0 : index
    %6 = vector.load %arg3[%c0_4, %c0_5] : memref<256x128xbf16, #tpu.memory_space<vmem>>, vector<256x128xbf16>
    %7 = arith.extf %6 : vector<256x128xbf16> to vector<256x128xf32>
    %8 = arith.addf %5, %7 : vector<256x128xf32>
    %c0_6 = arith.constant 0 : index
    %c0_7 = arith.constant 0 : index
    %9 = vector.load %arg4[%c0_6, %c0_7] : memref<256x128xf32, #tpu.memory_space<vmem>>, vector<256x128xf32>
    tpu.vector_store %arg4[%c0_6, %c0_7], %8 {strides = array<i32>} : memref<256x128xf32, #tpu.memory_space<vmem>>, vector<256x128xf32>,
    %c0_8 = arith.constant 0 : index
    %c0_9 = arith.constant 0 : index
    %10 = vector.load %arg5[%c0_8, %c0_9] : memref<1x128xf32, #tpu.memory_space<vmem>>, vector<1x128xf32>
    %cst_10 = arith.constant dense<0.000000e+00> : vector<128xf32>
    %11 = vector.multi_reduction <add>, %8, %cst_10 [0] : vector<256x128xf32> to vector<128xf32>
    %12 = vector.shape_cast %11 : vector<128xf32> to vector<1x128xf32>
    %13 = arith.addf %10, %12 : vector<1x128xf32>
    %c0_11 = arith.constant 0 : index
    %c0_12 = arith.constant 0 : index
    %14 = vector.load %arg5[%c0_11, %c0_12] : memref<1x128xf32, #tpu.memory_space<vmem>>, vector<1x128xf32>
    tpu.vector_store %arg5[%c0_11, %c0_12], %13 {strides = array<i32>} : memref<1x128xf32, #tpu.memory_space<vmem>>, vector<1x128xf32>,
    %c0_13 = arith.constant 0 : index
    %c0_14 = arith.constant 0 : index
    %15 = vector.load %arg6[%c0_13, %c0_14] : memref<1x128xf32, #tpu.memory_space<vmem>>, vector<1x128xf32>
    %16 = arith.mulf %8, %8 : vector<256x128xf32>
    %cst_15 = arith.constant dense<0.000000e+00> : vector<128xf32>
    %17 = vector.multi_reduction <add>, %16, %cst_15 [0] : vector<256x128xf32> to vector<128xf32>
    %18 = vector.shape_cast %17 : vector<128xf32> to vector<1x128xf32>
    %19 = arith.addf %15, %18 : vector<1x128xf32>
    %c0_16 = arith.constant 0 : index
    %c0_17 = arith.constant 0 : index
    %20 = vector.load %arg6[%c0_16, %c0_17] : memref<1x128xf32, #tpu.memory_space<vmem>>, vector<1x128xf32>
    tpu.vector_store %arg6[%c0_16, %c0_17], %19 {strides = array<i32>} : memref<1x128xf32, #tpu.memory_space<vmem>>, vector<1x128xf32>,
    return
  }
  func.func @transform_0(%arg0: i32) -> (i32, i32) {
    %c0_i32 = arith.constant 0 : i32
    %c0_i32_0 = arith.constant 0 : i32
    return %arg0, %c0_i32 : i32, i32
  }
  func.func @transform_1(%arg0: i32) -> (i32, i32) {
    %c0_i32 = arith.constant 0 : i32
    %c0_i32_0 = arith.constant 0 : i32
    %c0_i32_1 = arith.constant 0 : i32
    return %c0_i32, %c0_i32_0 : i32, i32
  }
  func.func @transform_2(%arg0: i32) -> (i32, i32) {
    %c0_i32 = arith.constant 0 : i32
    %c0_i32_0 = arith.constant 0 : i32
    return %arg0, %c0_i32 : i32, i32
  }
  func.func @transform_3(%arg0: i32) -> (i32, i32) {
    %c0_i32 = arith.constant 0 : i32
    %c0_i32_0 = arith.constant 0 : i32
    return %arg0, %c0_i32 : i32, i32
  }
  func.func @transform_4(%arg0: i32) -> (i32, i32) {
    %c0_i32 = arith.constant 0 : i32
    %c0_i32_0 = arith.constant 0 : i32
    %c0_i32_1 = arith.constant 0 : i32
    return %c0_i32, %c0_i32_0 : i32, i32
  }
  func.func @transform_5(%arg0: i32) -> (i32, i32) {
    %c0_i32 = arith.constant 0 : i32
    %c0_i32_0 = arith.constant 0 : i32
    %c0_i32_1 = arith.constant 0 : i32
    return %c0_i32, %c0_i32_0 : i32, i32
  }
}

</mosaic_0001>

<bundles_post_ra>
// kernel: graph_res_blocks_forward.10
= control target key start
LH: loop header
LB: loop body
LE: loop exit
PB: predicated region body
PF: predicated region fallthrough
CT: control target
= control target key end

     0   :  { %s466_s9 = smov 0   ;;  %s516_s0 = inlined_call_operand.vmem [shape: bf16[1024,128], index: 0, kind: input, shape index: {}]   ;;  %s517_s1 = inlined_call_operand.vmem [shape: f32[1,128], index: 1, kind: output, shape index: {0}]   ;;  %s518_s2 = inlined_call_operand.vmem [shape: f32[1,128], index: 2, kind: output, shape index: {1}]  }
   0x1 LB: > { %s345_s10 = sadd.s32 4294967295, %s448_s9   ;;  %p348_p0 = scmp.ge.s32.totalorder %s448_s9, 1  ;;  %s448_s9 = sphi %s466_s9, %s13_s9  }
   0x2   : > { %p106_p1 = scmp.lt.s32.totalorder %s448_s9, 5 }
   0x4   : > { %p107_p2 = pnand %p348_p0, %p106_p1 }
   0x5   : > { %s349_s11 = sshll.u32 (!%p107_p2), %s345_s10, 5  ;;  %p351_p4 = scmp.ne.s32.totalorder (!%p107_p2), %s345_s10, 0 }
   0x6   : > { %110 = sbr.rel (%p107_p2) target bundleno = 102 (0x66), region = 24  ;;  %p124_p3 = scmp.lt.s32.totalorder (!%p107_p2), %s349_s11, 127 }
   0xd   : > { %s520_s11 = smov (!%p124_p3, %s349_s11), 127  ;;  %132 = sbr.rel (%p351_p4) target bundleno = 20 (0x14), region = 28 }
   0xe   : > { %s350_s12 = sshll.u32 %s520_s11, 2  ;;  %v450_v0 = vmov (!%p351_p4), 0.0  }
   0xf   : > { %s477_s15 = scalar_lea.vmem %s516_s0, %s350_s12  ;;  %133 = vst [vmem:[%s517_s1] sm:$0x1] (!%p351_p4), %v450_v0  ;;  %134 = vst [vmem:[%s518_s2] sm:$0x1] (!%p351_p4), %v450_v0 }
  0x14 PF: > { %v355_v1 = vld [vmem:[%s477_s15] sm:$0xff]   ;;  %v418_v2 = vld [vmem:[%s477_s15 + $0x8] sm:$0xff]   ;;  %v419_v7 = vld [vmem:[%s477_s15 + $0x10] sm:$0xff]  }
  0x15   : > { %v356_v3 = vunpack.c.l.bf16 %v355_v1  ;;  %v357_v4 = vunpack.c.h.bf16 %v355_v1  ;;  %v360_v5 = vunpack.c.l.bf16 %v418_v2  ;;  %v361_v8 = vunpack.c.h.bf16 %v418_v2  ;;  %v420_v12 = vld [vmem:[%s477_s15 + $0x18] sm:$0xff]   ;;  %v421_v20 = vld [vmem:[%s477_s15 + $0x20] sm:$0xff]   ;;  %v422_v29 = vld [vmem:[%s477_s15 + $0x28] sm:$0xff]  }
  0x16   : > { %v364_v10 = vunpack.c.l.bf16 %v419_v7  ;;  %v365_v15 = vunpack.c.h.bf16 %v419_v7  ;;  %v368_v18 = vunpack.c.l.bf16 %v420_v12  ;;  %v369_v23 = vunpack.c.h.bf16 %v420_v12  ;;  %v423_v38 = vld [vmem:[%s477_s15 + $0x30] sm:$0xff]   ;;  %v424_v47 = vld [vmem:[%s477_s15 + $0x38] sm:$0xff]   ;;  %v425_v56 = vld [vmem:[%s477_s15 + $0x40] sm:$0xff]  }
  0x17   : > { %v200_v6 = vadd.f32 %v357_v4, %v356_v3  ;;  %v240_v13 = vmul.f32 %v356_v3, %v356_v3  ;;  %v241_v14 = vmul.f32 %v357_v4, %v357_v4  ;;  %v242_v17 = vmul.f32 %v360_v5, %v360_v5  ;;  %v426_v1 = vld [vmem:[%s477_s15 + $0x48] sm:$0xff]  }
  0x18   : > { %v243_v21 = vmul.f32 %v361_v8, %v361_v8  ;;  %v244_v25 = vmul.f32 %v364_v10, %v364_v10  ;;  %v372_v27 = vunpack.c.l.bf16 %v421_v20  ;;  %v245_v30 = vmul.f32 %v365_v15, %v365_v15 }
  0x19   : > { %v201_v9 = vadd.f32 %v360_v5, %v200_v6  ;;  %v272_v22 = vadd.f32 %v241_v14, %v240_v13  ;;  %v373_v32 = vunpack.c.h.bf16 %v421_v20  ;;  %v246_v34 = vmul.f32 %v368_v18, %v368_v18 }
  0x1a   : > { %v376_v36 = vunpack.c.l.bf16 %v422_v29  ;;  %v247_v39 = vmul.f32 %v369_v23, %v369_v23  ;;  %v377_v41 = vunpack.c.h.bf16 %v422_v29  ;;  %v248_v43 = vmul.f32 %v372_v27, %v372_v27 }
  0x1b   : > { %v202_v11 = vadd.f32 %v361_v8, %v201_v9  ;;  %v273_v26 = vadd.f32 %v272_v22, %v242_v17  ;;  %v380_v45 = vunpack.c.l.bf16 %v423_v38  ;;  %v249_v48 = vmul.f32 %v373_v32, %v373_v32 }
  0x1c   : > { %v381_v50 = vunpack.c.h.bf16 %v423_v38  ;;  %v250_v52 = vmul.f32 %v376_v36, %v376_v36  ;;  %v384_v54 = vunpack.c.l.bf16 %v424_v47  ;;  %v251_v57 = vmul.f32 %v377_v41, %v377_v41 }
  0x1d   : > { %v203_v16 = vadd.f32 %v364_v10, %v202_v11  ;;  %v274_v31 = vadd.f32 %v273_v26, %v243_v21  ;;  %v385_v59 = vunpack.c.h.bf16 %v424_v47  ;;  %v252_v61 = vmul.f32 %v380_v45, %v380_v45  ;;  %v427_v10 = vld [vmem:[%s477_s15 + $0x50] sm:$0xff]  }
  0x1e   : > { %v388_v63 = vunpack.c.l.bf16 %v425_v56  ;;  %v253_v2 = vmul.f32 %v381_v50, %v381_v50  ;;  %v389_v4 = vunpack.c.h.bf16 %v425_v56  ;;  %v254_v6 = vmul.f32 %v384_v54, %v384_v54 }
  0x1f   : > { %v204_v19 = vadd.f32 %v365_v15, %v203_v16  ;;  %v275_v35 = vadd.f32 %v274_v31, %v244_v25  ;;  %v392_v8 = vunpack.c.l.bf16 %v426_v1  ;;  %v255_v11 = vmul.f32 %v385_v59, %v385_v59 }
  0x20   : > { %v393_v13 = vunpack.c.h.bf16 %v426_v1  ;;  %v256_v15 = vmul.f32 %v388_v63, %v388_v63  ;;  %v396_v17 = vunpack.c.l.bf16 %v427_v10  ;;  %v257_v20 = vmul.f32 %v389_v4, %v389_v4 }
  0x21   : > { %v205_v24 = vadd.f32 %v368_v18, %v204_v19  ;;  %v276_v40 = vadd.f32 %v275_v35, %v245_v30  ;;  %v428_v19 = vld [vmem:[%s477_s15 + $0x58] sm:$0xff]   ;;  %v397_v22 = vunpack.c.h.bf16 %v427_v10 }
  0x22   : > { %v400_v26 = vunpack.c.l.bf16 %v428_v19  ;;  %v259_v29 = vmul.f32 %v393_v13, %v393_v13  ;;  %v401_v31 = vunpack.c.h.bf16 %v428_v19 }
  0x23   : > { %v206_v28 = vadd.f32 %v369_v23, %v205_v24  ;;  %v277_v44 = vadd.f32 %v276_v40, %v246_v34  ;;  %v258_v24 = vmul.f32 %v392_v8, %v392_v8  ;;  %v261_v38 = vmul.f32 %v397_v22, %v397_v22 }
  0x24   : > { %v263_v47 = vmul.f32 %v401_v31, %v401_v31 }
  0x25   : > { %v207_v33 = vadd.f32 %v372_v27, %v206_v28  ;;  %v278_v49 = vadd.f32 %v277_v44, %v247_v39  ;;  %v429_v28 = vld [vmem:[%s477_s15 + $0x60] sm:$0xff]  }
  0x26   : > { %v404_v35 = vunpack.c.l.bf16 %v429_v28  ;;  %v405_v40 = vunpack.c.h.bf16 %v429_v28  ;;  %v239_v28 = vld [vmem:[%s518_s2] sm:$0x1] }
  0x27   : > { %v208_v37 = vadd.f32 %v373_v32, %v207_v33  ;;  %v279_v53 = vadd.f32 %v278_v49, %v248_v43  ;;  %v260_v33 = vmul.f32 %v396_v17, %v396_v17 }
  0x28   : > { %v265_v56 = vmul.f32 %v405_v40, %v405_v40 }
  0x29   : > { %v209_v42 = vadd.f32 %v376_v36, %v208_v37  ;;  %v280_v58 = vadd.f32 %v279_v53, %v249_v48  ;;  %v430_v37 = vld [vmem:[%s477_s15 + $0x68] sm:$0xff]  }
  0x2a   : > { %v408_v44 = vunpack.c.l.bf16 %v430_v37  ;;  %v409_v49 = vunpack.c.h.bf16 %v430_v37 }
  0x2b   : > { %v210_v46 = vadd.f32 %v377_v41, %v209_v42  ;;  %v281_v62 = vadd.f32 %v280_v58, %v250_v52  ;;  %v262_v42 = vmul.f32 %v400_v26, %v400_v26 }
  0x2d   : > { %v211_v51 = vadd.f32 %v380_v45, %v210_v46  ;;  %v282_v3 = vadd.f32 %v281_v62, %v251_v57  ;;  %v431_v46 = vld [vmem:[%s477_s15 + $0x70] sm:$0xff]  }
  0x2e   : > { %v412_v53 = vunpack.c.l.bf16 %v431_v46  ;;  %v413_v58 = vunpack.c.h.bf16 %v431_v46 }
  0x2f   : > { %v212_v55 = vadd.f32 %v381_v50, %v211_v51  ;;  %v283_v7 = vadd.f32 %v282_v3, %v252_v61  ;;  %v264_v51 = vmul.f32 %v404_v35, %v404_v35 }
  0x31   : > { %v213_v60 = vadd.f32 %v384_v54, %v212_v55  ;;  %v284_v12 = vadd.f32 %v283_v7, %v253_v2  ;;  %v432_v55 = vld [vmem:[%s477_s15 + $0x78] sm:$0xff]   ;;  %v269_v7 = vmul.f32 %v413_v58, %v413_v58 }
  0x32   : > { %v416_v62 = vunpack.c.l.bf16 %v432_v55  ;;  %v417_v2 = vunpack.c.h.bf16 %v432_v55 }
  0x33   : > { %v214_v0 = vadd.f32 %v385_v59, %v213_v60  ;;  %v285_v16 = vadd.f32 %v284_v12, %v254_v6  ;;  %v266_v60 = vmul.f32 %v408_v44, %v408_v44 }
  0x34   : > { %v270_v10 = vmul.f32 %v416_v62, %v416_v62 }
  0x35   : > { %v215_v5 = vadd.f32 %v388_v63, %v214_v0  ;;  %v286_v21 = vadd.f32 %v285_v16, %v255_v11  ;;  %v267_v0 = vmul.f32 %v409_v49, %v409_v49 }
  0x37   : > { %v216_v9 = vadd.f32 %v389_v4, %v215_v5  ;;  %v287_v25 = vadd.f32 %v286_v21, %v256_v15  ;;  %v268_v4 = vmul.f32 %v412_v53, %v412_v53 }
  0x39   : > { %v217_v14 = vadd.f32 %v392_v8, %v216_v9  ;;  %v288_v30 = vadd.f32 %v287_v25, %v257_v20  ;;  %v199_v20 = vld [vmem:[%s517_s1] sm:$0x1] }
  0x3b   : > { %v218_v18 = vadd.f32 %v393_v13, %v217_v14  ;;  %v289_v34 = vadd.f32 %v288_v30, %v258_v24  ;;  %v271_v13 = vmul.f32 %v417_v2, %v417_v2 }
  0x3d   : > { %v219_v23 = vadd.f32 %v396_v17, %v218_v18  ;;  %v290_v39 = vadd.f32 %v289_v34, %v259_v29 }
  0x3f   : > { %v220_v27 = vadd.f32 %v397_v22, %v219_v23  ;;  %v291_v43 = vadd.f32 %v290_v39, %v260_v33 }
  0x41   : > { %v221_v32 = vadd.f32 %v400_v26, %v220_v27  ;;  %v292_v48 = vadd.f32 %v291_v43, %v261_v38 }
  0x43   : > { %v222_v36 = vadd.f32 %v401_v31, %v221_v32  ;;  %v293_v52 = vadd.f32 %v292_v48, %v262_v42 }
  0x45   : > { %v223_v41 = vadd.f32 %v404_v35, %v222_v36  ;;  %v294_v57 = vadd.f32 %v293_v52, %v263_v47 }
  0x47   : > { %v224_v45 = vadd.f32 %v405_v40, %v223_v41  ;;  %v295_v61 = vadd.f32 %v294_v57, %v264_v51 }
  0x49   : > { %v225_v50 = vadd.f32 %v408_v44, %v224_v45  ;;  %v296_v1 = vadd.f32 %v295_v61, %v265_v56 }
  0x4b   : > { %v226_v54 = vadd.f32 %v409_v49, %v225_v50  ;;  %v297_v5 = vadd.f32 %v296_v1, %v266_v60 }
  0x4d   : > { %v227_v59 = vadd.f32 %v412_v53, %v226_v54  ;;  %v298_v8 = vadd.f32 %v297_v5, %v267_v0 }
  0x4f   : > { %v228_v63 = vadd.f32 %v413_v58, %v227_v59  ;;  %v299_v11 = vadd.f32 %v298_v8, %v268_v4 }
  0x51   : > { %v229_v3 = vadd.f32 %v416_v62, %v228_v63  ;;  %v300_v14 = vadd.f32 %v299_v11, %v269_v7 }
  0x53   : > { %v230_v6 = vadd.f32 %v417_v2, %v229_v3  ;;  %v301_v16 = vadd.f32 %v300_v14, %v270_v10 }
  0x55   : > { %v231_v9 = vrot.slane %v230_v6, 4  ;;  %v302_v18 = vadd.f32 %v301_v16, %v271_v13 }
  0x57   : > { %v232_v12 = vadd.f32 %v231_v9, %v230_v6  ;;  %v303_v21 = vrot.slane %v302_v18, 4 }
  0x59   : > { %v233_v15 = vrot.slane %v232_v12, 2  ;;  %v304_v23 = vadd.f32 %v303_v21, %v302_v18 }
  0x5b   : > { %v234_v17 = vadd.f32 %v233_v15, %v232_v12  ;;  %v305_v25 = vrot.slane %v304_v23, 2 }
  0x5d   : > { %v235_v19 = vrot.slane %v234_v17, 1  ;;  %v306_v26 = vadd.f32 %v305_v25, %v304_v23 }
  0x5f   : > { %v236_v22 = vadd.f32 %v235_v19, %v234_v17  ;;  %v307_v27 = vrot.slane %v306_v26, 1 }
  0x61   : > { %v237_v24 = vadd.f32 %v236_v22, %v199_v20  ;;  %v308_v29 = vadd.f32 %v307_v27, %v306_v26 }
  0x63   : > { %238 = vst [vmem:[%s517_s1] sm:$0x1] %v237_v24  ;;  %v309_v30 = vadd.f32 %v308_v29, %v239_v28 }
  0x65   : > { %310 = vst [vmem:[%s518_s2] sm:$0x1] %v309_v30 }
  0x66 PF: > { %s13_s9 = sadd.s32 1, %s448_s9  }
  0x67   : > { %p10_p5 = scmp.ge.s32.totalorder %s13_s9, 6  }
  0x69   :  { %12 = sbr.rel (!%p10_p5) target bundleno = 1 (0x1), region = 62 }

// kernel: graph_res_blocks_forward.11
= control target key start
LH: loop header
LB: loop body
LE: loop exit
PB: predicated region body
PF: predicated region fallthrough
CT: control target
= control target key end

     0   :  { %s1203_s12 = smov 0   ;;  %s1471_s0 = inlined_call_operand.vmem [shape: bf16[1024,128], index: 0, kind: input, shape index: {}]   ;;  %s1472_s1 = inlined_call_operand.vmem [shape: f32[1,128], index: 1, kind: input, shape index: {}]   ;;  %s1473_s2 = inlined_call_operand.vmem [shape: f32[1,128], index: 2, kind: input, shape index: {}]   ;;  %s1474_s3 = inlined_call_operand.vmem [shape: bf16[1024,128], index: 3, kind: output, shape index: {}]  }
   0x1 LB: > { %s756_s13 = sadd.s32 4294967295, %s1181_s12   ;;  %p760_p0 = scmp.ge.s32.totalorder %s1181_s12, 1  ;;  %s1181_s12 = sphi %s1203_s12, %s13_s12  }
   0x2   : > { %p138_p1 = scmp.lt.s32.totalorder %s1181_s12, 5 }
   0x4   : > { %p139_p2 = pnand %p760_p0, %p138_p1 }
   0x5   : > { %s761_s14 = sshll.u32 (!%p139_p2), %s756_s13, 5  ;;  %v1224_v0 = vld [vmem:[%s1472_s1] ss:$0 sm:$0xff] (!%p139_p2) }
   0x6   : > { %142 = sbr.rel (%p139_p2) target bundleno = 111 (0x6f), region = 32  ;;  %p163_p3 = scmp.lt.s32.totalorder (!%p139_p2), %s761_s14, 127  ;;  %v1233_v9 = vld [vmem:[%s1473_s2] ss:$0 sm:$0xff] (!%p139_p2) }
   0xd   : > { %s1476_s14 = smov (!%p163_p3, %s761_s14), 127 }
   0xe   : > { %s762_s15 = sshll.u32 %s1476_s14, 2 }
   0xf   : > { %s1219_s18 = scalar_lea.vmem %s1471_s0, %s762_s15  ;;  %s1366_s25 = scalar_lea.vmem %s1474_s3, %s762_s15 }
  0x10   : > { %v866_v1 = vld [vmem:[%s1219_s18] sm:$0xff]   ;;  %v1009_v2 = vld [vmem:[%s1219_s18 + $0x8] sm:$0xff]   ;;  %v1010_v3 = vld [vmem:[%s1219_s18 + $0x10] sm:$0xff]  }
  0x11   : > { %v867_v4 = vunpack.c.l.bf16 %v866_v1  ;;  %v868_v5 = vunpack.c.h.bf16 %v866_v1  ;;  %v871_v6 = vunpack.c.l.bf16 %v1009_v2  ;;  %v872_v7 = vunpack.c.h.bf16 %v1009_v2  ;;  %v1011_v8 = vld [vmem:[%s1219_s18 + $0x18] sm:$0xff]   ;;  %v1012_v22 = vld [vmem:[%s1219_s18 + $0x20] sm:$0xff]   ;;  %v1013_v31 = vld [vmem:[%s1219_s18 + $0x28] sm:$0xff]  }
  0x12   : > { %v875_v10 = vunpack.c.l.bf16 %v1010_v3  ;;  %v876_v11 = vunpack.c.h.bf16 %v1010_v3  ;;  %v879_v12 = vunpack.c.l.bf16 %v1011_v8  ;;  %v880_v13 = vunpack.c.h.bf16 %v1011_v8  ;;  %v1014_v32 = vld [vmem:[%s1219_s18 + $0x30] sm:$0xff]   ;;  %v1015_v53 = vld [vmem:[%s1219_s18 + $0x38] sm:$0xff]   ;;  %v1016_v62 = vld [vmem:[%s1219_s18 + $0x40] sm:$0xff]  }
  0x13   : > { %v245_v14 = vmul.f32 %v867_v4, %v1224_v0  ;;  %v246_v15 = vmul.f32 %v868_v5, %v1224_v0  ;;  %v247_v16 = vmul.f32 %v871_v6, %v1224_v0  ;;  %v248_v17 = vmul.f32 %v872_v7, %v1224_v0  ;;  %v1017_v3 = vld [vmem:[%s1219_s18 + $0x48] sm:$0xff]  }
  0x14   : > { %v249_v18 = vmul.f32 %v875_v10, %v1224_v0  ;;  %v250_v19 = vmul.f32 %v876_v11, %v1224_v0  ;;  %v251_v20 = vmul.f32 %v879_v12, %v1224_v0  ;;  %v252_v21 = vmul.f32 %v880_v13, %v1224_v0 }
  0x15   : > { %v1245_v23 = vadd.f32 %v1233_v9, %v245_v14  ;;  %v1248_v24 = vadd.f32 %v1233_v9, %v246_v15  ;;  %v1251_v25 = vadd.f32 %v1233_v9, %v247_v16  ;;  %v1254_v26 = vadd.f32 %v1233_v9, %v248_v17 }
  0x16   : > { %v1257_v27 = vadd.f32 %v1233_v9, %v249_v18  ;;  %v1260_v28 = vadd.f32 %v1233_v9, %v250_v19  ;;  %v1263_v29 = vadd.f32 %v1233_v9, %v251_v20  ;;  %v1266_v30 = vadd.f32 %v1233_v9, %v252_v21 }
  0x17   : > { %v767_v33 = vmul.f32 -1.442695, %v1245_v23  ;;  %v768_v34 = vmul.f32 -1.442695, %v1248_v24  ;;  %v769_v35 = vmul.f32 -1.442695, %v1251_v25  ;;  %v883_v36 = vunpack.c.l.bf16 %v1012_v22 }
  0x18   : > { %v770_v37 = vmul.f32 -1.442695, %v1254_v26  ;;  %v771_v38 = vmul.f32 -1.442695, %v1257_v27  ;;  %v772_v39 = vmul.f32 -1.442695, %v1260_v28  ;;  %v884_v40 = vunpack.c.h.bf16 %v1012_v22 }
  0x19   : > { %1047 = vpow2.f32 %v767_v33  ;;  %v773_v41 = vmul.f32 -1.442695, %v1263_v29  ;;  %v774_v42 = vmul.f32 -1.442695, %v1266_v30  ;;  %v253_v43 = vmul.f32 %v883_v36, %v1224_v0 }
  0x1a   : > { %1049 = vpow2.f32 %v768_v34  ;;  %v254_v44 = vmul.f32 %v884_v40, %v1224_v0  ;;  %v887_v45 = vunpack.c.l.bf16 %v1013_v31  ;;  %v888_v46 = vunpack.c.h.bf16 %v1013_v31 }
  0x1b   : > { %1051 = vpow2.f32 %v769_v35  ;;  %v1281_v47 = vadd.f32 %v1233_v9, %v253_v43  ;;  %v891_v48 = vunpack.c.l.bf16 %v1014_v32  ;;  %v892_v49 = vunpack.c.h.bf16 %v1014_v32 }
  0x1c   : > { %1053 = vpow2.f32 %v770_v37  ;;  %v1284_v50 = vadd.f32 %v1233_v9, %v254_v44  ;;  %v255_v51 = vmul.f32 %v887_v45, %v1224_v0  ;;  %v256_v52 = vmul.f32 %v888_v46, %v1224_v0  ;;  %v1018_v37 = vld [vmem:[%s1219_s18 + $0x50] sm:$0xff]  }
  0x1d   : > { %1055 = vpow2.f32 %v771_v38  ;;  %v775_v54 = vmul.f32 -1.442695, %v1281_v47  ;;  %v257_v55 = vmul.f32 %v891_v48, %v1224_v0  ;;  %v258_v59 = vmul.f32 %v892_v49, %v1224_v0 }
  0x1e   : > { %1057 = vpow2.f32 %v772_v39  ;;  %v776_v56 = vmul.f32 -1.442695, %v1284_v50  ;;  %v1293_v57 = vadd.f32 %v1233_v9, %v255_v51  ;;  %v1296_v58 = vadd.f32 %v1233_v9, %v256_v52  ;;  %v1019_v52 = vld [vmem:[%s1219_s18 + $0x58] sm:$0xff]  }
  0x1f   : > { %1059 = vpow2.f32 %v773_v41  ;;  %v1300_v60 = vadd.f32 %v1233_v9, %v257_v55  ;;  %v895_v61 = vunpack.c.l.bf16 %v1015_v53  ;;  %v896_v2 = vunpack.c.h.bf16 %v1015_v53 }
  0x20   : > { %1061 = vpow2.f32 %v774_v42  ;;  %v777_v63 = vmul.f32 -1.442695, %v1293_v57  ;;  %v778_v1 = vmul.f32 -1.442695, %v1296_v58  ;;  %v899_v7 = vunpack.c.l.bf16 %v1016_v62 }
  0x21   : > { %1063 = vpow2.f32 %v775_v54  ;;  %v779_v4 = vmul.f32 -1.442695, %v1300_v60  ;;  %v259_v5 = vmul.f32 %v895_v61, %v1224_v0  ;;  %v260_v6 = vmul.f32 %v896_v2, %v1224_v0 }
  0x22   : > { %1065 = vpow2.f32 %v776_v56  ;;  %v900_v8 = vunpack.c.h.bf16 %v1016_v62  ;;  %v1310_v11 = vadd.f32 %v1233_v9, %v258_v59  ;;  %v903_v13 = vunpack.c.l.bf16 %v1017_v3 }
  0x23   : > { %v1048_v10 = vpop.eup %1047  ;;  %1067 = vpow2.f32 %v777_v63  ;;  %v1313_v12 = vadd.f32 %v1233_v9, %v259_v5  ;;  %v261_v16 = vmul.f32 %v899_v7, %v1224_v0  ;;  %v904_v17 = vunpack.c.h.bf16 %v1017_v3 }
  0x24   : > { %v1050_v14 = vpop.eup %1049  ;;  %v412_v15 = vadd.f32 1.0, %v1048_v10  ;;  %1069 = vpow2.f32 %v778_v1  ;;  %v1317_v20 = vadd.f32 %v1233_v9, %v260_v6  ;;  %v262_v21 = vmul.f32 %v900_v8, %v1224_v0 }
  0x25   : > { %v1052_v18 = vpop.eup %1051  ;;  %v413_v19 = vadd.f32 1.0, %v1050_v14  ;;  %1071 = vpow2.f32 %v779_v4  ;;  %v1321_v32 = vadd.f32 %v1233_v9, %v261_v16  ;;  %v780_v35 = vmul.f32 -1.442695, %v1310_v11  ;;  %v1020_v16 = vld [vmem:[%s1219_s18 + $0x60] sm:$0xff]  }
  0x26   : > { %v1054_v22 = vpop.eup %1053  ;;  %1073 = vrcp.f32 %v412_v15  ;;  %v414_v31 = vadd.f32 1.0, %v1052_v18  ;;  %v263_v36 = vmul.f32 %v903_v13, %v1224_v0  ;;  %v1327_v40 = vmul.f32 -1.442695, %v1313_v12 }
  0x27   : > { %v1056_v33 = vpop.eup %1055  ;;  %1075 = vrcp.f32 %v413_v19  ;;  %v415_v34 = vadd.f32 1.0, %v1054_v22  ;;  %v264_v41 = vmul.f32 %v904_v17, %v1224_v0  ;;  %v782_v44 = vmul.f32 -1.442695, %v1317_v20 }
  0x28   : > { %v1058_v38 = vpop.eup %1057  ;;  %1077 = vrcp.f32 %v414_v31  ;;  %v416_v39 = vadd.f32 1.0, %v1056_v33  ;;  %v1332_v45 = vadd.f32 %v1233_v9, %v262_v21  ;;  %v1335_v49 = vmul.f32 -1.442695, %v1321_v32 }
  0x29   : > { %v1060_v42 = vpop.eup %1059  ;;  %1079 = vrcp.f32 %v415_v34  ;;  %v417_v43 = vadd.f32 1.0, %v1058_v38  ;;  %v907_v51 = vunpack.c.l.bf16 %v1018_v37  ;;  %v1339_v55 = vadd.f32 %v1233_v9, %v263_v36 }
  0x2a   : > { %v1062_v46 = vpop.eup %1061  ;;  %1081 = vrcp.f32 %v416_v39  ;;  %v418_v48 = vadd.f32 1.0, %v1060_v42  ;;  %v908_v56 = vunpack.c.h.bf16 %v1018_v37  ;;  %v1342_v62 = vadd.f32 %v1233_v9, %v264_v41 }
  0x2b   : > { %v1064_v53 = vpop.eup %1063  ;;  %1083 = vrcp.f32 %v417_v43  ;;  %v419_v54 = vadd.f32 1.0, %v1062_v46  ;;  %v265_v63 = vmul.f32 %v907_v51, %v1224_v0  ;;  %v911_v4 = vunpack.c.l.bf16 %v1019_v52 }
  0x2c   : > { %v1066_v59 = vpop.eup %1065  ;;  %1085 = vrcp.f32 %v418_v48  ;;  %v420_v61 = vadd.f32 1.0, %v1064_v53  ;;  %v266_v3 = vmul.f32 %v908_v56, %v1224_v0  ;;  %v912_v8 = vunpack.c.h.bf16 %v1019_v52 }
  0x2d   : > { %v1068_v1 = vpop.eup %1067  ;;  %1087 = vrcp.f32 %v419_v54  ;;  %v421_v2 = vadd.f32 1.0, %v1066_v59  ;;  %v1347_v7 = vadd.f32 %v1233_v9, %v265_v63  ;;  %v784_v14 = vmul.f32 -1.442695, %v1332_v45 }
  0x2e   : > { %v1070_v5 = vpop.eup %1069  ;;  %1089 = vrcp.f32 %v420_v61  ;;  %v422_v6 = vadd.f32 1.0, %v1068_v1  ;;  %v267_v15 = vmul.f32 %v911_v4, %v1224_v0  ;;  %v785_v19 = vmul.f32 -1.442695, %v1339_v55 }
  0x2f   : > { %v1072_v10 = vpop.eup %1071  ;;  %1091 = vrcp.f32 %v421_v2  ;;  %v423_v13 = vadd.f32 1.0, %v1070_v5  ;;  %v268_v21 = vmul.f32 %v912_v8, %v1224_v0  ;;  %v786_v33 = vmul.f32 -1.442695, %v1342_v62 }
  0x30   : > { %v1074_v17 = vpop.eup %1073  ;;  %1093 = vrcp.f32 %v422_v6  ;;  %v424_v18 = vadd.f32 1.0, %v1072_v10  ;;  %v1357_v34 = vadd.f32 %v1233_v9, %v266_v3  ;;  %v787_v38 = vmul.f32 -1.442695, %v1347_v7 }
  0x31   : > { %v1076_v22 = vpop.eup %1075  ;;  %v508_v31 = vmul.f32 %v1074_v17, %v1245_v23  ;;  %1095 = vrcp.f32 %v423_v13  ;;  %v915_v39 = vunpack.c.l.bf16 %v1020_v16  ;;  %v1370_v42 = vadd.f32 %v1233_v9, %v267_v15 }
  0x32   : > { %v1078_v36 = vpop.eup %1077  ;;  %v509_v37 = vmul.f32 %v1076_v22, %v1248_v24  ;;  %1097 = vpow2.f32 %v780_v35  ;;  %v916_v43 = vunpack.c.h.bf16 %v1020_v16  ;;  %v1375_v48 = vadd.f32 %v1233_v9, %v268_v21 }
  0x33   : > { %v1080_v41 = vpop.eup %1079  ;;  %v510_v23 = vmul.f32 %v1078_v36, %v1251_v25  ;;  %1099 = vrcp.f32 %v424_v18  ;;  %v269_v25 = vmul.f32 %v915_v39, %v1224_v0 }
  0x34   : > { %v1082_v24 = vpop.eup %1081  ;;  %v932_v35 = vpack.c.bf16 %v509_v37, %v508_v31  ;;  %v511_v46 = vmul.f32 %v1080_v41, %v1254_v26  ;;  %1101 = vpow2.f32 %v1327_v40  ;;  %v270_v53 = vmul.f32 %v916_v43, %v1224_v0  ;;  %v1023_v31 = vld [vmem:[%s1219_s18 + $0x78] sm:$0xff]  }
  0x35   : > { %v1084_v51 = vpop.eup %1083  ;;  %v512_v52 = vmul.f32 %v1082_v24, %v1257_v27  ;;  %1103 = vpow2.f32 %v782_v44  ;;  %v788_v40 = vmul.f32 -1.442695, %v1357_v34  ;;  %v789_v27 = vmul.f32 -1.442695, %v1370_v42 }
  0x36   : > { %v1086_v54 = vpop.eup %1085  ;;  %933 = vst [vmem:[%s1366_s25] sm:$0xff] %v932_v35   ;;  %v937_v56 = vpack.c.bf16 %v511_v46, %v510_v23  ;;  %v513_v26 = vmul.f32 %v1084_v51, %v1260_v28  ;;  %1105 = vpow2.f32 %v1335_v49  ;;  %v1387_v44 = vadd.f32 %v1233_v9, %v269_v25  ;;  %v1021_v49 = vld [vmem:[%s1219_s18 + $0x68] sm:$0xff]  }
  0x37   : > { %v1088_v59 = vpop.eup %1087  ;;  %v514_v61 = vmul.f32 %v1086_v54, %v1263_v29  ;;  %1107 = vpow2.f32 %v784_v14  ;;  %v1392_v28 = vadd.f32 %v1233_v9, %v270_v53  ;;  %v790_v4 = vmul.f32 -1.442695, %v1375_v48 }
  0x38   : > { %v1090_v63 = vpop.eup %1089  ;;  %1024 = vst [vmem:[%s1366_s25 + $0x8] sm:$0xff] %v937_v56   ;;  %v942_v1 = vpack.c.bf16 %v513_v26, %v512_v52  ;;  %v515_v2 = vmul.f32 %v1088_v59, %v1266_v30  ;;  %1109 = vpow2.f32 %v785_v19  ;;  %v791_v30 = vmul.f32 -1.442695, %v1387_v44 }
  0x39   : > { %v1092_v3 = vpop.eup %1091  ;;  %v516_v29 = vmul.f32 %v1090_v63, %v1281_v47  ;;  %1111 = vpow2.f32 %v786_v33  ;;  %v919_v14 = vunpack.c.l.bf16 %v1021_v49  ;;  %v792_v17 = vmul.f32 -1.442695, %v1392_v28 }
  0x3a   : > { %v1094_v5 = vpop.eup %1093  ;;  %1025 = vst [vmem:[%s1366_s25 + $0x10] sm:$0xff] %v942_v1   ;;  %v947_v6 = vpack.c.bf16 %v515_v2, %v514_v61  ;;  %v517_v8 = vmul.f32 %v1092_v3, %v1284_v50  ;;  %1113 = vpow2.f32 %v787_v38  ;;  %v1022_v50 = vld [vmem:[%s1219_s18 + $0x70] sm:$0xff]   ;;  %v927_v24 = vunpack.c.l.bf16 %v1023_v31 }
  0x3b   : > { %v1096_v10 = vpop.eup %1095  ;;  %v518_v13 = vmul.f32 %v1094_v5, %v1293_v57  ;;  %1115 = vpow2.f32 %v788_v40  ;;  %v920_v57 = vunpack.c.h.bf16 %v1021_v49  ;;  %v923_v37 = vunpack.c.l.bf16 %v1022_v50 }
  0x3c   : > { %v1098_v47 = vpop.eup %1097  ;;  %1026 = vst [vmem:[%s1366_s25 + $0x18] sm:$0xff] %v947_v6   ;;  %v952_v15 = vpack.c.bf16 %v517_v8, %v516_v29  ;;  %v519_v16 = vmul.f32 %v1096_v10, %v1296_v58  ;;  %1117 = vpow2.f32 %v789_v27  ;;  %v271_v39 = vmul.f32 %v919_v14, %v1224_v0 }
  0x3d   : > { %v1100_v18 = vpop.eup %1099  ;;  %v425_v19 = vadd.f32 1.0, %v1098_v47  ;;  %1119 = vpow2.f32 %v790_v4  ;;  %v924_v41 = vunpack.c.h.bf16 %v1022_v50  ;;  %v272_v51 = vmul.f32 %v920_v57, %v1224_v0 }
  0x3e   : > { %v1102_v21 = vpop.eup %1101  ;;  %1027 = vst [vmem:[%s1366_s25 + $0x20] sm:$0xff] %v952_v15   ;;  %v957_v22 = vpack.c.bf16 %v519_v16, %v518_v13  ;;  %1121 = vpow2.f32 %v791_v30  ;;  %v928_v52 = vunpack.c.h.bf16 %v1023_v31  ;;  %v273_v54 = vmul.f32 %v923_v37, %v1224_v0 }
  0x3f   : > { %v1104_v33 = vpop.eup %1103  ;;  %1123 = vrcp.f32 %v425_v19  ;;  %v426_v36 = vadd.f32 1.0, %v1102_v21  ;;  %v1412_v40 = vadd.f32 %v1233_v9, %v271_v39  ;;  %v274_v59 = vmul.f32 %v924_v41, %v1224_v0 }
  0x40   : > { %v1106_v38 = vpop.eup %1105  ;;  %1028 = vst [vmem:[%s1366_s25 + $0x28] sm:$0xff] %v957_v22   ;;  %v427_v58 = vadd.f32 1.0, %v1104_v33  ;;  %1125 = vpow2.f32 %v792_v17  ;;  %v275_v63 = vmul.f32 %v927_v24, %v1224_v0  ;;  %v1417_v49 = vadd.f32 %v1233_v9, %v272_v51 }
  0x41   : > { %v1108_v23 = vpop.eup %1107  ;;  %1127 = vrcp.f32 %v426_v36  ;;  %v428_v43 = vadd.f32 1.0, %v1106_v38  ;;  %v276_v3 = vmul.f32 %v928_v52, %v1224_v0  ;;  %v520_v4 = vmul.f32 %v1100_v18, %v1300_v60 }
  0x42   : > { %v1110_v35 = vpop.eup %1109  ;;  %1129 = vrcp.f32 %v427_v58  ;;  %v429_v46 = vadd.f32 1.0, %v1108_v23  ;;  %v1422_v6 = vadd.f32 %v1233_v9, %v273_v54  ;;  %v793_v10 = vmul.f32 -1.442695, %v1412_v40 }
  0x43   : > { %v1112_v25 = vpop.eup %1111  ;;  %1131 = vrcp.f32 %v428_v43  ;;  %v430_v53 = vadd.f32 1.0, %v1110_v35  ;;  %v1426_v13 = vadd.f32 %v1233_v9, %v274_v59  ;;  %v1429_v0 = vadd.f32 %v1233_v9, %v275_v63 }
  0x44   : > { %v1114_v56 = vpop.eup %1113  ;;  %1133 = vrcp.f32 %v429_v46  ;;  %v431_v26 = vadd.f32 1.0, %v1112_v25  ;;  %v794_v16 = vmul.f32 -1.442695, %v1417_v49  ;;  %v1434_v17 = vadd.f32 %v1233_v9, %v276_v3 }
  0x45   : > { %v1116_v61 = vpop.eup %1115  ;;  %1135 = vrcp.f32 %v430_v53  ;;  %v432_v27 = vadd.f32 1.0, %v1114_v56  ;;  %v795_v19 = vmul.f32 -1.442695, %v1422_v6  ;;  %v796_v31 = vmul.f32 -1.442695, %v1426_v13 }
  0x46   : > { %v1118_v1 = vpop.eup %1117  ;;  %1137 = vrcp.f32 %v431_v26  ;;  %v433_v2 = vadd.f32 1.0, %v1116_v61  ;;  %v797_v9 = vmul.f32 -1.442695, %v1429_v0  ;;  %v798_v38 = vmul.f32 -1.442695, %v1434_v17 }
  0x47   : > { %v1120_v29 = vpop.eup %1119  ;;  %1139 = vrcp.f32 %v432_v27  ;;  %v434_v5 = vadd.f32 1.0, %v1118_v1 }
  0x48   : > { %v1122_v8 = vpop.eup %1121  ;;  %1141 = vrcp.f32 %v433_v2  ;;  %v435_v30 = vadd.f32 1.0, %v1120_v29 }
  0x49   : > { %v1124_v14 = vpop.eup %1123  ;;  %1143 = vrcp.f32 %v434_v5  ;;  %v436_v47 = vadd.f32 1.0, %v1122_v8 }
  0x4a   : > { %v1126_v60 = vpop.eup %1125  ;;  %v521_v15 = vmul.f32 %v1124_v14, %v1310_v11  ;;  %1145 = vrcp.f32 %v435_v30 }
  0x4b   : > { %v1128_v50 = vpop.eup %1127  ;;  %v437_v18 = vadd.f32 1.0, %v1126_v60  ;;  %1147 = vrcp.f32 %v436_v47 }
  0x4c   : > { %v1130_v21 = vpop.eup %1129  ;;  %v962_v22 = vpack.c.bf16 %v521_v15, %v520_v4  ;;  %v522_v57 = vmul.f32 %v1128_v50, %v1313_v12  ;;  %1149 = vpow2.f32 %v793_v10 }
  0x4d   : > { %v1132_v11 = vpop.eup %1131  ;;  %v523_v33 = vmul.f32 %v1130_v21, %v1317_v20  ;;  %1151 = vrcp.f32 %v437_v18 }
  0x4e   : > { %v1134_v36 = vpop.eup %1133  ;;  %1029 = vst [vmem:[%s1366_s25 + $0x30] sm:$0xff] %v962_v22   ;;  %v524_v37 = vmul.f32 %v1132_v11, %v1321_v32  ;;  %1153 = vpow2.f32 %v794_v16 }
  0x4f   : > { %v1136_v58 = vpop.eup %1135  ;;  %v967_v12 = vpack.c.bf16 %v523_v33, %v522_v57  ;;  %v525_v39 = vmul.f32 %v1134_v36, %v1332_v45  ;;  %1155 = vpow2.f32 %v795_v19 }
  0x50   : > { %v1138_v41 = vpop.eup %1137  ;;  %v526_v20 = vmul.f32 %v1136_v58, %v1339_v55  ;;  %1157 = vpow2.f32 %v796_v31 }
  0x51   : > { %v1140_v23 = vpop.eup %1139  ;;  %1030 = vst [vmem:[%s1366_s25 + $0x38] sm:$0xff] %v967_v12   ;;  %v972_v43 = vpack.c.bf16 %v525_v39, %v524_v37  ;;  %v527_v24 = vmul.f32 %v1138_v41, %v1342_v62  ;;  %1159 = vpow2.f32 %v797_v9 }
  0x52   : > { %v1142_v32 = vpop.eup %1141  ;;  %v528_v35 = vmul.f32 %v1140_v23, %v1347_v7  ;;  %1161 = vpow2.f32 %v798_v38 }
  0x53   : > { %v1144_v46 = vpop.eup %1143  ;;  %1031 = vst [vmem:[%s1366_s25 + $0x40] sm:$0xff] %v972_v43   ;;  %v977_v45 = vpack.c.bf16 %v527_v24, %v526_v20  ;;  %v529_v51 = vmul.f32 %v1142_v32, %v1357_v34 }
  0x54   : > { %v1146_v55 = vpop.eup %1145  ;;  %v530_v52 = vmul.f32 %v1144_v46, %v1370_v42 }
  0x55   : > { %v1148_v25 = vpop.eup %1147  ;;  %1032 = vst [vmem:[%s1366_s25 + $0x48] sm:$0xff] %v977_v45   ;;  %v982_v53 = vpack.c.bf16 %v529_v51, %v528_v35  ;;  %v531_v62 = vmul.f32 %v1146_v55, %v1375_v48 }
  0x56   : > { %v1150_v54 = vpop.eup %1149  ;;  %v532_v56 = vmul.f32 %v1148_v25, %v1387_v44 }
  0x57   : > { %v1152_v26 = vpop.eup %1151  ;;  %1033 = vst [vmem:[%s1366_s25 + $0x50] sm:$0xff] %v982_v53   ;;  %v987_v7 = vpack.c.bf16 %v531_v62, %v530_v52  ;;  %v438_v59 = vadd.f32 1.0, %v1150_v54 }
  0x58   : > { %v1154_v61 = vpop.eup %1153  ;;  %v533_v34 = vmul.f32 %v1152_v26, %v1392_v28 }
  0x59   : > { %v1156_v27 = vpop.eup %1155  ;;  %1034 = vst [vmem:[%s1366_s25 + $0x58] sm:$0xff] %v987_v7   ;;  %v439_v63 = vadd.f32 1.0, %v1154_v61  ;;  %1163 = vrcp.f32 %v438_v59 }
  0x5a   : > { %v1158_v42 = vpop.eup %1157  ;;  %v992_v1 = vpack.c.bf16 %v533_v34, %v532_v56  ;;  %v440_v2 = vadd.f32 1.0, %v1156_v27 }
  0x5b   : > { %v1160_v3 = vpop.eup %1159  ;;  %1165 = vrcp.f32 %v439_v63  ;;  %v441_v48 = vadd.f32 1.0, %v1158_v42 }
  0x5c   : > { %v1162_v29 = vpop.eup %1161  ;;  %1035 = vst [vmem:[%s1366_s25 + $0x60] sm:$0xff] %v992_v1   ;;  %1167 = vrcp.f32 %v440_v2  ;;  %v442_v44 = vadd.f32 1.0, %v1160_v3 }
  0x5d   : > { %1169 = vrcp.f32 %v441_v48  ;;  %v443_v4 = vadd.f32 1.0, %v1162_v29 }
  0x5e   : > { %1171 = vrcp.f32 %v442_v44 }
  0x5f   : > { %1173 = vrcp.f32 %v443_v4 }
  0x63   : > { %v1164_v28 = vpop.eup %1163 }
  0x64   : > { %v534_v5 = vmul.f32 %v1164_v28, %v1412_v40 }
  0x65   : > { %v1166_v8 = vpop.eup %1165 }
  0x66   : > { %v1168_v30 = vpop.eup %1167  ;;  %v535_v10 = vmul.f32 %v1166_v8, %v1417_v49 }
  0x67   : > { %v1170_v14 = vpop.eup %1169  ;;  %v536_v47 = vmul.f32 %v1168_v30, %v1422_v6 }
  0x68   : > { %v1172_v60 = vpop.eup %1171  ;;  %v997_v15 = vpack.c.bf16 %v535_v10, %v534_v5  ;;  %v537_v16 = vmul.f32 %v1170_v14, %v1426_v13 }
  0x69   : > { %v1174_v50 = vpop.eup %1173  ;;  %v538_v18 = vmul.f32 %v1172_v60, %v1429_v0 }
  0x6a   : > { %1036 = vst [vmem:[%s1366_s25 + $0x68] sm:$0xff] %v997_v15   ;;  %v1002_v19 = vpack.c.bf16 %v537_v16, %v536_v47  ;;  %v539_v21 = vmul.f32 %v1174_v50, %v1434_v17 }
  0x6c   : > { %1037 = vst [vmem:[%s1366_s25 + $0x70] sm:$0xff] %v1002_v19   ;;  %v1007_v40 = vpack.c.bf16 %v539_v21, %v538_v18 }
  0x6e   : > { %1038 = vst [vmem:[%s1366_s25 + $0x78] sm:$0xff] %v1007_v40  }
  0x6f PF: > { %s13_s12 = sadd.s32 1, %s1181_s12  }
  0x70   : > { %p10_p4 = scmp.ge.s32.totalorder %s13_s12, 6  }
  0x72   :  { %12 = sbr.rel (!%p10_p4) target bundleno = 1 (0x1), region = 62 }

// kernel: graph_res_blocks_forward.12
= control target key start
LH: loop header
LB: loop body
LE: loop exit
PB: predicated region body
PF: predicated region fallthrough
CT: control target
= control target key end

     0   :  { %s1246_s15 = smov 0   ;;  %s1425_s0 = inlined_call_operand.vmem [shape: bf16[1024,128], index: 0, kind: input, shape index: {}]   ;;  %s1426_s1 = inlined_call_operand.vmem [shape: bf16[128,128], index: 1, kind: input, shape index: {}]   ;;  %s1427_s2 = inlined_call_operand.vmem [shape: bf16[1024,128], index: 2, kind: output, shape index: {0}]   ;;  %s1428_s3 = inlined_call_operand.vmem [shape: f32[1,128], index: 3, kind: output, shape index: {1}]   ;;  %s1429_s4 = inlined_call_operand.vmem [shape: f32[1,128], index: 4, kind: output, shape index: {2}]  }
   0x1 LB: > { %s896_s16 = sadd.s32 4294967295, %s1218_s15   ;;  %p900_p0 = scmp.ge.s32.totalorder %s1218_s15, 1  ;;  %s1218_s15 = sphi %s1246_s15, %s15_s15  }
   0x2   : > { %p158_p1 = scmp.lt.s32.totalorder %s1218_s15, 5 }
   0x4   : > { %p159_p2 = pnand %p900_p0, %p158_p1 }
   0x5   : > { %s901_s17 = sshll.u32 (!%p159_p2), %s896_s16, 5  ;;  %p905_p4 = scmp.ne.s32.totalorder (!%p159_p2), %s896_s16, 0 }
   0x6   : > { %162 = sbr.rel (%p159_p2) target bundleno = 347 (0x15b), region = 28  ;;  %p185_p3 = scmp.lt.s32.totalorder (!%p159_p2), %s901_s17, 127 }
   0xd   : > { %s1431_s17 = smov (!%p185_p3, %s901_s17), 127  ;;  %200 = sbr.rel (%p905_p4) target bundleno = 20 (0x14), region = 32 }
   0xe   : > { %s902_s18 = sshll.u32 %s1431_s17, 2  ;;  %v1220_v0 = vmov (!%p905_p4), 0.0  }
   0xf   : > { %s1257_s21 = scalar_lea.vmem %s1425_s0, %s902_s18  ;;  %s1262_s24 = scalar_lea.vmem %s1427_s2, %s902_s18  ;;  %201 = vst [vmem:[%s1428_s3] sm:$0x1] (!%p905_p4), %v1220_v0  ;;  %202 = vst [vmem:[%s1429_s4] sm:$0x1] (!%p905_p4), %v1220_v0 }
  0x14 PF: > { %v1188_v1 = vld [vmem:[%s1426_s1] sm:$0xff]   ;;  %v1189_v2 = vld [vmem:[%s1426_s1 + $0x8] sm:$0xff]   ;;  %v1190_v3 = vld [vmem:[%s1426_s1 + $0x10] sm:$0xff]  }
  0x15   : > { %1115 = vmatprep.subr.bf16.mxu0 %v1188_v1  ;;  %1163 = vmatprep.subr.bf16.mxu1 %v1188_v1  ;;  %v1191_v4 = vld [vmem:[%s1426_s1 + $0x18] sm:$0xff]   ;;  %v1196_v5 = vld [vmem:[%s1257_s21] sm:$0xff]   ;;  %v1193_v7 = vld [vmem:[%s1426_s1 + $0x28] sm:$0xff]  }
  0x16   : > { %1116 = vmatpush3.bf16.msra.mxu0 %v1188_v1  ;;  %1171 = vmatpush3.bf16.msra.mxu1 %v1188_v1  ;;  %v1192_v6 = vld [vmem:[%s1426_s1 + $0x20] sm:$0xff]   ;;  %v1194_v9 = vld [vmem:[%s1426_s1 + $0x30] sm:$0xff]   ;;  %v1195_v10 = vld [vmem:[%s1426_s1 + $0x38] sm:$0xff]  }
  0x17   : > { %1117 = vmatprep.subr.bf16.mxu0 %v1189_v2  ;;  %1164 = vmatprep.subr.bf16.mxu1 %v1189_v2  ;;  %v1204_v8 = vld [vmem:[%s1257_s21 + $0x40] sm:$0xff]   ;;  %v1197_v11 = vld [vmem:[%s1257_s21 + $0x8] sm:$0xff]   ;;  %v1198_v13 = vld [vmem:[%s1257_s21 + $0x10] sm:$0xff]  }
  0x18   : > { %1131 = vmatprep.mubr.bf16.mxu0 %v1196_v5  ;;  %1147 = vmatprep.mubr.bf16.mxu1 %v1204_v8  ;;  %v1205_v12 = vld [vmem:[%s1257_s21 + $0x48] sm:$0xff]   ;;  %v1206_v14 = vld [vmem:[%s1257_s21 + $0x50] sm:$0xff]   ;;  %v1199_v15 = vld [vmem:[%s1257_s21 + $0x18] sm:$0xff]  }
  0x19   : > { %v1207_v16 = vld [vmem:[%s1257_s21 + $0x58] sm:$0xff]   ;;  %v1200_v17 = vld [vmem:[%s1257_s21 + $0x20] sm:$0xff]   ;;  %v1201_v19 = vld [vmem:[%s1257_s21 + $0x28] sm:$0xff]  }
  0x1a   : > { %1118 = vmatpush3.bf16.msra.mxu0 %v1189_v2  ;;  %1172 = vmatpush3.bf16.msra.mxu1 %v1189_v2  ;;  %v1208_v18 = vld [vmem:[%s1257_s21 + $0x60] sm:$0xff]   ;;  %v1209_v20 = vld [vmem:[%s1257_s21 + $0x68] sm:$0xff]   ;;  %v1202_v21 = vld [vmem:[%s1257_s21 + $0x30] sm:$0xff]  }
  0x1b   : > { %1119 = vmatprep.subr.bf16.mxu0 %v1190_v3  ;;  %1165 = vmatprep.subr.bf16.mxu1 %v1190_v3  ;;  %v1210_v22 = vld [vmem:[%s1257_s21 + $0x70] sm:$0xff]   ;;  %v1203_v23 = vld [vmem:[%s1257_s21 + $0x38] sm:$0xff]  }
  0x1c   : > { %v1211_v24 = vld [vmem:[%s1257_s21 + $0x78] sm:$0xff]  }
  0x1e   : > { %1120 = vmatpush3.bf16.msra.mxu0 %v1190_v3  ;;  %1173 = vmatpush3.bf16.msra.mxu1 %v1190_v3 }
  0x1f   : > { %1121 = vmatprep.subr.bf16.mxu0 %v1191_v4  ;;  %1166 = vmatprep.subr.bf16.mxu1 %v1191_v4 }
  0x22   : > { %1122 = vmatpush3.bf16.msra.mxu0 %v1191_v4  ;;  %1174 = vmatpush3.bf16.msra.mxu1 %v1191_v4 }
  0x23   : > { %1123 = vmatprep.subr.bf16.mxu0 %v1192_v6  ;;  %1167 = vmatprep.subr.bf16.mxu1 %v1192_v6 }
  0x26   : > { %1124 = vmatpush3.bf16.msra.mxu0 %v1192_v6  ;;  %1175 = vmatpush3.bf16.msra.mxu1 %v1192_v6 }
  0x27   : > { %1125 = vmatprep.subr.bf16.mxu0 %v1193_v7  ;;  %1168 = vmatprep.subr.bf16.mxu1 %v1193_v7 }
  0x2a   : > { %1126 = vmatpush3.bf16.msra.mxu0 %v1193_v7  ;;  %1176 = vmatpush3.bf16.msra.mxu1 %v1193_v7 }
  0x2b   : > { %1127 = vmatprep.subr.bf16.mxu0 %v1194_v9  ;;  %1169 = vmatprep.subr.bf16.mxu1 %v1194_v9 }
  0x2e   : > { %1128 = vmatpush3.bf16.msra.mxu0 %v1194_v9  ;;  %1177 = vmatpush3.bf16.msra.mxu1 %v1194_v9 }
  0x2f   : > { %1129 = vmatprep.subr.bf16.mxu0 %v1195_v10  ;;  %1170 = vmatprep.subr.bf16.mxu1 %v1195_v10 }
  0x32   : > { %1130 = vmatpush3.bf16.msra.mxu0 %v1195_v10  ;;  %1178 = vmatpush3.bf16.msra.mxu1 %v1195_v10 }
  0x35   : > { %1132 = vmatmul.mubr.bf16.vlgmr.msra.gmra.mrb[0].mxu0 %v1197_v11  ;;  %1148 = vmatmul.mubr.bf16.vlgmr.msra.gmra.mrb[0].mxu1 %v1205_v12 }
  0x36   : > { %1135 = vmatprep.mubr.bf16.mxu0 %v1198_v13  ;;  %1151 = vmatprep.mubr.bf16.mxu1 %v1206_v14 }
  0x3d   : > { %1136 = vmatmul.mubr.bf16.gmra.mrb[4].mxu0 %v1199_v15  ;;  %1152 = vmatmul.mubr.bf16.gmra.mrb[4].mxu1 %v1207_v16 }
  0x3e   : > { %1139 = vmatprep.mubr.bf16.mxu0 %v1200_v17  ;;  %1155 = vmatprep.mubr.bf16.mxu1 %v1208_v18 }
  0x45   : > { %1140 = vmatmul.mubr.bf16.gmra.mrb[8].mxu0 %v1201_v19  ;;  %1156 = vmatmul.mubr.bf16.gmra.mrb[8].mxu1 %v1209_v20 }
  0x46   : > { %1143 = vmatprep.mubr.bf16.mxu0 %v1202_v21  ;;  %1159 = vmatprep.mubr.bf16.mxu1 %v1210_v22 }
  0x4d   : > { %1144 = vmatmul.mubr.bf16.gmra.mrb[12].mxu0 %v1203_v23  ;;  %1160 = vmatmul.mubr.bf16.gmra.mrb[12].mxu1 %v1211_v24 }
 0x108   : > { %v1133_v25 = vpop.f32.mrb[0].mxu0  ;;  %v1310_v26 = vpop.f32.mrb[0].mxu1 }
 0x109   : > { %v429_v27 = vpop.f32.mrb[1].mxu0  ;;  %v1312_v28 = vpop.f32.mrb[1].mxu1  ;;  %v759_v40 = vmul.f32 %v1133_v25, %v1133_v25 }
 0x10a   : > { %v1134_v29 = vpop.f32.mrb[2].mxu0  ;;  %v1314_v30 = vpop.f32.mrb[2].mxu1  ;;  %v757_v31 = vmul.f32 %v429_v27, %v429_v27 }
 0x10b   : > { %v1004_v32 = vpack.c.bf16 %v1134_v29, %v1133_v25  ;;  %v432_v33 = vpop.f32.mrb[3].mxu0  ;;  %v1044_v34 = vpack.c.bf16 %v1314_v30, %v1310_v26  ;;  %v1318_v35 = vpop.f32.mrb[3].mxu1  ;;  %v760_v43 = vmul.f32 %v1134_v29, %v1134_v29 }
 0x10c   : > { %v999_v36 = vpack.c.bf16 %v432_v33, %v429_v27  ;;  %v717_v37 = vadd.f32 %v432_v33, %v429_v27  ;;  %v758_v38 = vmul.f32 %v432_v33, %v432_v33  ;;  %v1039_v39 = vpack.c.bf16 %v1318_v35, %v1312_v28 }
 0x10d   : > { %1076 = vst [vmem:[%s1262_s24 + $0x8] sm:$0xff] %v1004_v32   ;;  %1084 = vst [vmem:[%s1262_s24 + $0x48] sm:$0xff] %v1044_v34  }
 0x10e   : > { %1000 = vst [vmem:[%s1262_s24] sm:$0xff] %v999_v36   ;;  %v718_v41 = vadd.f32 %v1133_v25, %v717_v37  ;;  %v789_v42 = vadd.f32 %v758_v38, %v757_v31  ;;  %1083 = vst [vmem:[%s1262_s24 + $0x40] sm:$0xff] %v1039_v39  }
 0x110   : > { %v790_v44 = vadd.f32 %v789_v42, %v759_v40  ;;  %v1137_v45 = vpop.f32.mrb[4].mxu0  ;;  %v719_v46 = vadd.f32 %v1134_v29, %v718_v41  ;;  %v1326_v47 = vpop.f32.mrb[4].mxu1 }
 0x111   : > { %v445_v48 = vpop.f32.mrb[5].mxu0  ;;  %v1328_v49 = vpop.f32.mrb[5].mxu1  ;;  %v763_v0 = vmul.f32 %v1137_v45, %v1137_v45 }
 0x112   : > { %v720_v50 = vadd.f32 %v719_v46, %v445_v48  ;;  %v761_v51 = vmul.f32 %v445_v48, %v445_v48  ;;  %v791_v52 = vadd.f32 %v790_v44, %v760_v43  ;;  %v1138_v53 = vpop.f32.mrb[6].mxu0  ;;  %v1330_v54 = vpop.f32.mrb[6].mxu1 }
 0x113   : > { %v1014_v55 = vpack.c.bf16 %v1138_v53, %v1137_v45  ;;  %v448_v56 = vpop.f32.mrb[7].mxu0  ;;  %v1054_v57 = vpack.c.bf16 %v1330_v54, %v1326_v47  ;;  %v1334_v58 = vpop.f32.mrb[7].mxu1  ;;  %v764_v3 = vmul.f32 %v1138_v53, %v1138_v53 }
 0x114   : > { %v792_v59 = vadd.f32 %v791_v52, %v761_v51  ;;  %v1009_v60 = vpack.c.bf16 %v448_v56, %v445_v48  ;;  %v721_v61 = vadd.f32 %v720_v50, %v448_v56  ;;  %v762_v62 = vmul.f32 %v448_v56, %v448_v56 }
 0x115   : > { %1078 = vst [vmem:[%s1262_s24 + $0x18] sm:$0xff] %v1014_v55   ;;  %1086 = vst [vmem:[%s1262_s24 + $0x58] sm:$0xff] %v1054_v57   ;;  %v1049_v63 = vpack.c.bf16 %v1334_v58, %v1328_v49 }
 0x116   : > { %1077 = vst [vmem:[%s1262_s24 + $0x10] sm:$0xff] %v1009_v60   ;;  %v722_v1 = vadd.f32 %v1137_v45, %v721_v61  ;;  %v793_v2 = vadd.f32 %v792_v59, %v762_v62  ;;  %v773_v62 = vmul.f32 %v1312_v28, %v1312_v28 }
 0x117   : > { %1085 = vst [vmem:[%s1262_s24 + $0x50] sm:$0xff] %v1049_v63  }
 0x118   : > { %v794_v4 = vadd.f32 %v793_v2, %v763_v0  ;;  %v1141_v5 = vpop.f32.mrb[8].mxu0  ;;  %v723_v6 = vadd.f32 %v1138_v53, %v722_v1  ;;  %v1342_v7 = vpop.f32.mrb[8].mxu1 }
 0x119   : > { %v461_v8 = vpop.f32.mrb[9].mxu0  ;;  %v1344_v9 = vpop.f32.mrb[9].mxu1  ;;  %v767_v24 = vmul.f32 %v1141_v5, %v1141_v5 }
 0x11a   : > { %v724_v10 = vadd.f32 %v723_v6, %v461_v8  ;;  %v765_v11 = vmul.f32 %v461_v8, %v461_v8  ;;  %v795_v12 = vadd.f32 %v794_v4, %v764_v3  ;;  %v1142_v13 = vpop.f32.mrb[10].mxu0  ;;  %v1346_v14 = vpop.f32.mrb[10].mxu1  ;;  %v774_v3 = vmul.f32 %v1318_v35, %v1318_v35 }
 0x11b   : > { %v1024_v15 = vpack.c.bf16 %v1142_v13, %v1141_v5  ;;  %v464_v16 = vpop.f32.mrb[11].mxu0  ;;  %v1064_v17 = vpack.c.bf16 %v1346_v14, %v1342_v7  ;;  %v1350_v18 = vpop.f32.mrb[11].mxu1  ;;  %v768_v29 = vmul.f32 %v1142_v13, %v1142_v13  ;;  %v775_v4 = vmul.f32 %v1310_v26, %v1310_v26 }
 0x11c   : > { %v796_v19 = vadd.f32 %v795_v12, %v765_v11  ;;  %v1019_v20 = vpack.c.bf16 %v464_v16, %v461_v8  ;;  %v725_v21 = vadd.f32 %v724_v10, %v464_v16  ;;  %v766_v22 = vmul.f32 %v464_v16, %v464_v16 }
 0x11d   : > { %1080 = vst [vmem:[%s1262_s24 + $0x28] sm:$0xff] %v1024_v15   ;;  %1088 = vst [vmem:[%s1262_s24 + $0x68] sm:$0xff] %v1064_v17   ;;  %v1059_v23 = vpack.c.bf16 %v1350_v18, %v1344_v9  ;;  %v776_v8 = vmul.f32 %v1314_v30, %v1314_v30  ;;  %v778_v16 = vmul.f32 %v1334_v58, %v1334_v58 }
 0x11e   : > { %1079 = vst [vmem:[%s1262_s24 + $0x20] sm:$0xff] %v1019_v20   ;;  %v726_v25 = vadd.f32 %v1141_v5, %v725_v21  ;;  %v797_v27 = vadd.f32 %v796_v19, %v766_v22 }
 0x11f   : > { %1087 = vst [vmem:[%s1262_s24 + $0x60] sm:$0xff] %v1059_v23  }
 0x120   : > { %v798_v31 = vadd.f32 %v797_v27, %v767_v24  ;;  %v1145_v32 = vpop.f32.mrb[12].mxu0  ;;  %v727_v33 = vadd.f32 %v1142_v13, %v726_v25  ;;  %v1358_v34 = vpop.f32.mrb[12].mxu1  ;;  %v782_v25 = vmul.f32 %v1350_v18, %v1350_v18 }
 0x121   : > { %v477_v36 = vpop.f32.mrb[13].mxu0  ;;  %v541_v37 = vpop.f32.mrb[13].mxu1  ;;  %v771_v55 = vmul.f32 %v1145_v32, %v1145_v32 }
 0x122   : > { %v728_v38 = vadd.f32 %v727_v33, %v477_v36  ;;  %v769_v39 = vmul.f32 %v477_v36, %v477_v36  ;;  %v799_v40 = vadd.f32 %v798_v31, %v768_v29  ;;  %v1146_v41 = vpop.f32.mrb[14].mxu0  ;;  %v1360_v42 = vpop.f32.mrb[14].mxu1 }
 0x123   : > { %v1034_v43 = vpack.c.bf16 %v1146_v41, %v1145_v32  ;;  %v480_v44 = vpop.f32.mrb[15].mxu0  ;;  %v1074_v45 = vpack.c.bf16 %v1360_v42, %v1358_v34  ;;  %v544_v46 = vpop.f32.mrb[15].mxu1  ;;  %v772_v59 = vmul.f32 %v1146_v41, %v1146_v41 }
 0x124   : > { %v800_v48 = vadd.f32 %v799_v40, %v769_v39  ;;  %v1029_v50 = vpack.c.bf16 %v480_v44, %v477_v36  ;;  %v729_v51 = vadd.f32 %v728_v38, %v480_v44  ;;  %v770_v52 = vmul.f32 %v480_v44, %v480_v44 }
 0x125   : > { %1082 = vst [vmem:[%s1262_s24 + $0x38] sm:$0xff] %v1034_v43   ;;  %1090 = vst [vmem:[%s1262_s24 + $0x78] sm:$0xff] %v1074_v45   ;;  %v1069_v53 = vpack.c.bf16 %v544_v46, %v541_v37  ;;  %v786_v40 = vmul.f32 %v544_v46, %v544_v46 }
 0x126   : > { %1081 = vst [vmem:[%s1262_s24 + $0x30] sm:$0xff] %v1029_v50   ;;  %v730_v56 = vadd.f32 %v1145_v32, %v729_v51  ;;  %v801_v57 = vadd.f32 %v800_v48, %v770_v52 }
 0x127   : > { %1089 = vst [vmem:[%s1262_s24 + $0x70] sm:$0xff] %v1069_v53  }
 0x128   : > { %v802_v60 = vadd.f32 %v801_v57, %v771_v55  ;;  %v731_v61 = vadd.f32 %v1146_v41, %v730_v56 }
 0x12a   : > { %v732_v63 = vadd.f32 %v731_v61, %v1312_v28  ;;  %v803_v0 = vadd.f32 %v802_v60, %v772_v59  ;;  %v777_v28 = vmul.f32 %v1328_v49, %v1328_v49 }
 0x12c   : > { %v804_v1 = vadd.f32 %v803_v0, %v773_v62  ;;  %v733_v2 = vadd.f32 %v732_v63, %v1318_v35 }
 0x12e   : > { %v734_v5 = vadd.f32 %v1310_v26, %v733_v2  ;;  %v805_v6 = vadd.f32 %v804_v1, %v774_v3  ;;  %v779_v26 = vmul.f32 %v1326_v47, %v1326_v47 }
 0x130   : > { %v806_v10 = vadd.f32 %v805_v6, %v775_v4  ;;  %v735_v11 = vadd.f32 %v1314_v30, %v734_v5  ;;  %v780_v30 = vmul.f32 %v1330_v54, %v1330_v54 }
 0x132   : > { %v736_v12 = vadd.f32 %v735_v11, %v1328_v49  ;;  %v807_v13 = vadd.f32 %v806_v10, %v776_v8  ;;  %v781_v49 = vmul.f32 %v1344_v9, %v1344_v9 }
 0x134   : > { %v808_v15 = vadd.f32 %v807_v13, %v777_v28  ;;  %v737_v35 = vadd.f32 %v736_v12, %v1334_v58 }
 0x136   : > { %v738_v17 = vadd.f32 %v1326_v47, %v737_v35  ;;  %v809_v19 = vadd.f32 %v808_v15, %v778_v16  ;;  %v783_v47 = vmul.f32 %v1342_v7, %v1342_v7 }
 0x138   : > { %v810_v20 = vadd.f32 %v809_v19, %v779_v26  ;;  %v739_v21 = vadd.f32 %v1330_v54, %v738_v17  ;;  %v784_v54 = vmul.f32 %v1346_v14, %v1346_v14 }
 0x13a   : > { %v740_v22 = vadd.f32 %v739_v21, %v1344_v9  ;;  %v811_v23 = vadd.f32 %v810_v20, %v780_v30  ;;  %v785_v9 = vmul.f32 %v541_v37, %v541_v37 }
 0x13c   : > { %v812_v24 = vadd.f32 %v811_v23, %v781_v49  ;;  %v741_v58 = vadd.f32 %v740_v22, %v1350_v18  ;;  %v787_v18 = vmul.f32 %v1358_v34, %v1358_v34 }
 0x13e   : > { %v742_v27 = vadd.f32 %v1342_v7, %v741_v58  ;;  %v813_v29 = vadd.f32 %v812_v24, %v782_v25  ;;  %v788_v7 = vmul.f32 %v1360_v42, %v1360_v42 }
 0x140   : > { %v814_v31 = vadd.f32 %v813_v29, %v783_v47  ;;  %v743_v32 = vadd.f32 %v1346_v14, %v742_v27 }
 0x142   : > { %v744_v33 = vadd.f32 %v743_v32, %v541_v37  ;;  %v815_v36 = vadd.f32 %v814_v31, %v784_v54 }
 0x144   : > { %v816_v38 = vadd.f32 %v815_v36, %v785_v9  ;;  %v745_v39 = vadd.f32 %v744_v33, %v544_v46 }
 0x146   : > { %v746_v41 = vadd.f32 %v1358_v34, %v745_v39  ;;  %v817_v43 = vadd.f32 %v816_v38, %v786_v40  ;;  %v716_v34 = vld [vmem:[%s1428_s3] sm:$0x1] }
 0x148   : > { %v747_v44 = vadd.f32 %v1360_v42, %v746_v41  ;;  %v818_v45 = vadd.f32 %v817_v43, %v787_v18  ;;  %v756_v42 = vld [vmem:[%s1429_s4] sm:$0x1] }
 0x14a   : > { %v748_v48 = vrot.slane %v747_v44, 4  ;;  %v819_v14 = vadd.f32 %v818_v45, %v788_v7 }
 0x14c   : > { %v749_v50 = vadd.f32 %v748_v48, %v747_v44  ;;  %v820_v37 = vrot.slane %v819_v14, 4 }
 0x14e   : > { %v750_v51 = vrot.slane %v749_v50, 2  ;;  %v821_v52 = vadd.f32 %v820_v37, %v819_v14 }
 0x150   : > { %v751_v53 = vadd.f32 %v750_v51, %v749_v50  ;;  %v822_v46 = vrot.slane %v821_v52, 2 }
 0x152   : > { %v752_v55 = vrot.slane %v751_v53, 1  ;;  %v823_v56 = vadd.f32 %v822_v46, %v821_v52 }
 0x154   : > { %v753_v57 = vadd.f32 %v752_v55, %v751_v53  ;;  %v824_v59 = vrot.slane %v823_v56, 1 }
 0x156   : > { %v754_v60 = vadd.f32 %v753_v57, %v716_v34  ;;  %v825_v61 = vadd.f32 %v824_v59, %v823_v56 }
 0x158   : > { %755 = vst [vmem:[%s1428_s3] sm:$0x1] %v754_v60  ;;  %v826_v62 = vadd.f32 %v825_v61, %v756_v42 }
 0x15a   : > { %827 = vst [vmem:[%s1429_s4] sm:$0x1] %v826_v62 }
 0x15b PF: > { %s15_s15 = sadd.s32 1, %s1218_s15  }
 0x15c   : > { %p12_p5 = scmp.ge.s32.totalorder %s15_s15, 6  }
 0x15e   :  { %14 = sbr.rel (!%p12_p5) target bundleno = 1 (0x1), region = 78 }

// kernel: graph_res_blocks_forward.15
= control target key start
LH: loop header
LB: loop body
LE: loop exit
PB: predicated region body
PF: predicated region fallthrough
CT: control target
= control target key end

     0   :  { %s1970_s24 = smov 0   ;;  %s2447_s0 = inlined_call_operand.vmem [shape: bf16[1024,256], index: 0, kind: input, shape index: {}]   ;;  %s2448_s1 = inlined_call_operand.vmem [shape: bf16[256,128], index: 1, kind: input, shape index: {}]   ;;  %s2449_s2 = inlined_call_operand.vmem [shape: bf16[1024,128], index: 2, kind: input, shape index: {}]   ;;  %s2450_s3 = inlined_call_operand.vmem [shape: f32[1,128], index: 3, kind: input, shape index: {}]   ;;  %s2451_s4 = inlined_call_operand.vmem [shape: f32[1,128], index: 4, kind: input, shape index: {}]   ;;  %s2452_s5 = inlined_call_operand.vmem [shape: bf16[1024,128], index: 5, kind: output, shape index: {0}]   ;;  %s2453_s6 = inlined_call_operand.vmem [shape: f32[1,128], index: 6, kind: output, shape index: {1}]   ;;  %s2454_s7 = inlined_call_operand.vmem [shape: f32[1,128], index: 7, kind: output, shape index: {2}]  }
   0x1 LB: > { %s1976_s25 = sadd.s32 4294967295, %s1927_s24   ;;  %p1419_p0 = scmp.ge.s32.totalorder %s1927_s24, 1  ;;  %s1927_s24 = sphi %s1970_s24, %s18_s24  }
   0x2   : > { %p245_p1 = scmp.lt.s32.totalorder %s1927_s24, 5 }
   0x4   : > { %p246_p2 = pnand %p1419_p0, %p245_p1 }
   0x5   : > { %s1420_s26 = sshll.u32 (!%p246_p2), %s1976_s25, 5  ;;  %p1427_p4 = scmp.ne.s32.totalorder (!%p246_p2), %s1976_s25, 0 }
   0x6   : > { %249 = sbr.rel (%p246_p2) target bundleno = 379 (0x17b), region = 40  ;;  %p284_p3 = scmp.lt.s32.totalorder (!%p246_p2), %s1420_s26, 127 }
   0xd   : > { %s2456_s26 = smov (!%p284_p3, %s1420_s26), 127  ;;  %306 = sbr.rel (%p1427_p4) target bundleno = 20 (0x14), region = 44 }
   0xe   : > { %s1513_s27 = sshll.u32 %s2456_s26, 3  ;;  %s1424_s28 = sshll.u32 %s2456_s26, 2  ;;  %v1929_v0 = vmov (!%p1427_p4), 0.0  }
   0xf   : > { %s1984_s8 = scalar_lea.vmem %s2447_s0, %s1513_s27  ;;  %s1989_s11 = scalar_lea.vmem %s2449_s2, %s1424_s28  ;;  %307 = vst [vmem:[%s2453_s6] sm:$0x1] (!%p1427_p4), %v1929_v0  ;;  %308 = vst [vmem:[%s2454_s7] sm:$0x1] (!%p1427_p4), %v1929_v0 }
  0x10   : > { %s1994_s14 = scalar_lea.vmem %s2452_s5, %s1424_s28 }
  0x14 PF: > { %v1857_v1 = vld [vmem:[%s2448_s1 + $0x40] sm:$0xff]   ;;  %v1859_v3 = vld [vmem:[%s2448_s1 + $0x48] sm:$0xff]   ;;  %v1861_v5 = vld [vmem:[%s2448_s1 + $0x50] sm:$0xff]   ;;  %v516_v49 = vlaneseq  ;;  %s1430_s15 = sshll.u32 %s1976_s25, 8 }
  0x15   : > { %v1858_v2 = vld [vmem:[%s2448_s1] sm:$0xff]   ;;  %1720 = vmatprep.subr.bf16.mxu0 %v1857_v1  ;;  %1832 = vmatprep.subr.bf16.mxu1 %v1857_v1  ;;  %v1860_v4 = vld [vmem:[%s2448_s1 + $0x8] sm:$0xff]   ;;  %v1862_v6 = vld [vmem:[%s2448_s1 + $0x10] sm:$0xff]   ;;  %v2093_v55 = vstv %s1430_s15 }
  0x16   : > { %1721 = vmatpush3.bf16.msra.mxu0 %v1858_v2  ;;  %1840 = vmatpush3.bf16.msra.mxu1 %v1858_v2  ;;  %v1863_v7 = vld [vmem:[%s2448_s1 + $0x58] sm:$0xff]   ;;  %v1865_v9 = vld [vmem:[%s2448_s1 + $0x60] sm:$0xff]   ;;  %v1867_v11 = vld [vmem:[%s2448_s1 + $0x68] sm:$0xff]   ;;  %v2084_v51 = vshrl.u32 %v516_v49, 7 }
  0x17   : > { %1722 = vmatprep.subr.bf16.mxu0 %v1859_v3  ;;  %1833 = vmatprep.subr.bf16.mxu1 %v1859_v3  ;;  %v1864_v8 = vld [vmem:[%s2448_s1 + $0x18] sm:$0xff]   ;;  %v1866_v10 = vld [vmem:[%s2448_s1 + $0x20] sm:$0xff]   ;;  %v1868_v13 = vld [vmem:[%s2448_s1 + $0x28] sm:$0xff]  }
  0x18   : > { %v1875_v12 = vld [vmem:[%s1984_s8 + $0x4] ss:$8 sps:$4 sm:$0xff]   ;;  %v1869_v14 = vld [vmem:[%s2448_s1 + $0x70] sm:$0xff]   ;;  %v1871_v17 = vld [vmem:[%s2448_s1 + $0x78] sm:$0xff]   ;;  %v518_v57 = vadd.s32 8, %v2084_v51  ;;  %v519_v59 = vadd.s32 16, %v2084_v51  ;;  %v550_v62 = vadd.s32 %v2093_v55, %v2084_v51 }
  0x19   : > { %934 = vmatprep.mubr.bf16.mxu0 %v1875_v12  ;;  %v1887_v15 = vld [vmem:[%s1984_s8 + $0x84] ss:$8 sps:$4 sm:$0xff]   ;;  %v1870_v16 = vld [vmem:[%s2448_s1 + $0x30] sm:$0xff]   ;;  %v1872_v18 = vld [vmem:[%s2448_s1 + $0x38] sm:$0xff]  }
  0x1a   : > { %1723 = vmatpush3.bf16.msra.mxu0 %v1860_v4  ;;  %1841 = vmatpush3.bf16.msra.mxu1 %v1860_v4  ;;  %v1873_v19 = vld [vmem:[%s1984_s8] ss:$8 sps:$4 sm:$0xff]   ;;  %v1876_v20 = vld [vmem:[%s1984_s8 + $0x14] ss:$8 sps:$4 sm:$0xff]   ;;  %v1878_v23 = vld [vmem:[%s1984_s8 + $0x10] ss:$8 sps:$4 sm:$0xff]   ;;  %v551_v1 = vadd.s32 %v2093_v55, %v518_v57  ;;  %v552_v4 = vadd.s32 %v2093_v55, %v519_v59 }
  0x1b   : > { %1724 = vmatprep.subr.bf16.mxu0 %v1861_v5  ;;  %1834 = vmatprep.subr.bf16.mxu1 %v1861_v5  ;;  %v1885_v21 = vld [vmem:[%s1984_s8 + $0x80] ss:$8 sps:$4 sm:$0xff]   ;;  %v1891_v22 = vld [vmem:[%s1984_s8 + $0x94] ss:$8 sps:$4 sm:$0xff]   ;;  %v1879_v24 = vld [vmem:[%s1984_s8 + $0x24] ss:$8 sps:$4 sm:$0xff]  }
  0x1c   : > { %998 = vmatprep.mubr.bf16.mxu1 %v1887_v15  ;;  %v1893_v25 = vld [vmem:[%s1984_s8 + $0x90] ss:$8 sps:$4 sm:$0xff]   ;;  %v1897_v26 = vld [vmem:[%s1984_s8 + $0xa4] ss:$8 sps:$4 sm:$0xff]   ;;  %v1881_v27 = vld [vmem:[%s1984_s8 + $0x20] ss:$8 sps:$4 sm:$0xff]  }
  0x1d   : > { %v1882_v28 = vld [vmem:[%s1984_s8 + $0x34] ss:$8 sps:$4 sm:$0xff]   ;;  %v1899_v29 = vld [vmem:[%s1984_s8 + $0xa0] ss:$8 sps:$4 sm:$0xff]   ;;  %v1884_v31 = vld [vmem:[%s1984_s8 + $0x30] ss:$8 sps:$4 sm:$0xff]  }
  0x1e   : > { %1725 = vmatpush3.bf16.msra.mxu0 %v1862_v6  ;;  %1842 = vmatpush3.bf16.msra.mxu1 %v1862_v6  ;;  %v1903_v30 = vld [vmem:[%s1984_s8 + $0xb4] ss:$8 sps:$4 sm:$0xff]   ;;  %v1888_v32 = vld [vmem:[%s1984_s8 + $0x44] ss:$8 sps:$4 sm:$0xff]   ;;  %v1905_v33 = vld [vmem:[%s1984_s8 + $0xb0] ss:$8 sps:$4 sm:$0xff]  }
  0x1f   : > { %1726 = vmatprep.subr.bf16.mxu0 %v1863_v7  ;;  %1835 = vmatprep.subr.bf16.mxu1 %v1863_v7  ;;  %v1909_v34 = vld [vmem:[%s1984_s8 + $0xc4] ss:$8 sps:$4 sm:$0xff]   ;;  %v1890_v35 = vld [vmem:[%s1984_s8 + $0x40] ss:$8 sps:$4 sm:$0xff]   ;;  %v1894_v36 = vld [vmem:[%s1984_s8 + $0x54] ss:$8 sps:$4 sm:$0xff]  }
  0x20   : > { %v1911_v37 = vld [vmem:[%s1984_s8 + $0xc0] ss:$8 sps:$4 sm:$0xff]   ;;  %v1912_v38 = vld [vmem:[%s1984_s8 + $0xd4] ss:$8 sps:$4 sm:$0xff]   ;;  %v1896_v39 = vld [vmem:[%s1984_s8 + $0x50] ss:$8 sps:$4 sm:$0xff]  }
  0x21   : > { %v1900_v40 = vld [vmem:[%s1984_s8 + $0x64] ss:$8 sps:$4 sm:$0xff]   ;;  %v1914_v41 = vld [vmem:[%s1984_s8 + $0xd0] ss:$8 sps:$4 sm:$0xff]   ;;  %v1902_v43 = vld [vmem:[%s1984_s8 + $0x60] ss:$8 sps:$4 sm:$0xff]  }
  0x22   : > { %1727 = vmatpush3.bf16.msra.mxu0 %v1864_v8  ;;  %1843 = vmatpush3.bf16.msra.mxu1 %v1864_v8  ;;  %v1915_v42 = vld [vmem:[%s1984_s8 + $0xe4] ss:$8 sps:$4 sm:$0xff]   ;;  %v1906_v44 = vld [vmem:[%s1984_s8 + $0x74] ss:$8 sps:$4 sm:$0xff]   ;;  %v1917_v45 = vld [vmem:[%s1984_s8 + $0xe0] ss:$8 sps:$4 sm:$0xff]  }
  0x23   : > { %1728 = vmatprep.subr.bf16.mxu0 %v1865_v9  ;;  %1836 = vmatprep.subr.bf16.mxu1 %v1865_v9  ;;  %v1918_v46 = vld [vmem:[%s1984_s8 + $0xf4] ss:$8 sps:$4 sm:$0xff]   ;;  %v1908_v47 = vld [vmem:[%s1984_s8 + $0x70] ss:$8 sps:$4 sm:$0xff]   ;;  %v1547_v50 = vld [vmem:[%s1989_s11] sm:$0xff]   ;;  %v520_v5 = vadd.s32 24, %v2084_v51 }
  0x24   : > { %v1920_v48 = vld [vmem:[%s1984_s8 + $0xf0] ss:$8 sps:$4 sm:$0xff]   ;;  %v1690_v52 = vld [vmem:[%s1989_s11 + $0x8] sm:$0xff]   ;;  %v1548_v53 = vunpack.c.l.bf16 %v1547_v50  ;;  %v2091_v54 = vld [vmem:[%s2450_s3] ss:$0 sm:$0xff]  ;;  %v1549_v56 = vunpack.c.h.bf16 %v1547_v50  ;;  %v521_v7 = vadd.s32 32, %v2084_v51 }
  0x25   : > { %v1552_v58 = vunpack.c.l.bf16 %v1690_v52  ;;  %v1691_v60 = vld [vmem:[%s1989_s11 + $0x10] sm:$0xff]   ;;  %v2104_v63 = vld [vmem:[%s2451_s4] ss:$0 sm:$0xff]  ;;  %v1553_v3 = vunpack.c.h.bf16 %v1690_v52  ;;  %vm582_vm0 = vcmp.lt.s32.totalorder %v550_v62, 777  ;;  %v1692_v9 = vld [vmem:[%s1989_s11 + $0x18] sm:$0xff]   ;;  %vm583_vm1 = vcmp.lt.s32.totalorder %v551_v1, 777 }
  0x26   : > { %1729 = vmatpush3.bf16.msra.mxu0 %v1866_v10  ;;  %1844 = vmatpush3.bf16.msra.mxu1 %v1866_v10  ;;  %v444_v61 = vmul.f32 %v1548_v53, %v2091_v54  ;;  %v445_v0 = vmul.f32 %v1549_v56, %v2091_v54  ;;  %v1556_v6 = vunpack.c.l.bf16 %v1691_v60  ;;  %vm584_vm2 = vcmp.lt.s32.totalorder %v552_v4, 777  ;;  %v1694_v52 = vld [vmem:[%s1989_s11 + $0x28] sm:$0xff]  }
  0x27   : > { %1730 = vmatprep.subr.bf16.mxu0 %v1867_v11  ;;  %1837 = vmatprep.subr.bf16.mxu1 %v1867_v11  ;;  %v446_v2 = vmul.f32 %v1552_v58, %v2091_v54  ;;  %v447_v12 = vmul.f32 %v1553_v3, %v2091_v54  ;;  %v1557_v15 = vunpack.c.h.bf16 %v1691_v60  ;;  %v536_v1 = vadd.s32 152, %v2084_v51 }
  0x28   : > { %v483_v8 = vadd.f32 %v2104_v63, %v444_v61  ;;  %v484_v10 = vadd.f32 %v2104_v63, %v445_v0  ;;  %v535_v61 = vadd.s32 144, %v2084_v51  ;;  %v527_v3 = vadd.s32 80, %v2084_v51 }
  0x29   : > { %v485_v11 = vadd.f32 %v2104_v63, %v446_v2  ;;  %v1568_v2 = vunpack.c.l.bf16 %v1694_v52 }
  0x2a   : > { %1731 = vmatpush3.bf16.msra.mxu0 %v1868_v13  ;;  %1845 = vmatpush3.bf16.msra.mxu1 %v1868_v13  ;;  %v553_v13 = vadd.s32 %v2093_v55, %v520_v5 }
  0x2b   : > { %1732 = vmatprep.subr.bf16.mxu0 %v1869_v14  ;;  %1838 = vmatprep.subr.bf16.mxu1 %v1869_v14  ;;  %v448_v14 = vmul.f32 %v1556_v6, %v2091_v54  ;;  %v1569_v6 = vunpack.c.h.bf16 %v1694_v52 }
  0x2c   : > { %vm585_vm3 = vcmp.lt.s32.totalorder %v553_v13, 777  ;;  %v569_v13 = vadd.s32 %v2093_v55, %v536_v1 }
  0x2e   : > { %1733 = vmatpush3.bf16.msra.mxu0 %v1870_v16  ;;  %1846 = vmatpush3.bf16.msra.mxu1 %v1870_v16  ;;  %v554_v16 = vadd.s32 %v2093_v55, %v521_v7  ;;  %v528_v7 = vadd.s32 88, %v2084_v51  ;;  %vm601_vm13 = vcmp.lt.s32.totalorder %v569_v13, 777 }
  0x2f   : > { %1734 = vmatprep.subr.bf16.mxu0 %v1871_v17  ;;  %1839 = vmatprep.subr.bf16.mxu1 %v1871_v17  ;;  %v522_v17 = vadd.s32 40, %v2084_v51 }
  0x30   : > { %vm586_vm4 = vcmp.lt.s32.totalorder %v554_v16, 777 }
  0x32   : > { %1735 = vmatpush3.bf16.msra.mxu0 %v1872_v18  ;;  %1847 = vmatpush3.bf16.msra.mxu1 %v1872_v18  ;;  %v1560_v18 = vunpack.c.l.bf16 %v1692_v9 }
  0x35   : > { %935 = vmatmul.mubr.bf16.vlgmr.msra.gmra.mrb[0].mxu0 %v1873_v19  ;;  %999 = vmatmul.mubr.bf16.vlgmr.msra.gmra.mrb[0].mxu1 %v1885_v21  ;;  %v523_v19 = vadd.s32 48, %v2084_v51  ;;  %v524_v21 = vadd.s32 56, %v2084_v51 }
  0x36   : > { %942 = vmatprep.mubr.bf16.mxu0 %v1876_v20  ;;  %1006 = vmatprep.mubr.bf16.mxu1 %v1891_v22  ;;  %v1561_v20 = vunpack.c.h.bf16 %v1692_v9  ;;  %v2124_v22 = vsel %vm582_vm0, %v483_v8, 0.0 }
  0x3d   : > { %943 = vmatmul.mubr.bf16.gmra.mrb[4].mxu0 %v1878_v23  ;;  %1007 = vmatmul.mubr.bf16.gmra.mrb[4].mxu1 %v1893_v25  ;;  %v2126_v23 = vsel %vm583_vm1, %v484_v10, 0.0  ;;  %v1697_v25 = vld [vmem:[%s1989_s11 + $0x40] sm:$0xff]  }
  0x3e   : > { %950 = vmatprep.mubr.bf16.mxu0 %v1879_v24  ;;  %1014 = vmatprep.mubr.bf16.mxu1 %v1897_v26  ;;  %v2128_v24 = vsel %vm584_vm2, %v485_v11, 0.0  ;;  %v486_v26 = vadd.f32 %v2104_v63, %v447_v12  ;;  %v568_v11 = vadd.s32 %v2093_v55, %v535_v61  ;;  %v529_v61 = vadd.s32 96, %v2084_v51 }
  0x40   : > { %vm600_vm12 = vcmp.lt.s32.totalorder %v568_v11, 777 }
  0x45   : > { %951 = vmatmul.mubr.bf16.gmra.mrb[8].mxu0 %v1881_v27  ;;  %1015 = vmatmul.mubr.bf16.gmra.mrb[8].mxu1 %v1899_v29  ;;  %v487_v27 = vadd.f32 %v2104_v63, %v448_v14  ;;  %v1693_v29 = vld [vmem:[%s1989_s11 + $0x20] sm:$0xff]   ;;  %v454_v14 = vmul.f32 %v1568_v2, %v2091_v54 }
  0x46   : > { %958 = vmatprep.mubr.bf16.mxu0 %v1882_v28  ;;  %1022 = vmatprep.mubr.bf16.mxu1 %v1903_v30  ;;  %v449_v28 = vmul.f32 %v1557_v15, %v2091_v54  ;;  %v555_v30 = vadd.s32 %v2093_v55, %v522_v17  ;;  %v560_v15 = vadd.s32 %v2093_v55, %v527_v3 }
  0x48   : > { %vm587_vm5 = vcmp.lt.s32.totalorder %v555_v30, 777  ;;  %vm592_vm14 = vcmp.lt.s32.totalorder %v560_v15, 777  ;;  %v562_v15 = vadd.s32 %v2093_v55, %v529_v61 }
  0x4a   : > { %vm594_vm2 = vcmp.lt.s32.totalorder %v562_v15, 777 }
  0x4d   : > { %959 = vmatmul.mubr.bf16.gmra.mrb[12].mxu0 %v1884_v31  ;;  %1023 = vmatmul.mubr.bf16.gmra.mrb[12].mxu1 %v1905_v33  ;;  %v450_v31 = vmul.f32 %v1560_v18, %v2091_v54  ;;  %v451_v33 = vmul.f32 %v1561_v20, %v2091_v54  ;;  %v455_v18 = vmul.f32 %v1569_v6, %v2091_v54  ;;  %v1699_v20 = vld [vmem:[%s1989_s11 + $0x50] sm:$0xff]  }
  0x4e   : > { %966 = vmatprep.mubr.bf16.mxu0 %v1888_v32  ;;  %1030 = vmatprep.mubr.bf16.mxu1 %v1909_v34  ;;  %v556_v32 = vadd.s32 %v2093_v55, %v523_v19  ;;  %v557_v34 = vadd.s32 %v2093_v55, %v524_v21  ;;  %v561_v19 = vadd.s32 %v2093_v55, %v528_v7 }
  0x50   : > { %vm588_vm6 = vcmp.lt.s32.totalorder %v556_v32, 777  ;;  %vm589_vm7 = vcmp.lt.s32.totalorder %v557_v34, 777  ;;  %v2198_v32 = vld [vmem:[%s1989_s11 + $0x30] sm:$0xff]   ;;  %vm593_vm15 = vcmp.lt.s32.totalorder %v561_v19, 777 }
  0x55   : > { %967 = vmatmul.mubr.bf16.gmra.mrb[16].mxu0 %v1890_v35  ;;  %1031 = vmatmul.mubr.bf16.gmra.mrb[16].mxu1 %v1911_v37  ;;  %v1580_v35 = vunpack.c.l.bf16 %v1697_v25  ;;  %v533_v37 = vadd.s32 128, %v2084_v51 }
  0x56   : > { %974 = vmatprep.mubr.bf16.mxu0 %v1894_v36  ;;  %1038 = vmatprep.mubr.bf16.mxu1 %v1912_v38  ;;  %v1581_v36 = vunpack.c.h.bf16 %v1697_v25  ;;  %v534_v38 = vadd.s32 136, %v2084_v51 }
  0x57   : > { %v460_v49 = vmul.f32 %v1580_v35, %v2091_v54  ;;  %v566_v53 = vadd.s32 %v2093_v55, %v533_v37  ;;  %v493_v35 = vadd.f32 %v2104_v63, %v454_v14 }
  0x58   : > { %v461_v50 = vmul.f32 %v1581_v36, %v2091_v54  ;;  %v567_v56 = vadd.s32 %v2093_v55, %v534_v38  ;;  %v1588_v36 = vunpack.c.l.bf16 %v1699_v20 }
  0x59   : > { %v499_v4 = vadd.f32 %v2104_v63, %v460_v49  ;;  %vm598_vm8 = vcmp.lt.s32.totalorder %v566_v53, 777  ;;  %v1572_v49 = vunpack.c.l.bf16 %v2198_v32 }
  0x5a   : > { %v500_v5 = vadd.f32 %v2104_v63, %v461_v50  ;;  %vm599_vm9 = vcmp.lt.s32.totalorder %v567_v56, 777 }
  0x5b   : > { %v630_v25 = vsel %vm598_vm8, %v499_v4, 0.0 }
  0x5d   : > { %975 = vmatmul.mubr.bf16.gmra.mrb[20].mxu0 %v1896_v39  ;;  %1039 = vmatmul.mubr.bf16.gmra.mrb[20].mxu1 %v1914_v41  ;;  %v1564_v39 = vunpack.c.l.bf16 %v1693_v29  ;;  %v2144_v41 = vsel %vm585_vm3, %v486_v26, 0.0  ;;  %v631_v26 = vsel %vm599_vm9, %v500_v5, 0.0  ;;  %v456_v5 = vmul.f32 %v1572_v49, %v2091_v54 }
  0x5e   : > { %982 = vmatprep.mubr.bf16.mxu0 %v1900_v40  ;;  %1046 = vmatprep.mubr.bf16.mxu1 %v1915_v42  ;;  %v525_v40 = vadd.s32 64, %v2084_v51  ;;  %v2146_v42 = vsel %vm586_vm4, %v487_v27, 0.0 }
  0x5f   : > { %v452_v57 = vmul.f32 %v1564_v39, %v2091_v54 }
  0x60   : > { %v558_v58 = vadd.s32 %v2093_v55, %v525_v40  ;;  %v494_v40 = vadd.f32 %v2104_v63, %v455_v18  ;;  %v1573_v18 = vunpack.c.h.bf16 %v2198_v32 }
  0x61   : > { %v491_v8 = vadd.f32 %v2104_v63, %v452_v57 }
  0x62   : > { %vm590_vm10 = vcmp.lt.s32.totalorder %v558_v58, 777 }
  0x63   : > { %v2191_v27 = vsel %vm590_vm10, %v491_v8, 0.0 }
  0x65   : > { %983 = vmatmul.mubr.bf16.gmra.mrb[24].mxu0 %v1902_v43  ;;  %1047 = vmatmul.mubr.bf16.gmra.mrb[24].mxu1 %v1917_v45  ;;  %v488_v43 = vadd.f32 %v2104_v63, %v449_v28  ;;  %v489_v45 = vadd.f32 %v2104_v63, %v450_v31 }
  0x66   : > { %990 = vmatprep.mubr.bf16.mxu0 %v1906_v44  ;;  %1054 = vmatprep.mubr.bf16.mxu1 %v1918_v46  ;;  %v1565_v44 = vunpack.c.h.bf16 %v1693_v29  ;;  %v526_v46 = vadd.s32 72, %v2084_v51 }
  0x67   : > { %v2177_v16 = vsel %vm587_vm5, %v488_v43, 0.0  ;;  %v2180_v17 = vsel %vm588_vm6, %v489_v45, 0.0  ;;  %v1589_v43 = vunpack.c.h.bf16 %v1699_v20 }
  0x68   : > { %v453_v59 = vmul.f32 %v1565_v44, %v2091_v54  ;;  %v559_v0 = vadd.s32 %v2093_v55, %v526_v46 }
  0x69   : > { %v465_v1 = vmul.f32 %v1589_v43, %v2091_v54 }
  0x6a   : > { %v492_v9 = vadd.f32 %v2104_v63, %v453_v59  ;;  %vm591_vm11 = vcmp.lt.s32.totalorder %v559_v0, 777  ;;  %v2214_v0 = vsel %vm592_vm14, %v493_v35, 0.0 }
  0x6c   : > { %v2193_v29 = vsel %vm591_vm11, %v492_v9, 0.0 }
  0x6d   : > { %991 = vmatmul.mubr.bf16.gmra.mrb[28].mxu0 %v1908_v47  ;;  %1055 = vmatmul.mubr.bf16.gmra.mrb[28].mxu1 %v1920_v48  ;;  %v1698_v47 = vld [vmem:[%s1989_s11 + $0x48] sm:$0xff]   ;;  %v490_v48 = vadd.f32 %v2104_v63, %v451_v33 }
  0x6e   : > { %v1584_v60 = vunpack.c.l.bf16 %v1698_v47  ;;  %v1585_v62 = vunpack.c.h.bf16 %v1698_v47  ;;  %v537_v47 = vadd.s32 160, %v2084_v51 }
  0x6f   : > { %v2186_v21 = vsel %vm589_vm7, %v490_v48, 0.0  ;;  %v538_v48 = vadd.s32 168, %v2084_v51 }
  0x70   : > { %v462_v10 = vmul.f32 %v1584_v60, %v2091_v54  ;;  %v463_v12 = vmul.f32 %v1585_v62, %v2091_v54  ;;  %v464_v60 = vmul.f32 %v1588_v36, %v2091_v54  ;;  %v570_v3 = vadd.s32 %v2093_v55, %v537_v47 }
  0x71   : > { %v571_v4 = vadd.s32 %v2093_v55, %v538_v48  ;;  %v539_v48 = vadd.s32 176, %v2084_v51 }
  0x72   : > { %v501_v30 = vadd.f32 %v2104_v63, %v462_v10  ;;  %v502_v31 = vadd.f32 %v2104_v63, %v463_v12  ;;  %v1700_v10 = vld [vmem:[%s1989_s11 + $0x58] sm:$0xff]   ;;  %v503_v14 = vadd.f32 %v2104_v63, %v464_v60  ;;  %vm602_vm0 = vcmp.lt.s32.totalorder %v570_v3, 777 }
  0x73   : > { %v1592_v35 = vunpack.c.l.bf16 %v1700_v10  ;;  %v1593_v36 = vunpack.c.h.bf16 %v1700_v10  ;;  %vm603_vm1 = vcmp.lt.s32.totalorder %v571_v4, 777 }
  0x74   : > { %v632_v56 = vsel %vm600_vm12, %v501_v30, 0.0  ;;  %v633_v57 = vsel %vm601_vm13, %v502_v31, 0.0  ;;  %v530_v30 = vadd.s32 104, %v2084_v51 }
 0x108   : > { %v1736_v28 = vpop.f32.mrb[0].mxu0  ;;  %v1784_v34 = vpop.f32.mrb[0].mxu1 }
 0x109   : > { %v1737_v33 = vpop.f32.mrb[1].mxu0  ;;  %v1785_v39 = vpop.f32.mrb[1].mxu1 }
 0x10a   : > { %v1738_v37 = vadd.f32 %v1737_v33, %v1736_v28  ;;  %v1739_v38 = vpop.f32.mrb[2].mxu0  ;;  %v1786_v45 = vadd.f32 %v1785_v39, %v1784_v34  ;;  %v1787_v46 = vpop.f32.mrb[2].mxu1  ;;  %v504_v28 = vadd.f32 %v2104_v63, %v465_v1  ;;  %v495_v39 = vadd.f32 %v2104_v63, %v456_v5 }
 0x10b   : > { %v1740_v44 = vpop.f32.mrb[3].mxu0  ;;  %v1788_v53 = vpop.f32.mrb[3].mxu1  ;;  %v634_v5 = vsel %vm602_vm0, %v503_v14, 0.0 }
 0x10c   : > { %v937_v50 = vadd.f32 %v1738_v37, %v2124_v22  ;;  %v1741_v52 = vadd.f32 %v1740_v44, %v1739_v38  ;;  %v2208_v58 = vadd.f32 %v1786_v45, %v630_v25  ;;  %v1789_v59 = vadd.f32 %v1788_v53, %v1787_v46 }
 0x10d   : > { %v2217_v22 = vsel %vm593_vm15, %v494_v40, 0.0  ;;  %v457_v44 = vmul.f32 %v1573_v18, %v2091_v54 }
 0x10e   : > { %v940_v62 = vadd.f32 %v1741_v52, %v2126_v23  ;;  %v2220_v2 = vadd.f32 %v1789_v59, %v631_v26  ;;  %v1264_v6 = vmul.f32 %v937_v50, %v937_v50  ;;  %v540_v52 = vadd.s32 184, %v2084_v51 }
 0x110   : > { %v1613_v7 = vpack.c.bf16 %v940_v62, %v937_v50  ;;  %v1224_v23 = vadd.f32 %v940_v62, %v937_v50  ;;  %v1265_v8 = vmul.f32 %v940_v62, %v940_v62  ;;  %v1742_v9 = vpop.f32.mrb[4].mxu0  ;;  %v1653_v12 = vpack.c.bf16 %v2220_v2, %v2208_v58  ;;  %v1790_v13 = vpop.f32.mrb[4].mxu1  ;;  %v1701_v62 = vld [vmem:[%s1989_s11 + $0x60] sm:$0xff]  }
 0x111   : > { %v1743_v11 = vpop.f32.mrb[5].mxu0  ;;  %v1791_v26 = vpop.f32.mrb[5].mxu1  ;;  %v467_v50 = vmul.f32 %v1593_v36, %v2091_v54  ;;  %v573_v4 = vadd.s32 %v2093_v55, %v540_v52  ;;  %v1596_v14 = vunpack.c.l.bf16 %v1701_v62  ;;  %v496_v52 = vadd.f32 %v2104_v63, %v457_v44 }
 0x112   : > { %1614 = vst [vmem:[%s1994_s14] sm:$0xff] %v1613_v7   ;;  %v1296_v19 = vadd.f32 %v1265_v8, %v1264_v6  ;;  %v1744_v20 = vadd.f32 %v1743_v11, %v1742_v9  ;;  %v1745_v25 = vpop.f32.mrb[6].mxu0  ;;  %1712 = vst [vmem:[%s1994_s14 + $0x40] sm:$0xff] %v1653_v12   ;;  %v1792_v33 = vadd.f32 %v1791_v26, %v1790_v13  ;;  %v1793_v34 = vpop.f32.mrb[6].mxu1  ;;  %v635_v6 = vsel %vm603_vm1, %v504_v28, 0.0 }
 0x113   : > { %v1746_v31 = vpop.f32.mrb[7].mxu0  ;;  %v1794_v32 = vpop.f32.mrb[7].mxu1  ;;  %v2253_v7 = vadd.s32 %v2093_v55, %v530_v30  ;;  %v2257_v11 = vsel %vm594_vm2, %v495_v39, 0.0  ;;  %v572_v12 = vadd.s32 %v2093_v55, %v539_v48  ;;  %v506_v15 = vadd.f32 %v2104_v63, %v467_v50  ;;  %v2275_v48 = vld [vmem:[%s1989_s11 + $0x38] sm:$0xff]  }
 0x114   : > { %v945_v37 = vadd.f32 %v1744_v20, %v2128_v24  ;;  %v1747_v38 = vadd.f32 %v1746_v31, %v1745_v25  ;;  %v2237_v40 = vadd.f32 %v1792_v33, %v632_v56  ;;  %v1795_v43 = vadd.f32 %v1794_v32, %v1793_v34 }
 0x115   : > { %v466_v24 = vmul.f32 %v1592_v35, %v2091_v54  ;;  %v541_v33 = vadd.s32 192, %v2084_v51  ;;  %v542_v34 = vadd.s32 200, %v2084_v51  ;;  %vm604_vm3 = vcmp.lt.s32.totalorder %v572_v12, 777 }
 0x116   : > { %v1225_v45 = vadd.f32 %v1224_v23, %v945_v37  ;;  %v1266_v46 = vmul.f32 %v945_v37, %v945_v37  ;;  %v948_v47 = vadd.f32 %v1747_v38, %v2144_v41  ;;  %v2242_v49 = vadd.f32 %v1795_v43, %v633_v57 }
 0x117   : > { %v505_v28 = vadd.f32 %v2104_v63, %v466_v24  ;;  %vm605_vm4 = vcmp.lt.s32.totalorder %v573_v4, 777  ;;  %v468_v38 = vmul.f32 %v1596_v14, %v2091_v54  ;;  %v1702_v24 = vld [vmem:[%s1989_s11 + $0x68] sm:$0xff]   ;;  %vm595_vm5 = vcmp.lt.s32.totalorder %v2253_v7, 777  ;;  %v1703_v7 = vld [vmem:[%s1989_s11 + $0x70] sm:$0xff]  }
 0x118   : > { %v1297_v53 = vadd.f32 %v1296_v19, %v1266_v46  ;;  %v1618_v56 = vpack.c.bf16 %v948_v47, %v945_v37  ;;  %v1226_v59 = vadd.f32 %v1225_v45, %v948_v47  ;;  %v1267_v60 = vmul.f32 %v948_v47, %v948_v47  ;;  %v1748_v61 = vpop.f32.mrb[8].mxu0  ;;  %v1796_v57 = vpop.f32.mrb[8].mxu1 }
 0x119   : > { %v1749_v1 = vpop.f32.mrb[9].mxu0  ;;  %v1658_v41 = vpack.c.bf16 %v2242_v49, %v2237_v40  ;;  %v1797_v10 = vpop.f32.mrb[9].mxu1  ;;  %v1597_v19 = vunpack.c.h.bf16 %v1701_v62  ;;  %v637_v44 = vsel %vm605_vm4, %v506_v15, 0.0  ;;  %v544_v15 = vadd.s32 216, %v2084_v51 }
 0x11a   : > { %1705 = vst [vmem:[%s1994_s14 + $0x8] sm:$0xff] %v1618_v56   ;;  %v1298_v23 = vadd.f32 %v1297_v53, %v1267_v60  ;;  %v1750_v8 = vadd.f32 %v1749_v1, %v1748_v61  ;;  %v1751_v9 = vpop.f32.mrb[10].mxu0  ;;  %v1798_v18 = vadd.f32 %v1797_v10, %v1796_v57  ;;  %v1799_v3 = vpop.f32.mrb[10].mxu1  ;;  %v574_v56 = vadd.s32 %v2093_v55, %v541_v33 }
 0x11b   : > { %v1752_v13 = vpop.f32.mrb[11].mxu0  ;;  %1713 = vst [vmem:[%s1994_s14 + $0x48] sm:$0xff] %v1658_v41   ;;  %v1800_v26 = vpop.f32.mrb[11].mxu1  ;;  %v469_v32 = vmul.f32 %v1597_v19, %v2091_v54  ;;  %v636_v1 = vsel %vm604_vm3, %v505_v28, 0.0  ;;  %v543_v28 = vadd.s32 208, %v2084_v51 }
 0x11c   : > { %v953_v20 = vadd.f32 %v1750_v8, %v2146_v42  ;;  %v1753_v25 = vadd.f32 %v1752_v13, %v1751_v9  ;;  %v2265_v30 = vadd.f32 %v1798_v18, %v634_v5  ;;  %v1801_v31 = vadd.f32 %v1800_v26, %v1799_v3 }
 0x11d   : > { %v1600_v8 = vunpack.c.l.bf16 %v1702_v24  ;;  %v507_v18 = vadd.f32 %v2104_v63, %v468_v38  ;;  %v508_v3 = vadd.f32 %v2104_v63, %v469_v32  ;;  %vm606_vm6 = vcmp.lt.s32.totalorder %v574_v56, 777 }
 0x11e   : > { %v1227_v35 = vadd.f32 %v1226_v59, %v953_v20  ;;  %v1268_v36 = vmul.f32 %v953_v20, %v953_v20  ;;  %v956_v37 = vadd.f32 %v1753_v25, %v2177_v16  ;;  %v2270_v42 = vadd.f32 %v1801_v31, %v635_v6 }
 0x11f   : > { %v575_v59 = vadd.s32 %v2093_v55, %v542_v34  ;;  %v1601_v25 = vunpack.c.h.bf16 %v1702_v24  ;;  %v638_v24 = vsel %vm606_vm6, %v507_v18, 0.0 }
 0x120   : > { %v1299_v39 = vadd.f32 %v1298_v23, %v1268_v36  ;;  %v1623_v43 = vpack.c.bf16 %v956_v37, %v953_v20  ;;  %v1228_v45 = vadd.f32 %v1227_v35, %v956_v37  ;;  %v1269_v46 = vmul.f32 %v956_v37, %v956_v37  ;;  %v1754_v47 = vpop.f32.mrb[12].mxu0  ;;  %v1802_v53 = vpop.f32.mrb[12].mxu1 }
 0x121   : > { %v1755_v50 = vpop.f32.mrb[13].mxu0  ;;  %v1663_v16 = vpack.c.bf16 %v2270_v42, %v2265_v30  ;;  %v1803_v41 = vpop.f32.mrb[13].mxu1  ;;  %v1576_v23 = vunpack.c.l.bf16 %v2275_v48  ;;  %vm607_vm7 = vcmp.lt.s32.totalorder %v575_v59, 777 }
 0x122   : > { %1706 = vst [vmem:[%s1994_s14 + $0x10] sm:$0xff] %v1623_v43   ;;  %v1300_v60 = vadd.f32 %v1299_v39, %v1269_v46  ;;  %v1756_v61 = vadd.f32 %v1755_v50, %v1754_v47  ;;  %v1757_v62 = vpop.f32.mrb[14].mxu0  ;;  %v1804_v5 = vadd.f32 %v1803_v41, %v1802_v53  ;;  %v1805_v6 = vpop.f32.mrb[14].mxu1  ;;  %v531_v39 = vadd.s32 112, %v2084_v51 }
 0x123   : > { %v1758_v57 = vpop.f32.mrb[15].mxu0  ;;  %1714 = vst [vmem:[%s1994_s14 + $0x50] sm:$0xff] %v1663_v16   ;;  %v1806_v13 = vpop.f32.mrb[15].mxu1  ;;  %v458_v32 = vmul.f32 %v1576_v23, %v2091_v54  ;;  %v471_v16 = vmul.f32 %v1601_v25, %v2091_v54  ;;  %v1577_v53 = vunpack.c.h.bf16 %v2275_v48 }
 0x124   : > { %v961_v9 = vadd.f32 %v1756_v61, %v2180_v17  ;;  %v1759_v10 = vadd.f32 %v1758_v57, %v1757_v62  ;;  %v2292_v12 = vadd.f32 %v1804_v5, %v636_v1  ;;  %v1807_v14 = vadd.f32 %v1806_v13, %v1805_v6 }
 0x125   : > { %v470_v17 = vmul.f32 %v1600_v8, %v2091_v54  ;;  %v639_v62 = vsel %vm607_vm7, %v508_v3, 0.0  ;;  %v576_v1 = vadd.s32 %v2093_v55, %v543_v28  ;;  %v577_v6 = vadd.s32 %v2093_v55, %v544_v15 }
 0x126   : > { %v1229_v19 = vadd.f32 %v1228_v45, %v961_v9  ;;  %v1270_v20 = vmul.f32 %v961_v9, %v961_v9  ;;  %v964_v4 = vadd.f32 %v1759_v10, %v2186_v21  ;;  %v2295_v26 = vadd.f32 %v1807_v14, %v637_v44 }
 0x127   : > { %v2302_v21 = vsel %vm595_vm5, %v496_v52, 0.0  ;;  %v509_v56 = vadd.f32 %v2104_v63, %v470_v17  ;;  %v1604_v8 = vunpack.c.l.bf16 %v1703_v7  ;;  %v510_v18 = vadd.f32 %v2104_v63, %v471_v16 }
 0x128   : > { %v1301_v31 = vadd.f32 %v1300_v60, %v1270_v20  ;;  %v1628_v33 = vpack.c.bf16 %v964_v4, %v961_v9  ;;  %v1230_v34 = vadd.f32 %v1229_v19, %v964_v4  ;;  %v1271_v35 = vmul.f32 %v964_v4, %v964_v4  ;;  %v1760_v36 = vpop.f32.mrb[16].mxu0  ;;  %v1808_v43 = vpop.f32.mrb[16].mxu1 }
 0x129   : > { %v1761_v37 = vpop.f32.mrb[17].mxu0  ;;  %v1668_v38 = vpack.c.bf16 %v2295_v26, %v2292_v12  ;;  %v1809_v50 = vpop.f32.mrb[17].mxu1  ;;  %v1605_v9 = vunpack.c.h.bf16 %v1703_v7  ;;  %vm608_vm8 = vcmp.lt.s32.totalorder %v576_v1, 777  ;;  %v546_v14 = vadd.s32 232, %v2084_v51  ;;  %v1704_v7 = vld [vmem:[%s1989_s11 + $0x78] sm:$0xff]  }
 0x12a   : > { %1707 = vst [vmem:[%s1994_s14 + $0x18] sm:$0xff] %v1628_v33   ;;  %v1302_v45 = vadd.f32 %v1301_v31, %v1271_v35  ;;  %v1762_v46 = vadd.f32 %v1761_v37, %v1760_v36  ;;  %v1763_v47 = vpop.f32.mrb[18].mxu0  ;;  %v1810_v60 = vadd.f32 %v1809_v50, %v1808_v43  ;;  %v1811_v61 = vpop.f32.mrb[18].mxu1  ;;  %vm609_vm9 = vcmp.lt.s32.totalorder %v577_v6, 777 }
 0x12b   : > { %v1764_v52 = vpop.f32.mrb[19].mxu0  ;;  %1715 = vst [vmem:[%s1994_s14 + $0x58] sm:$0xff] %v1668_v38   ;;  %v1812_v5 = vpop.f32.mrb[19].mxu1  ;;  %v472_v31 = vmul.f32 %v1604_v8, %v2091_v54  ;;  %v473_v33 = vmul.f32 %v1605_v9, %v2091_v54  ;;  %v2333_v37 = vadd.s32 %v2093_v55, %v531_v39  ;;  %v640_v38 = vsel %vm608_vm8, %v509_v56, 0.0 }
 0x12c   : > { %v969_v41 = vadd.f32 %v1762_v46, %v2191_v27  ;;  %v1765_v57 = vadd.f32 %v1764_v52, %v1763_v47  ;;  %v2319_v44 = vadd.f32 %v1810_v60, %v638_v24  ;;  %v1813_v23 = vadd.f32 %v1812_v5, %v1811_v61 }
 0x12d   : > { %v545_v27 = vadd.s32 224, %v2084_v51  ;;  %v2337_v46 = vadd.f32 %v2104_v63, %v458_v32  ;;  %v532_v47 = vadd.s32 120, %v2084_v51  ;;  %v641_v39 = vsel %vm609_vm9, %v510_v18, 0.0 }
 0x12e   : > { %v1231_v10 = vadd.f32 %v1230_v34, %v969_v41  ;;  %v1272_v13 = vmul.f32 %v969_v41, %v969_v41  ;;  %v972_v59 = vadd.f32 %v1765_v57, %v2193_v29  ;;  %v2323_v3 = vadd.f32 %v1813_v23, %v639_v62 }
 0x12f   : > { %v578_v16 = vadd.s32 %v2093_v55, %v545_v27  ;;  %v579_v62 = vadd.s32 %v2093_v55, %v546_v14  ;;  %v512_v57 = vadd.f32 %v2104_v63, %v473_v33  ;;  %v1608_v8 = vunpack.c.l.bf16 %v1704_v7 }
 0x130   : > { %v1303_v19 = vadd.f32 %v1302_v45, %v1272_v13  ;;  %v1633_v20 = vpack.c.bf16 %v972_v59, %v969_v41  ;;  %v1232_v4 = vadd.f32 %v1231_v10, %v972_v59  ;;  %v1273_v25 = vmul.f32 %v972_v59, %v972_v59  ;;  %v1766_v17 = vpop.f32.mrb[20].mxu0  ;;  %v1814_v15 = vpop.f32.mrb[20].mxu1 }
 0x131   : > { %v1767_v28 = vpop.f32.mrb[21].mxu0  ;;  %v1673_v29 = vpack.c.bf16 %v2323_v3, %v2319_v44  ;;  %v1815_v43 = vpop.f32.mrb[21].mxu1  ;;  %v511_v41 = vadd.f32 %v2104_v63, %v472_v31  ;;  %vm610_vm10 = vcmp.lt.s32.totalorder %v578_v16, 777  ;;  %v547_v6 = vadd.s32 240, %v2084_v51 }
 0x132   : > { %1708 = vst [vmem:[%s1994_s14 + $0x20] sm:$0xff] %v1633_v20   ;;  %v1304_v34 = vadd.f32 %v1303_v19, %v1273_v25  ;;  %v1768_v35 = vadd.f32 %v1767_v28, %v1766_v17  ;;  %v1769_v36 = vpop.f32.mrb[22].mxu0  ;;  %v1816_v24 = vadd.f32 %v1815_v43, %v1814_v15  ;;  %v1817_v50 = vpop.f32.mrb[22].mxu1  ;;  %v1609_v9 = vunpack.c.h.bf16 %v1704_v7 }
 0x133   : > { %v1770_v45 = vpop.f32.mrb[23].mxu0  ;;  %1716 = vst [vmem:[%s1994_s14 + $0x60] sm:$0xff] %v1673_v29   ;;  %v1818_v61 = vpop.f32.mrb[23].mxu1  ;;  %v459_v19 = vmul.f32 %v1577_v53, %v2091_v54  ;;  %vm611_vm11 = vcmp.lt.s32.totalorder %v579_v62, 777  ;;  %v642_v29 = vsel %vm610_vm10, %v511_v41, 0.0  ;;  %v474_v31 = vmul.f32 %v1608_v8, %v2091_v54 }
 0x134   : > { %v977_v52 = vadd.f32 %v1768_v35, %v2214_v0  ;;  %v1771_v60 = vadd.f32 %v1770_v45, %v1769_v36  ;;  %v2346_v1 = vadd.f32 %v1816_v24, %v640_v38  ;;  %v1819_v32 = vadd.f32 %v1818_v61, %v1817_v50 }
 0x135   : > { %v565_v48 = vadd.s32 %v2093_v55, %v532_v47  ;;  %v580_v35 = vadd.s32 %v2093_v55, %v547_v6  ;;  %v475_v36 = vmul.f32 %v1609_v9, %v2091_v54  ;;  %vm596_vm12 = vcmp.lt.s32.totalorder %v2333_v37, 777 }
 0x136   : > { %v1233_v5 = vadd.f32 %v1232_v4, %v977_v52  ;;  %v1274_v56 = vmul.f32 %v977_v52, %v977_v52  ;;  %v980_v23 = vadd.f32 %v1771_v60, %v2217_v22  ;;  %v2351_v0 = vadd.f32 %v1819_v32, %v641_v39 }
 0x137   : > { %v548_v4 = vadd.s32 248, %v2084_v51  ;;  %v643_v43 = vsel %vm611_vm11, %v512_v57, 0.0  ;;  %v498_v24 = vadd.f32 %v2104_v63, %v459_v19  ;;  %v513_v54 = vadd.f32 %v2104_v63, %v474_v31 }
 0x138   : > { %v1305_v10 = vadd.f32 %v1304_v34, %v1274_v56  ;;  %v1638_v13 = vpack.c.bf16 %v980_v23, %v977_v52  ;;  %v1234_v59 = vadd.f32 %v1233_v5, %v980_v23  ;;  %v1275_v18 = vmul.f32 %v980_v23, %v980_v23  ;;  %v1772_v27 = vpop.f32.mrb[24].mxu0  ;;  %v1820_v20 = vpop.f32.mrb[24].mxu1 }
 0x139   : > { %v1773_v14 = vpop.f32.mrb[25].mxu0  ;;  %v1678_v22 = vpack.c.bf16 %v2351_v0, %v2346_v1  ;;  %v1821_v15 = vpop.f32.mrb[25].mxu1  ;;  %v581_v16 = vadd.s32 %v2093_v55, %v548_v4  ;;  %vm597_vm13 = vcmp.lt.s32.totalorder %v565_v48, 777  ;;  %vm612_vm14 = vcmp.lt.s32.totalorder %v580_v35, 777 }
 0x13a   : > { %1709 = vst [vmem:[%s1994_s14 + $0x28] sm:$0xff] %v1638_v13   ;;  %v1306_v25 = vadd.f32 %v1305_v10, %v1275_v18  ;;  %v1774_v17 = vadd.f32 %v1773_v14, %v1772_v27  ;;  %v1775_v28 = vpop.f32.mrb[26].mxu0  ;;  %v1822_v53 = vadd.f32 %v1821_v15, %v1820_v20  ;;  %v1823_v34 = vpop.f32.mrb[26].mxu1  ;;  %v514_v39 = vadd.f32 %v2104_v63, %v475_v36 }
 0x13b   : > { %v1776_v33 = vpop.f32.mrb[27].mxu0  ;;  %1717 = vst [vmem:[%s1994_s14 + $0x68] sm:$0xff] %v1678_v22   ;;  %v1824_v45 = vpop.f32.mrb[27].mxu1  ;;  %v628_v55 = vsel %vm596_vm12, %v2337_v46, 0.0  ;;  %vm613_vm15 = vcmp.lt.s32.totalorder %v581_v16, 777  ;;  %v644_v6 = vsel %vm612_vm14, %v513_v54, 0.0  ;;  %v1280_v48 = vmul.f32 %v2208_v58, %v2208_v58 }
 0x13c   : > { %v985_v51 = vadd.f32 %v1774_v17, %v2257_v11  ;;  %v1777_v38 = vadd.f32 %v1776_v33, %v1775_v28  ;;  %v2371_v50 = vadd.f32 %v1822_v53, %v642_v29  ;;  %v1825_v47 = vadd.f32 %v1824_v45, %v1823_v34 }
 0x13d   : > { %v629_v10 = vsel %vm597_vm13, %v498_v24, 0.0  ;;  %v645_v27 = vsel %vm613_vm15, %v514_v39, 0.0  ;;  %v1281_v35 = vmul.f32 %v2220_v2, %v2220_v2  ;;  %v1283_v24 = vmul.f32 %v2242_v49, %v2242_v49 }
 0x13e   : > { %v1235_v7 = vadd.f32 %v1234_v59, %v985_v51  ;;  %v1276_v52 = vmul.f32 %v985_v51, %v985_v51  ;;  %v988_v60 = vadd.f32 %v1777_v38, %v2302_v21  ;;  %v2376_v11 = vadd.f32 %v1825_v47, %v643_v43 }
 0x13f   : > { %v1282_v38 = vmul.f32 %v2237_v40, %v2237_v40  ;;  %v1284_v16 = vmul.f32 %v2265_v30, %v2265_v30 }
 0x140   : > { %v1307_v61 = vadd.f32 %v1306_v25, %v1276_v52  ;;  %v1643_v62 = vpack.c.bf16 %v988_v60, %v985_v51  ;;  %v1236_v32 = vadd.f32 %v1235_v7, %v988_v60  ;;  %v1277_v41 = vmul.f32 %v988_v60, %v988_v60  ;;  %v1778_v57 = vpop.f32.mrb[28].mxu0  ;;  %v1826_v56 = vpop.f32.mrb[28].mxu1 }
 0x141   : > { %v1779_v21 = vpop.f32.mrb[29].mxu0  ;;  %v1683_v5 = vpack.c.bf16 %v2376_v11, %v2371_v50  ;;  %v1827_v9 = vpop.f32.mrb[29].mxu1 }
 0x142   : > { %1710 = vst [vmem:[%s1994_s14 + $0x30] sm:$0xff] %v1643_v62   ;;  %v1308_v23 = vadd.f32 %v1307_v61, %v1277_v41  ;;  %v1780_v8 = vadd.f32 %v1779_v21, %v1778_v57  ;;  %v1781_v63 = vpop.f32.mrb[30].mxu0  ;;  %v1828_v59 = vadd.f32 %v1827_v9, %v1826_v56  ;;  %v1829_v37 = vpop.f32.mrb[30].mxu1  ;;  %v1288_v41 = vmul.f32 %v2319_v44, %v2319_v44 }
 0x143   : > { %v1782_v13 = vpop.f32.mrb[31].mxu0  ;;  %1718 = vst [vmem:[%s1994_s14 + $0x70] sm:$0xff] %v1683_v5   ;;  %v1830_v14 = vpop.f32.mrb[31].mxu1  ;;  %v1289_v21 = vmul.f32 %v2323_v3, %v2323_v3  ;;  %v1290_v56 = vmul.f32 %v2346_v1, %v2346_v1 }
 0x144   : > { %v993_v46 = vadd.f32 %v1780_v8, %v628_v55  ;;  %v1783_v18 = vadd.f32 %v1782_v13, %v1781_v63  ;;  %v1057_v19 = vadd.f32 %v1828_v59, %v644_v6  ;;  %v1831_v22 = vadd.f32 %v1830_v14, %v1829_v37 }
 0x145   : > { %v1291_v8 = vmul.f32 %v2351_v0, %v2351_v0  ;;  %v1292_v6 = vmul.f32 %v2371_v50, %v2371_v50 }
 0x146   : > { %v1237_v20 = vadd.f32 %v1236_v32, %v993_v46  ;;  %v1278_v4 = vmul.f32 %v993_v46, %v993_v46  ;;  %v996_v25 = vadd.f32 %v1783_v18, %v629_v10  ;;  %v1060_v17 = vadd.f32 %v1831_v22, %v645_v27 }
 0x147   : > { %v1293_v10 = vmul.f32 %v2376_v11, %v2376_v11  ;;  %v1294_v13 = vmul.f32 %v1057_v19, %v1057_v19 }
 0x148   : > { %v1309_v28 = vadd.f32 %v1308_v23, %v1278_v4  ;;  %v1648_v29 = vpack.c.bf16 %v996_v25, %v993_v46  ;;  %v1238_v15 = vadd.f32 %v1237_v20, %v996_v25  ;;  %v1279_v31 = vmul.f32 %v996_v25, %v996_v25 }
 0x149   : > { %v1688_v33 = vpack.c.bf16 %v1060_v17, %v1057_v19  ;;  %v1295_v18 = vmul.f32 %v1060_v17, %v1060_v17 }
 0x14a   : > { %1711 = vst [vmem:[%s1994_s14 + $0x38] sm:$0xff] %v1648_v29   ;;  %v1239_v53 = vadd.f32 %v1238_v15, %v2208_v58  ;;  %v1310_v34 = vadd.f32 %v1309_v28, %v1279_v31 }
 0x14b   : > { %1719 = vst [vmem:[%s1994_s14 + $0x78] sm:$0xff] %v1688_v33  }
 0x14c   : > { %v1240_v36 = vadd.f32 %v1239_v53, %v2220_v2  ;;  %v1311_v51 = vadd.f32 %v1310_v34, %v1280_v48  ;;  %v1285_v2 = vmul.f32 %v2270_v42, %v2270_v42 }
 0x14e   : > { %v1241_v43 = vadd.f32 %v1240_v36, %v2237_v40  ;;  %v1312_v45 = vadd.f32 %v1311_v51, %v1281_v35  ;;  %v1286_v40 = vmul.f32 %v2292_v12, %v2292_v12 }
 0x150   : > { %v1242_v47 = vadd.f32 %v1241_v43, %v2242_v49  ;;  %v1313_v58 = vadd.f32 %v1312_v45, %v1282_v38  ;;  %v1287_v49 = vmul.f32 %v2295_v26, %v2295_v26 }
 0x152   : > { %v1314_v7 = vadd.f32 %v1313_v58, %v1283_v24  ;;  %v1243_v52 = vadd.f32 %v1242_v47, %v2265_v30 }
 0x154   : > { %v1244_v60 = vadd.f32 %v1243_v52, %v2270_v42  ;;  %v1315_v54 = vadd.f32 %v1314_v7, %v1284_v16 }
 0x156   : > { %v1245_v39 = vadd.f32 %v1244_v60, %v2292_v12  ;;  %v1316_v61 = vadd.f32 %v1315_v54, %v1285_v2 }
 0x158   : > { %v1246_v62 = vadd.f32 %v1245_v39, %v2295_v26  ;;  %v1317_v32 = vadd.f32 %v1316_v61, %v1286_v40 }
 0x15a   : > { %v1247_v30 = vadd.f32 %v1246_v62, %v2319_v44  ;;  %v1318_v57 = vadd.f32 %v1317_v32, %v1287_v49 }
 0x15c   : > { %v1319_v42 = vadd.f32 %v1318_v57, %v1288_v41  ;;  %v1248_v55 = vadd.f32 %v1247_v30, %v2323_v3 }
 0x15e   : > { %v1320_v12 = vadd.f32 %v1319_v42, %v1289_v21  ;;  %v1249_v5 = vadd.f32 %v1248_v55, %v2346_v1 }
 0x160   : > { %v1321_v26 = vadd.f32 %v1320_v12, %v1290_v56  ;;  %v1250_v23 = vadd.f32 %v1249_v5, %v2351_v0 }
 0x162   : > { %v1322_v44 = vadd.f32 %v1321_v26, %v1291_v8  ;;  %v1251_v63 = vadd.f32 %v1250_v23, %v2371_v50 }
 0x164   : > { %v1323_v9 = vadd.f32 %v1322_v44, %v1292_v6  ;;  %v1252_v3 = vadd.f32 %v1251_v63, %v2376_v11  ;;  %v1223_v11 = vld [vmem:[%s2453_s6] sm:$0x1] }
 0x166   : > { %v1324_v1 = vadd.f32 %v1323_v9, %v1293_v10  ;;  %v1253_v59 = vadd.f32 %v1252_v3, %v1057_v19  ;;  %v1263_v19 = vld [vmem:[%s2454_s7] sm:$0x1] }
 0x168   : > { %v1325_v37 = vadd.f32 %v1324_v1, %v1294_v13  ;;  %v1254_v46 = vadd.f32 %v1253_v59, %v1060_v17 }
 0x16a   : > { %v1255_v27 = vrot.slane %v1254_v46, 4  ;;  %v1326_v0 = vadd.f32 %v1325_v37, %v1295_v18 }
 0x16c   : > { %v1256_v14 = vadd.f32 %v1255_v27, %v1254_v46  ;;  %v1327_v22 = vrot.slane %v1326_v0, 4 }
 0x16e   : > { %v1257_v20 = vrot.slane %v1256_v14, 2  ;;  %v1328_v4 = vadd.f32 %v1327_v22, %v1326_v0 }
 0x170   : > { %v1258_v25 = vadd.f32 %v1257_v20, %v1256_v14  ;;  %v1329_v50 = vrot.slane %v1328_v4, 2 }
 0x172   : > { %v1259_v28 = vrot.slane %v1258_v25, 1  ;;  %v1330_v29 = vadd.f32 %v1329_v50, %v1328_v4 }
 0x174   : > { %v1260_v15 = vadd.f32 %v1259_v28, %v1258_v25  ;;  %v1331_v31 = vrot.slane %v1330_v29, 1 }
 0x176   : > { %v1261_v17 = vadd.f32 %v1260_v15, %v1223_v11  ;;  %v1332_v33 = vadd.f32 %v1331_v31, %v1330_v29 }
 0x178   : > { %1262 = vst [vmem:[%s2453_s6] sm:$0x1] %v1261_v17  ;;  %v1333_v48 = vadd.f32 %v1332_v33, %v1263_v19 }
 0x17a   : > { %1334 = vst [vmem:[%s2454_s7] sm:$0x1] %v1333_v48 }
 0x17b PF: > { %s18_s24 = sadd.s32 1, %s1927_s24  }
 0x17c   : > { %p15_p5 = scmp.ge.s32.totalorder %s18_s24, 6  }
 0x17e   :  { %17 = sbr.rel (!%p15_p5) target bundleno = 1 (0x1), region = 93 }

// kernel: graph_res_blocks_forward.17
= control target key start
LH: loop header
LB: loop body
LE: loop exit
PB: predicated region body
PF: predicated region fallthrough
CT: control target
= control target key end

     0   :  { %s1483_s15 = smov 0   ;;  %s1702_s0 = inlined_call_operand.vmem [shape: bf16[1024,256], index: 0, kind: input, shape index: {}]   ;;  %s1703_s1 = inlined_call_operand.vmem [shape: bf16[256,128], index: 1, kind: input, shape index: {}]   ;;  %s1704_s2 = inlined_call_operand.vmem [shape: bf16[1024,128], index: 2, kind: output, shape index: {0}]   ;;  %s1705_s3 = inlined_call_operand.vmem [shape: f32[1,128], index: 3, kind: output, shape index: {1}]   ;;  %s1706_s4 = inlined_call_operand.vmem [shape: f32[1,128], index: 4, kind: output, shape index: {2}]  }
   0x1 LB: > { %s1027_s16 = sadd.s32 4294967295, %s1455_s15   ;;  %p1031_p0 = scmp.ge.s32.totalorder %s1455_s15, 1  ;;  %s1455_s15 = sphi %s1483_s15, %s15_s15  }
   0x2   : > { %p159_p1 = scmp.lt.s32.totalorder %s1455_s15, 5 }
   0x4   : > { %p160_p2 = pnand %p1031_p0, %p159_p1 }
   0x5   : > { %s1032_s17 = sshll.u32 (!%p160_p2), %s1027_s16, 5  ;;  %p1037_p4 = scmp.ne.s32.totalorder (!%p160_p2), %s1027_s16, 0 }
   0x6   : > { %163 = sbr.rel (%p160_p2) target bundleno = 377 (0x179), region = 28  ;;  %p187_p3 = scmp.lt.s32.totalorder (!%p160_p2), %s1032_s17, 127 }
   0xd   : > { %s1708_s17 = smov (!%p187_p3, %s1032_s17), 127  ;;  %203 = sbr.rel (%p1037_p4) target bundleno = 20 (0x14), region = 32 }
   0xe   : > { %s1120_s18 = sshll.u32 %s1708_s17, 3  ;;  %s1036_s19 = sshll.u32 %s1708_s17, 2  ;;  %v1457_v0 = vmov (!%p1037_p4), 0.0  }
   0xf   : > { %s1494_s22 = scalar_lea.vmem %s1702_s0, %s1120_s18  ;;  %s1499_s25 = scalar_lea.vmem %s1704_s2, %s1036_s19  ;;  %204 = vst [vmem:[%s1705_s3] sm:$0x1] (!%p1037_p4), %v1457_v0  ;;  %205 = vst [vmem:[%s1706_s4] sm:$0x1] (!%p1037_p4), %v1457_v0 }
  0x14 PF: > { %v1385_v1 = vld [vmem:[%s1703_s1 + $0x40] sm:$0xff]   ;;  %v1387_v3 = vld [vmem:[%s1703_s1 + $0x48] sm:$0xff]   ;;  %v1389_v5 = vld [vmem:[%s1703_s1 + $0x50] sm:$0xff]  }
  0x15   : > { %v1386_v2 = vld [vmem:[%s1703_s1] sm:$0xff]   ;;  %1248 = vmatprep.subr.bf16.mxu0 %v1385_v1  ;;  %1360 = vmatprep.subr.bf16.mxu1 %v1385_v1  ;;  %v1388_v4 = vld [vmem:[%s1703_s1 + $0x8] sm:$0xff]   ;;  %v1390_v6 = vld [vmem:[%s1703_s1 + $0x10] sm:$0xff]  }
  0x16   : > { %1249 = vmatpush3.bf16.msra.mxu0 %v1386_v2  ;;  %1368 = vmatpush3.bf16.msra.mxu1 %v1386_v2  ;;  %v1391_v7 = vld [vmem:[%s1703_s1 + $0x58] sm:$0xff]   ;;  %v1393_v9 = vld [vmem:[%s1703_s1 + $0x60] sm:$0xff]   ;;  %v1395_v11 = vld [vmem:[%s1703_s1 + $0x68] sm:$0xff]  }
  0x17   : > { %1250 = vmatprep.subr.bf16.mxu0 %v1387_v3  ;;  %1361 = vmatprep.subr.bf16.mxu1 %v1387_v3  ;;  %v1392_v8 = vld [vmem:[%s1703_s1 + $0x18] sm:$0xff]   ;;  %v1394_v10 = vld [vmem:[%s1703_s1 + $0x20] sm:$0xff]   ;;  %v1396_v13 = vld [vmem:[%s1703_s1 + $0x28] sm:$0xff]  }
  0x18   : > { %v1403_v12 = vld [vmem:[%s1494_s22 + $0x4] ss:$8 sps:$4 sm:$0xff]   ;;  %v1397_v14 = vld [vmem:[%s1703_s1 + $0x70] sm:$0xff]   ;;  %v1399_v17 = vld [vmem:[%s1703_s1 + $0x78] sm:$0xff]  }
  0x19   : > { %558 = vmatprep.mubr.bf16.mxu0 %v1403_v12  ;;  %v1415_v15 = vld [vmem:[%s1494_s22 + $0x84] ss:$8 sps:$4 sm:$0xff]   ;;  %v1398_v16 = vld [vmem:[%s1703_s1 + $0x30] sm:$0xff]   ;;  %v1400_v18 = vld [vmem:[%s1703_s1 + $0x38] sm:$0xff]  }
  0x1a   : > { %1251 = vmatpush3.bf16.msra.mxu0 %v1388_v4  ;;  %1369 = vmatpush3.bf16.msra.mxu1 %v1388_v4  ;;  %v1401_v19 = vld [vmem:[%s1494_s22] ss:$8 sps:$4 sm:$0xff]   ;;  %v1404_v20 = vld [vmem:[%s1494_s22 + $0x14] ss:$8 sps:$4 sm:$0xff]   ;;  %v1406_v23 = vld [vmem:[%s1494_s22 + $0x10] ss:$8 sps:$4 sm:$0xff]  }
  0x1b   : > { %1252 = vmatprep.subr.bf16.mxu0 %v1389_v5  ;;  %1362 = vmatprep.subr.bf16.mxu1 %v1389_v5  ;;  %v1413_v21 = vld [vmem:[%s1494_s22 + $0x80] ss:$8 sps:$4 sm:$0xff]   ;;  %v1419_v22 = vld [vmem:[%s1494_s22 + $0x94] ss:$8 sps:$4 sm:$0xff]   ;;  %v1407_v24 = vld [vmem:[%s1494_s22 + $0x24] ss:$8 sps:$4 sm:$0xff]  }
  0x1c   : > { %622 = vmatprep.mubr.bf16.mxu1 %v1415_v15  ;;  %v1421_v25 = vld [vmem:[%s1494_s22 + $0x90] ss:$8 sps:$4 sm:$0xff]   ;;  %v1425_v26 = vld [vmem:[%s1494_s22 + $0xa4] ss:$8 sps:$4 sm:$0xff]   ;;  %v1409_v27 = vld [vmem:[%s1494_s22 + $0x20] ss:$8 sps:$4 sm:$0xff]  }
  0x1d   : > { %v1410_v28 = vld [vmem:[%s1494_s22 + $0x34] ss:$8 sps:$4 sm:$0xff]   ;;  %v1427_v29 = vld [vmem:[%s1494_s22 + $0xa0] ss:$8 sps:$4 sm:$0xff]   ;;  %v1412_v31 = vld [vmem:[%s1494_s22 + $0x30] ss:$8 sps:$4 sm:$0xff]  }
  0x1e   : > { %1253 = vmatpush3.bf16.msra.mxu0 %v1390_v6  ;;  %1370 = vmatpush3.bf16.msra.mxu1 %v1390_v6  ;;  %v1431_v30 = vld [vmem:[%s1494_s22 + $0xb4] ss:$8 sps:$4 sm:$0xff]   ;;  %v1416_v32 = vld [vmem:[%s1494_s22 + $0x44] ss:$8 sps:$4 sm:$0xff]   ;;  %v1433_v33 = vld [vmem:[%s1494_s22 + $0xb0] ss:$8 sps:$4 sm:$0xff]  }
  0x1f   : > { %1254 = vmatprep.subr.bf16.mxu0 %v1391_v7  ;;  %1363 = vmatprep.subr.bf16.mxu1 %v1391_v7  ;;  %v1437_v34 = vld [vmem:[%s1494_s22 + $0xc4] ss:$8 sps:$4 sm:$0xff]   ;;  %v1418_v35 = vld [vmem:[%s1494_s22 + $0x40] ss:$8 sps:$4 sm:$0xff]   ;;  %v1422_v36 = vld [vmem:[%s1494_s22 + $0x54] ss:$8 sps:$4 sm:$0xff]  }
  0x20   : > { %v1439_v37 = vld [vmem:[%s1494_s22 + $0xc0] ss:$8 sps:$4 sm:$0xff]   ;;  %v1440_v38 = vld [vmem:[%s1494_s22 + $0xd4] ss:$8 sps:$4 sm:$0xff]   ;;  %v1424_v39 = vld [vmem:[%s1494_s22 + $0x50] ss:$8 sps:$4 sm:$0xff]  }
  0x21   : > { %v1428_v40 = vld [vmem:[%s1494_s22 + $0x64] ss:$8 sps:$4 sm:$0xff]   ;;  %v1442_v41 = vld [vmem:[%s1494_s22 + $0xd0] ss:$8 sps:$4 sm:$0xff]   ;;  %v1430_v43 = vld [vmem:[%s1494_s22 + $0x60] ss:$8 sps:$4 sm:$0xff]  }
  0x22   : > { %1255 = vmatpush3.bf16.msra.mxu0 %v1392_v8  ;;  %1371 = vmatpush3.bf16.msra.mxu1 %v1392_v8  ;;  %v1443_v42 = vld [vmem:[%s1494_s22 + $0xe4] ss:$8 sps:$4 sm:$0xff]   ;;  %v1434_v44 = vld [vmem:[%s1494_s22 + $0x74] ss:$8 sps:$4 sm:$0xff]   ;;  %v1445_v45 = vld [vmem:[%s1494_s22 + $0xe0] ss:$8 sps:$4 sm:$0xff]  }
  0x23   : > { %1256 = vmatprep.subr.bf16.mxu0 %v1393_v9  ;;  %1364 = vmatprep.subr.bf16.mxu1 %v1393_v9  ;;  %v1446_v46 = vld [vmem:[%s1494_s22 + $0xf4] ss:$8 sps:$4 sm:$0xff]   ;;  %v1436_v47 = vld [vmem:[%s1494_s22 + $0x70] ss:$8 sps:$4 sm:$0xff]  }
  0x24   : > { %v1448_v48 = vld [vmem:[%s1494_s22 + $0xf0] ss:$8 sps:$4 sm:$0xff]  }
  0x26   : > { %1257 = vmatpush3.bf16.msra.mxu0 %v1394_v10  ;;  %1372 = vmatpush3.bf16.msra.mxu1 %v1394_v10 }
  0x27   : > { %1258 = vmatprep.subr.bf16.mxu0 %v1395_v11  ;;  %1365 = vmatprep.subr.bf16.mxu1 %v1395_v11 }
  0x2a   : > { %1259 = vmatpush3.bf16.msra.mxu0 %v1396_v13  ;;  %1373 = vmatpush3.bf16.msra.mxu1 %v1396_v13 }
  0x2b   : > { %1260 = vmatprep.subr.bf16.mxu0 %v1397_v14  ;;  %1366 = vmatprep.subr.bf16.mxu1 %v1397_v14 }
  0x2e   : > { %1261 = vmatpush3.bf16.msra.mxu0 %v1398_v16  ;;  %1374 = vmatpush3.bf16.msra.mxu1 %v1398_v16 }
  0x2f   : > { %1262 = vmatprep.subr.bf16.mxu0 %v1399_v17  ;;  %1367 = vmatprep.subr.bf16.mxu1 %v1399_v17 }
  0x32   : > { %1263 = vmatpush3.bf16.msra.mxu0 %v1400_v18  ;;  %1375 = vmatpush3.bf16.msra.mxu1 %v1400_v18 }
  0x35   : > { %559 = vmatmul.mubr.bf16.vlgmr.msra.gmra.mrb[0].mxu0 %v1401_v19  ;;  %623 = vmatmul.mubr.bf16.vlgmr.msra.gmra.mrb[0].mxu1 %v1413_v21 }
  0x36   : > { %566 = vmatprep.mubr.bf16.mxu0 %v1404_v20  ;;  %630 = vmatprep.mubr.bf16.mxu1 %v1419_v22 }
  0x3d   : > { %567 = vmatmul.mubr.bf16.gmra.mrb[4].mxu0 %v1406_v23  ;;  %631 = vmatmul.mubr.bf16.gmra.mrb[4].mxu1 %v1421_v25 }
  0x3e   : > { %574 = vmatprep.mubr.bf16.mxu0 %v1407_v24  ;;  %638 = vmatprep.mubr.bf16.mxu1 %v1425_v26 }
  0x45   : > { %575 = vmatmul.mubr.bf16.gmra.mrb[8].mxu0 %v1409_v27  ;;  %639 = vmatmul.mubr.bf16.gmra.mrb[8].mxu1 %v1427_v29 }
  0x46   : > { %582 = vmatprep.mubr.bf16.mxu0 %v1410_v28  ;;  %646 = vmatprep.mubr.bf16.mxu1 %v1431_v30 }
  0x4d   : > { %583 = vmatmul.mubr.bf16.gmra.mrb[12].mxu0 %v1412_v31  ;;  %647 = vmatmul.mubr.bf16.gmra.mrb[12].mxu1 %v1433_v33 }
  0x4e   : > { %590 = vmatprep.mubr.bf16.mxu0 %v1416_v32  ;;  %654 = vmatprep.mubr.bf16.mxu1 %v1437_v34 }
  0x55   : > { %591 = vmatmul.mubr.bf16.gmra.mrb[16].mxu0 %v1418_v35  ;;  %655 = vmatmul.mubr.bf16.gmra.mrb[16].mxu1 %v1439_v37 }
  0x56   : > { %598 = vmatprep.mubr.bf16.mxu0 %v1422_v36  ;;  %662 = vmatprep.mubr.bf16.mxu1 %v1440_v38 }
  0x5d   : > { %599 = vmatmul.mubr.bf16.gmra.mrb[20].mxu0 %v1424_v39  ;;  %663 = vmatmul.mubr.bf16.gmra.mrb[20].mxu1 %v1442_v41 }
  0x5e   : > { %606 = vmatprep.mubr.bf16.mxu0 %v1428_v40  ;;  %670 = vmatprep.mubr.bf16.mxu1 %v1443_v42 }
  0x65   : > { %607 = vmatmul.mubr.bf16.gmra.mrb[24].mxu0 %v1430_v43  ;;  %671 = vmatmul.mubr.bf16.gmra.mrb[24].mxu1 %v1445_v45 }
  0x66   : > { %614 = vmatprep.mubr.bf16.mxu0 %v1434_v44  ;;  %678 = vmatprep.mubr.bf16.mxu1 %v1446_v46 }
  0x6d   : > { %615 = vmatmul.mubr.bf16.gmra.mrb[28].mxu0 %v1436_v47  ;;  %679 = vmatmul.mubr.bf16.gmra.mrb[28].mxu1 %v1448_v48 }
 0x108   : > { %v1264_v49 = vpop.f32.mrb[0].mxu0  ;;  %v1312_v51 = vpop.f32.mrb[0].mxu1 }
 0x109   : > { %v1265_v50 = vpop.f32.mrb[1].mxu0  ;;  %v1313_v54 = vpop.f32.mrb[1].mxu1 }
 0x10a   : > { %v1266_v52 = vadd.f32 %v1265_v50, %v1264_v49  ;;  %v1267_v53 = vpop.f32.mrb[2].mxu0  ;;  %v1587_v56 = vadd.f32 %v1313_v54, %v1312_v51  ;;  %v1315_v57 = vpop.f32.mrb[2].mxu1 }
 0x10b   : > { %v1268_v55 = vpop.f32.mrb[3].mxu0  ;;  %v1316_v59 = vpop.f32.mrb[3].mxu1 }
 0x10c   : > { %v1269_v58 = vadd.f32 %v1268_v55, %v1267_v53  ;;  %v1589_v60 = vadd.f32 %v1316_v59, %v1315_v57  ;;  %v888_v61 = vmul.f32 %v1266_v52, %v1266_v52 }
 0x10e   : > { %v1156_v62 = vpack.c.bf16 %v1269_v58, %v1266_v52  ;;  %v848_v63 = vadd.f32 %v1269_v58, %v1266_v52  ;;  %v889_v0 = vmul.f32 %v1269_v58, %v1269_v58  ;;  %v1196_v1 = vpack.c.bf16 %v1589_v60, %v1587_v56 }
 0x110   : > { %1157 = vst [vmem:[%s1499_s25] sm:$0xff] %v1156_v62   ;;  %v920_v2 = vadd.f32 %v889_v0, %v888_v61  ;;  %v1270_v3 = vpop.f32.mrb[4].mxu0  ;;  %1240 = vst [vmem:[%s1499_s25 + $0x40] sm:$0xff] %v1196_v1   ;;  %v1318_v5 = vpop.f32.mrb[4].mxu1 }
 0x111   : > { %v1271_v4 = vpop.f32.mrb[5].mxu0  ;;  %v1319_v8 = vpop.f32.mrb[5].mxu1 }
 0x112   : > { %v1272_v6 = vadd.f32 %v1271_v4, %v1270_v3  ;;  %v1273_v7 = vpop.f32.mrb[6].mxu0  ;;  %v1595_v10 = vadd.f32 %v1319_v8, %v1318_v5  ;;  %v1321_v11 = vpop.f32.mrb[6].mxu1 }
 0x113   : > { %v1274_v9 = vpop.f32.mrb[7].mxu0  ;;  %v1322_v15 = vpop.f32.mrb[7].mxu1 }
 0x114   : > { %v849_v12 = vadd.f32 %v1272_v6, %v848_v63  ;;  %v890_v13 = vmul.f32 %v1272_v6, %v1272_v6  ;;  %v1275_v14 = vadd.f32 %v1274_v9, %v1273_v7  ;;  %v1597_v16 = vadd.f32 %v1322_v15, %v1321_v11 }
 0x116   : > { %v921_v17 = vadd.f32 %v920_v2, %v890_v13  ;;  %v1161_v18 = vpack.c.bf16 %v1275_v14, %v1272_v6  ;;  %v850_v19 = vadd.f32 %v1275_v14, %v849_v12  ;;  %v891_v20 = vmul.f32 %v1275_v14, %v1275_v14 }
 0x117   : > { %v1201_v21 = vpack.c.bf16 %v1597_v16, %v1595_v10 }
 0x118   : > { %1233 = vst [vmem:[%s1499_s25 + $0x8] sm:$0xff] %v1161_v18   ;;  %v922_v22 = vadd.f32 %v921_v17, %v891_v20  ;;  %v1276_v23 = vpop.f32.mrb[8].mxu0  ;;  %v1324_v25 = vpop.f32.mrb[8].mxu1 }
 0x119   : > { %v1277_v24 = vpop.f32.mrb[9].mxu0  ;;  %1241 = vst [vmem:[%s1499_s25 + $0x48] sm:$0xff] %v1201_v21   ;;  %v1325_v28 = vpop.f32.mrb[9].mxu1 }
 0x11a   : > { %v1278_v26 = vadd.f32 %v1277_v24, %v1276_v23  ;;  %v1279_v27 = vpop.f32.mrb[10].mxu0  ;;  %v1603_v30 = vadd.f32 %v1325_v28, %v1324_v25  ;;  %v1327_v31 = vpop.f32.mrb[10].mxu1 }
 0x11b   : > { %v1280_v29 = vpop.f32.mrb[11].mxu0  ;;  %v1328_v35 = vpop.f32.mrb[11].mxu1 }
 0x11c   : > { %v851_v32 = vadd.f32 %v1278_v26, %v850_v19  ;;  %v892_v33 = vmul.f32 %v1278_v26, %v1278_v26  ;;  %v1281_v34 = vadd.f32 %v1280_v29, %v1279_v27  ;;  %v1605_v36 = vadd.f32 %v1328_v35, %v1327_v31 }
 0x11e   : > { %v923_v37 = vadd.f32 %v922_v22, %v892_v33  ;;  %v1166_v38 = vpack.c.bf16 %v1281_v34, %v1278_v26  ;;  %v852_v39 = vadd.f32 %v1281_v34, %v851_v32  ;;  %v893_v40 = vmul.f32 %v1281_v34, %v1281_v34 }
 0x11f   : > { %v1206_v41 = vpack.c.bf16 %v1605_v36, %v1603_v30 }
 0x120   : > { %1234 = vst [vmem:[%s1499_s25 + $0x10] sm:$0xff] %v1166_v38   ;;  %v924_v42 = vadd.f32 %v923_v37, %v893_v40  ;;  %v1282_v43 = vpop.f32.mrb[12].mxu0  ;;  %v1330_v45 = vpop.f32.mrb[12].mxu1 }
 0x121   : > { %v1283_v44 = vpop.f32.mrb[13].mxu0  ;;  %1242 = vst [vmem:[%s1499_s25 + $0x50] sm:$0xff] %v1206_v41   ;;  %v1331_v48 = vpop.f32.mrb[13].mxu1 }
 0x122   : > { %v1284_v46 = vadd.f32 %v1283_v44, %v1282_v43  ;;  %v1285_v47 = vpop.f32.mrb[14].mxu0  ;;  %v1611_v50 = vadd.f32 %v1331_v48, %v1330_v45  ;;  %v1333_v51 = vpop.f32.mrb[14].mxu1 }
 0x123   : > { %v1286_v49 = vpop.f32.mrb[15].mxu0  ;;  %v1334_v55 = vpop.f32.mrb[15].mxu1 }
 0x124   : > { %v853_v52 = vadd.f32 %v1284_v46, %v852_v39  ;;  %v894_v53 = vmul.f32 %v1284_v46, %v1284_v46  ;;  %v1287_v54 = vadd.f32 %v1286_v49, %v1285_v47  ;;  %v1613_v57 = vadd.f32 %v1334_v55, %v1333_v51 }
 0x126   : > { %v925_v58 = vadd.f32 %v924_v42, %v894_v53  ;;  %v1171_v59 = vpack.c.bf16 %v1287_v54, %v1284_v46  ;;  %v854_v61 = vadd.f32 %v1287_v54, %v853_v52  ;;  %v895_v62 = vmul.f32 %v1287_v54, %v1287_v54 }
 0x127   : > { %v1211_v63 = vpack.c.bf16 %v1613_v57, %v1611_v50 }
 0x128   : > { %1235 = vst [vmem:[%s1499_s25 + $0x18] sm:$0xff] %v1171_v59   ;;  %v926_v0 = vadd.f32 %v925_v58, %v895_v62  ;;  %v1288_v1 = vpop.f32.mrb[16].mxu0  ;;  %v1336_v3 = vpop.f32.mrb[16].mxu1 }
 0x129   : > { %v1289_v2 = vpop.f32.mrb[17].mxu0  ;;  %1243 = vst [vmem:[%s1499_s25 + $0x58] sm:$0xff] %v1211_v63   ;;  %v1337_v6 = vpop.f32.mrb[17].mxu1 }
 0x12a   : > { %v1290_v4 = vadd.f32 %v1289_v2, %v1288_v1  ;;  %v1291_v5 = vpop.f32.mrb[18].mxu0  ;;  %v1619_v8 = vadd.f32 %v1337_v6, %v1336_v3  ;;  %v1339_v9 = vpop.f32.mrb[18].mxu1 }
 0x12b   : > { %v1292_v7 = vpop.f32.mrb[19].mxu0  ;;  %v1340_v14 = vpop.f32.mrb[19].mxu1 }
 0x12c   : > { %v855_v11 = vadd.f32 %v1290_v4, %v854_v61  ;;  %v896_v12 = vmul.f32 %v1290_v4, %v1290_v4  ;;  %v1293_v13 = vadd.f32 %v1292_v7, %v1291_v5  ;;  %v1621_v15 = vadd.f32 %v1340_v14, %v1339_v9 }
 0x12e   : > { %v927_v17 = vadd.f32 %v926_v0, %v896_v12  ;;  %v1176_v18 = vpack.c.bf16 %v1293_v13, %v1290_v4  ;;  %v856_v19 = vadd.f32 %v1293_v13, %v855_v11  ;;  %v897_v20 = vmul.f32 %v1293_v13, %v1293_v13 }
 0x12f   : > { %v1216_v21 = vpack.c.bf16 %v1621_v15, %v1619_v8 }
 0x130   : > { %1236 = vst [vmem:[%s1499_s25 + $0x20] sm:$0xff] %v1176_v18   ;;  %v928_v22 = vadd.f32 %v927_v17, %v897_v20  ;;  %v1294_v23 = vpop.f32.mrb[20].mxu0  ;;  %v1342_v25 = vpop.f32.mrb[20].mxu1 }
 0x131   : > { %v1295_v24 = vpop.f32.mrb[21].mxu0  ;;  %1244 = vst [vmem:[%s1499_s25 + $0x60] sm:$0xff] %v1216_v21   ;;  %v1343_v28 = vpop.f32.mrb[21].mxu1 }
 0x132   : > { %v1296_v26 = vadd.f32 %v1295_v24, %v1294_v23  ;;  %v1297_v27 = vpop.f32.mrb[22].mxu0  ;;  %v1627_v31 = vadd.f32 %v1343_v28, %v1342_v25  ;;  %v1345_v32 = vpop.f32.mrb[22].mxu1  ;;  %v904_v28 = vmul.f32 %v1587_v56, %v1587_v56 }
 0x133   : > { %v1298_v29 = vpop.f32.mrb[23].mxu0  ;;  %v1346_v37 = vpop.f32.mrb[23].mxu1 }
 0x134   : > { %v857_v33 = vadd.f32 %v1296_v26, %v856_v19  ;;  %v898_v34 = vmul.f32 %v1296_v26, %v1296_v26  ;;  %v1299_v35 = vadd.f32 %v1298_v29, %v1297_v27  ;;  %v1629_v38 = vadd.f32 %v1346_v37, %v1345_v32 }
 0x135   : > { %v906_v37 = vmul.f32 %v1595_v10, %v1595_v10 }
 0x136   : > { %v929_v39 = vadd.f32 %v928_v22, %v898_v34  ;;  %v1181_v40 = vpack.c.bf16 %v1299_v35, %v1296_v26  ;;  %v858_v41 = vadd.f32 %v1299_v35, %v857_v33  ;;  %v899_v42 = vmul.f32 %v1299_v35, %v1299_v35 }
 0x137   : > { %v1221_v43 = vpack.c.bf16 %v1629_v38, %v1627_v31  ;;  %v905_v33 = vmul.f32 %v1589_v60, %v1589_v60 }
 0x138   : > { %1237 = vst [vmem:[%s1499_s25 + $0x28] sm:$0xff] %v1181_v40   ;;  %v930_v44 = vadd.f32 %v929_v39, %v899_v42  ;;  %v1300_v45 = vpop.f32.mrb[24].mxu0  ;;  %v1348_v47 = vpop.f32.mrb[24].mxu1 }
 0x139   : > { %v1301_v46 = vpop.f32.mrb[25].mxu0  ;;  %1245 = vst [vmem:[%s1499_s25 + $0x68] sm:$0xff] %v1221_v43   ;;  %v1349_v51 = vpop.f32.mrb[25].mxu1  ;;  %v908_v43 = vmul.f32 %v1603_v30, %v1603_v30 }
 0x13a   : > { %v1302_v48 = vadd.f32 %v1301_v46, %v1300_v45  ;;  %v1303_v49 = vpop.f32.mrb[26].mxu0  ;;  %v1635_v53 = vadd.f32 %v1349_v51, %v1348_v47  ;;  %v1351_v54 = vpop.f32.mrb[26].mxu1 }
 0x13b   : > { %v1304_v52 = vpop.f32.mrb[27].mxu0  ;;  %v1352_v61 = vpop.f32.mrb[27].mxu1 }
 0x13c   : > { %v859_v55 = vadd.f32 %v1302_v48, %v858_v41  ;;  %v900_v58 = vmul.f32 %v1302_v48, %v1302_v48  ;;  %v1305_v59 = vadd.f32 %v1304_v52, %v1303_v49  ;;  %v1637_v62 = vadd.f32 %v1352_v61, %v1351_v54 }
 0x13d   : > { %v907_v41 = vmul.f32 %v1597_v16, %v1597_v16  ;;  %v912_v54 = vmul.f32 %v1619_v8, %v1619_v8 }
 0x13e   : > { %v931_v63 = vadd.f32 %v930_v44, %v900_v58  ;;  %v1186_v0 = vpack.c.bf16 %v1305_v59, %v1302_v48  ;;  %v860_v1 = vadd.f32 %v1305_v59, %v859_v55  ;;  %v901_v2 = vmul.f32 %v1305_v59, %v1305_v59 }
 0x13f   : > { %v1226_v3 = vpack.c.bf16 %v1637_v62, %v1635_v53  ;;  %v913_v59 = vmul.f32 %v1621_v15, %v1621_v15 }
 0x140   : > { %1238 = vst [vmem:[%s1499_s25 + $0x30] sm:$0xff] %v1186_v0   ;;  %v932_v4 = vadd.f32 %v931_v63, %v901_v2  ;;  %v1306_v5 = vpop.f32.mrb[28].mxu0  ;;  %v1354_v7 = vpop.f32.mrb[28].mxu1  ;;  %v914_v63 = vmul.f32 %v1627_v31, %v1627_v31 }
 0x141   : > { %v1307_v6 = vpop.f32.mrb[29].mxu0  ;;  %1246 = vst [vmem:[%s1499_s25 + $0x70] sm:$0xff] %v1226_v3   ;;  %v1355_v12 = vpop.f32.mrb[29].mxu1  ;;  %v916_v3 = vmul.f32 %v1635_v53, %v1635_v53 }
 0x142   : > { %v1308_v9 = vadd.f32 %v1307_v6, %v1306_v5  ;;  %v1309_v11 = vpop.f32.mrb[30].mxu0  ;;  %v1356_v14 = vadd.f32 %v1355_v12, %v1354_v7  ;;  %v1357_v17 = vpop.f32.mrb[30].mxu1  ;;  %v917_v5 = vmul.f32 %v1637_v62, %v1637_v62 }
 0x143   : > { %v1310_v13 = vpop.f32.mrb[31].mxu0  ;;  %v1358_v21 = vpop.f32.mrb[31].mxu1 }
 0x144   : > { %v861_v18 = vadd.f32 %v1308_v9, %v860_v1  ;;  %v902_v19 = vmul.f32 %v1308_v9, %v1308_v9  ;;  %v1311_v20 = vadd.f32 %v1310_v13, %v1309_v11  ;;  %v1359_v22 = vadd.f32 %v1358_v21, %v1357_v17 }
 0x145   : > { %v915_v1 = vmul.f32 %v1629_v38, %v1629_v38  ;;  %v918_v6 = vmul.f32 %v1356_v14, %v1356_v14 }
 0x146   : > { %v933_v23 = vadd.f32 %v932_v4, %v902_v19  ;;  %v1191_v24 = vpack.c.bf16 %v1311_v20, %v1308_v9  ;;  %v862_v25 = vadd.f32 %v1311_v20, %v861_v18  ;;  %v903_v26 = vmul.f32 %v1311_v20, %v1311_v20 }
 0x147   : > { %v1231_v27 = vpack.c.bf16 %v1359_v22, %v1356_v14  ;;  %v919_v12 = vmul.f32 %v1359_v22, %v1359_v22 }
 0x148   : > { %1239 = vst [vmem:[%s1499_s25 + $0x38] sm:$0xff] %v1191_v24   ;;  %v863_v29 = vadd.f32 %v1587_v56, %v862_v25  ;;  %v934_v32 = vadd.f32 %v933_v23, %v903_v26 }
 0x149   : > { %1247 = vst [vmem:[%s1499_s25 + $0x78] sm:$0xff] %v1231_v27  }
 0x14a   : > { %v864_v34 = vadd.f32 %v1589_v60, %v863_v29  ;;  %v935_v35 = vadd.f32 %v934_v32, %v904_v28  ;;  %v909_v60 = vmul.f32 %v1605_v36, %v1605_v36 }
 0x14c   : > { %v865_v39 = vadd.f32 %v1595_v10, %v864_v34  ;;  %v936_v40 = vadd.f32 %v935_v35, %v905_v33  ;;  %v910_v10 = vmul.f32 %v1611_v50, %v1611_v50 }
 0x14e   : > { %v866_v42 = vadd.f32 %v1597_v16, %v865_v39  ;;  %v937_v56 = vadd.f32 %v936_v40, %v906_v37  ;;  %v911_v16 = vmul.f32 %v1613_v57, %v1613_v57 }
 0x150   : > { %v938_v44 = vadd.f32 %v937_v56, %v907_v41  ;;  %v867_v45 = vadd.f32 %v1603_v30, %v866_v42 }
 0x152   : > { %v868_v46 = vadd.f32 %v1605_v36, %v867_v45  ;;  %v939_v47 = vadd.f32 %v938_v44, %v908_v43 }
 0x154   : > { %v869_v48 = vadd.f32 %v1611_v50, %v868_v46  ;;  %v940_v49 = vadd.f32 %v939_v47, %v909_v60 }
 0x156   : > { %v870_v51 = vadd.f32 %v1613_v57, %v869_v48  ;;  %v941_v52 = vadd.f32 %v940_v49, %v910_v10 }
 0x158   : > { %v871_v30 = vadd.f32 %v1619_v8, %v870_v51  ;;  %v942_v55 = vadd.f32 %v941_v52, %v911_v16 }
 0x15a   : > { %v943_v36 = vadd.f32 %v942_v55, %v912_v54  ;;  %v872_v58 = vadd.f32 %v1621_v15, %v871_v30 }
 0x15c   : > { %v944_v50 = vadd.f32 %v943_v36, %v913_v59  ;;  %v873_v61 = vadd.f32 %v1627_v31, %v872_v58 }
 0x15e   : > { %v945_v57 = vadd.f32 %v944_v50, %v914_v63  ;;  %v874_v0 = vadd.f32 %v1629_v38, %v873_v61 }
 0x160   : > { %v946_v8 = vadd.f32 %v945_v57, %v915_v1  ;;  %v875_v2 = vadd.f32 %v1635_v53, %v874_v0 }
 0x162   : > { %v947_v4 = vadd.f32 %v946_v8, %v916_v3  ;;  %v876_v15 = vadd.f32 %v1637_v62, %v875_v2  ;;  %v847_v62 = vld [vmem:[%s1705_s3] sm:$0x1] }
 0x164   : > { %v948_v31 = vadd.f32 %v947_v4, %v917_v5  ;;  %v877_v7 = vadd.f32 %v1356_v14, %v876_v15  ;;  %v887_v14 = vld [vmem:[%s1706_s4] sm:$0x1] }
 0x166   : > { %v949_v9 = vadd.f32 %v948_v31, %v918_v6  ;;  %v878_v11 = vadd.f32 %v1359_v22, %v877_v7 }
 0x168   : > { %v879_v13 = vrot.slane %v878_v11, 4  ;;  %v950_v38 = vadd.f32 %v949_v9, %v919_v12 }
 0x16a   : > { %v880_v17 = vadd.f32 %v879_v13, %v878_v11  ;;  %v951_v18 = vrot.slane %v950_v38, 4 }
 0x16c   : > { %v881_v19 = vrot.slane %v880_v17, 2  ;;  %v952_v20 = vadd.f32 %v951_v18, %v950_v38 }
 0x16e   : > { %v882_v21 = vadd.f32 %v881_v19, %v880_v17  ;;  %v953_v53 = vrot.slane %v952_v20, 2 }
 0x170   : > { %v883_v23 = vrot.slane %v882_v21, 1  ;;  %v954_v24 = vadd.f32 %v953_v53, %v952_v20 }
 0x172   : > { %v884_v25 = vadd.f32 %v883_v23, %v882_v21  ;;  %v955_v26 = vrot.slane %v954_v24, 1 }
 0x174   : > { %v885_v22 = vadd.f32 %v884_v25, %v847_v62  ;;  %v956_v27 = vadd.f32 %v955_v26, %v954_v24 }
 0x176   : > { %886 = vst [vmem:[%s1705_s3] sm:$0x1] %v885_v22  ;;  %v957_v28 = vadd.f32 %v956_v27, %v887_v14 }
 0x178   : > { %958 = vst [vmem:[%s1706_s4] sm:$0x1] %v957_v28 }
 0x179 PF: > { %s15_s15 = sadd.s32 1, %s1455_s15  }
 0x17a   : > { %p12_p5 = scmp.ge.s32.totalorder %s15_s15, 6  }
 0x17c   :  { %14 = sbr.rel (!%p12_p5) target bundleno = 1 (0x1), region = 78 }

// kernel: graph_res_blocks_forward.19
= control target key start
LH: loop header
LB: loop body
LE: loop exit
PB: predicated region body
PF: predicated region fallthrough
CT: control target
= control target key end

     0   :  { %11 = vsyncpa [#allocation3], 0  ;;  %s1818_s0 = inlined_call_operand.vmem [shape: bf16[1024,256], index: 0, kind: input, shape index: {}]   ;;  %s1819_s1 = inlined_call_operand.vmem [shape: bf16[256,128], index: 1, kind: input, shape index: {}]   ;;  %s1820_s2 = inlined_call_operand.vmem [shape: bf16[1024,128], index: 2, kind: input, shape index: {}]   ;;  %s1821_s3 = inlined_call_operand.vmem [shape: f32[1024,128], index: 3, kind: output, shape index: {0}]   ;;  %s1822_s4 = inlined_call_operand.hbm [shape: f32[1,128], index: 4, kind: output, shape index: {1}]   ;;  %s1823_s5 = inlined_call_operand.hbm [shape: f32[1,128], index: 5, kind: output, shape index: {2}]  }
   0x1   :  { %12 = vsyncpa [#allocation5], 0  ;;  %s1523_s18 = smov 0  }
   0x2 LB: > { %s1529_s19 = sadd.s32 4294967295, %s1488_s18   ;;  %p1064_p0 = scmp.ge.s32.totalorder %s1488_s18, 1  ;;  %s1488_s18 = sphi %s1523_s18, %s18_s18  }
   0x3   : > { %p197_p1 = scmp.lt.s32.totalorder %s1488_s18, 5 }
   0x5   : > { %p198_p2 = pnand %p1064_p0, %p197_p1 }
   0x6   : > { %s1065_s20 = sshll.u32 (!%p198_p2), %s1529_s19, 5  ;;  %p1072_p4 = scmp.ne.s32.totalorder (!%p198_p2), %s1529_s19, 0 }
   0x7   : > { %201 = sbr.rel (%p198_p2) target bundleno = 415 (0x19f), region = 32  ;;  %p232_p3 = scmp.lt.s32.totalorder (!%p198_p2), %s1065_s20, 127 }
   0xe   : > { %s1825_s20 = smov (!%p232_p3, %s1065_s20), 127  ;;  %254 = sbr.rel (%p1072_p4) target bundleno = 21 (0x15), region = 36 }
   0xf   : > { %s1127_s21 = sshll.u32 %s1825_s20, 3  ;;  %s1069_s22 = sshll.u32 %s1825_s20, 2  ;;  %v1490_v0 = vmov (!%p1072_p4), 0.0  }
  0x10   : > { %s1537_s25 = scalar_lea.vmem %s1818_s0, %s1127_s21  ;;  %s1542_s28 = scalar_lea.vmem %s1820_s2, %s1069_s22  ;;  %255 = vst [vmem:[#allocation2] sm:$0x1] (!%p1072_p4), %v1490_v0  ;;  %256 = vst [vmem:[#allocation4] sm:$0x1] (!%p1072_p4), %v1490_v0 }
  0x11   : > { %s1547_s6 = scalar_lea.vmem %s1821_s3, %s1127_s21 }
  0x15 PF: > { %v1358_v1 = vld [vmem:[%s1819_s1 + $0x40] sm:$0xff]   ;;  %v1360_v3 = vld [vmem:[%s1819_s1 + $0x48] sm:$0xff]   ;;  %v1362_v5 = vld [vmem:[%s1819_s1 + $0x50] sm:$0xff]   ;;  %p1343_p5 = scmp.eq.s32.totalorder %s1529_s19, 3 }
  0x16   : > { %v1359_v2 = vld [vmem:[%s1819_s1] sm:$0xff]   ;;  %1207 = vmatprep.subr.bf16.mxu0 %v1358_v1  ;;  %1319 = vmatprep.subr.bf16.mxu1 %v1358_v1  ;;  %v1361_v4 = vld [vmem:[%s1819_s1 + $0x8] sm:$0xff]   ;;  %v1363_v6 = vld [vmem:[%s1819_s1 + $0x10] sm:$0xff]  }
  0x17   : > { %1208 = vmatpush3.bf16.msra.mxu0 %v1359_v2  ;;  %1327 = vmatpush3.bf16.msra.mxu1 %v1359_v2  ;;  %v1364_v7 = vld [vmem:[%s1819_s1 + $0x58] sm:$0xff]   ;;  %v1366_v9 = vld [vmem:[%s1819_s1 + $0x60] sm:$0xff]   ;;  %v1368_v11 = vld [vmem:[%s1819_s1 + $0x68] sm:$0xff]  }
  0x18   : > { %1209 = vmatprep.subr.bf16.mxu0 %v1360_v3  ;;  %1320 = vmatprep.subr.bf16.mxu1 %v1360_v3  ;;  %v1365_v8 = vld [vmem:[%s1819_s1 + $0x18] sm:$0xff]   ;;  %v1367_v10 = vld [vmem:[%s1819_s1 + $0x20] sm:$0xff]   ;;  %v1369_v13 = vld [vmem:[%s1819_s1 + $0x28] sm:$0xff]  }
  0x19   : > { %v1376_v12 = vld [vmem:[%s1537_s25 + $0x4] ss:$8 sps:$4 sm:$0xff]   ;;  %v1370_v14 = vld [vmem:[%s1819_s1 + $0x70] sm:$0xff]   ;;  %v1372_v17 = vld [vmem:[%s1819_s1 + $0x78] sm:$0xff]  }
  0x1a   : > { %673 = vmatprep.mubr.bf16.mxu0 %v1376_v12  ;;  %v1388_v15 = vld [vmem:[%s1537_s25 + $0x84] ss:$8 sps:$4 sm:$0xff]   ;;  %v1371_v16 = vld [vmem:[%s1819_s1 + $0x30] sm:$0xff]   ;;  %v1373_v18 = vld [vmem:[%s1819_s1 + $0x38] sm:$0xff]  }
  0x1b   : > { %1210 = vmatpush3.bf16.msra.mxu0 %v1361_v4  ;;  %1328 = vmatpush3.bf16.msra.mxu1 %v1361_v4  ;;  %v1374_v19 = vld [vmem:[%s1537_s25] ss:$8 sps:$4 sm:$0xff]   ;;  %v1377_v20 = vld [vmem:[%s1537_s25 + $0x14] ss:$8 sps:$4 sm:$0xff]   ;;  %v1379_v23 = vld [vmem:[%s1537_s25 + $0x10] ss:$8 sps:$4 sm:$0xff]  }
  0x1c   : > { %1211 = vmatprep.subr.bf16.mxu0 %v1362_v5  ;;  %1321 = vmatprep.subr.bf16.mxu1 %v1362_v5  ;;  %v1386_v21 = vld [vmem:[%s1537_s25 + $0x80] ss:$8 sps:$4 sm:$0xff]   ;;  %v1392_v22 = vld [vmem:[%s1537_s25 + $0x94] ss:$8 sps:$4 sm:$0xff]   ;;  %v1380_v24 = vld [vmem:[%s1537_s25 + $0x24] ss:$8 sps:$4 sm:$0xff]  }
  0x1d   : > { %737 = vmatprep.mubr.bf16.mxu1 %v1388_v15  ;;  %v1394_v25 = vld [vmem:[%s1537_s25 + $0x90] ss:$8 sps:$4 sm:$0xff]   ;;  %v1398_v26 = vld [vmem:[%s1537_s25 + $0xa4] ss:$8 sps:$4 sm:$0xff]   ;;  %v1382_v27 = vld [vmem:[%s1537_s25 + $0x20] ss:$8 sps:$4 sm:$0xff]  }
  0x1e   : > { %v1383_v28 = vld [vmem:[%s1537_s25 + $0x34] ss:$8 sps:$4 sm:$0xff]   ;;  %v1400_v29 = vld [vmem:[%s1537_s25 + $0xa0] ss:$8 sps:$4 sm:$0xff]   ;;  %v1385_v31 = vld [vmem:[%s1537_s25 + $0x30] ss:$8 sps:$4 sm:$0xff]  }
  0x1f   : > { %1212 = vmatpush3.bf16.msra.mxu0 %v1363_v6  ;;  %1329 = vmatpush3.bf16.msra.mxu1 %v1363_v6  ;;  %v1404_v30 = vld [vmem:[%s1537_s25 + $0xb4] ss:$8 sps:$4 sm:$0xff]   ;;  %v1389_v32 = vld [vmem:[%s1537_s25 + $0x44] ss:$8 sps:$4 sm:$0xff]   ;;  %v1406_v33 = vld [vmem:[%s1537_s25 + $0xb0] ss:$8 sps:$4 sm:$0xff]  }
  0x20   : > { %1213 = vmatprep.subr.bf16.mxu0 %v1364_v7  ;;  %1322 = vmatprep.subr.bf16.mxu1 %v1364_v7  ;;  %v1410_v34 = vld [vmem:[%s1537_s25 + $0xc4] ss:$8 sps:$4 sm:$0xff]   ;;  %v1391_v35 = vld [vmem:[%s1537_s25 + $0x40] ss:$8 sps:$4 sm:$0xff]   ;;  %v1395_v36 = vld [vmem:[%s1537_s25 + $0x54] ss:$8 sps:$4 sm:$0xff]  }
  0x21   : > { %v1412_v37 = vld [vmem:[%s1537_s25 + $0xc0] ss:$8 sps:$4 sm:$0xff]   ;;  %v1413_v38 = vld [vmem:[%s1537_s25 + $0xd4] ss:$8 sps:$4 sm:$0xff]   ;;  %v1397_v39 = vld [vmem:[%s1537_s25 + $0x50] ss:$8 sps:$4 sm:$0xff]  }
  0x22   : > { %v1401_v40 = vld [vmem:[%s1537_s25 + $0x64] ss:$8 sps:$4 sm:$0xff]   ;;  %v1415_v41 = vld [vmem:[%s1537_s25 + $0xd0] ss:$8 sps:$4 sm:$0xff]   ;;  %v1403_v43 = vld [vmem:[%s1537_s25 + $0x60] ss:$8 sps:$4 sm:$0xff]  }
  0x23   : > { %1214 = vmatpush3.bf16.msra.mxu0 %v1365_v8  ;;  %1330 = vmatpush3.bf16.msra.mxu1 %v1365_v8  ;;  %v1416_v42 = vld [vmem:[%s1537_s25 + $0xe4] ss:$8 sps:$4 sm:$0xff]   ;;  %v1407_v44 = vld [vmem:[%s1537_s25 + $0x74] ss:$8 sps:$4 sm:$0xff]   ;;  %v1418_v45 = vld [vmem:[%s1537_s25 + $0xe0] ss:$8 sps:$4 sm:$0xff]  }
  0x24   : > { %1215 = vmatprep.subr.bf16.mxu0 %v1366_v9  ;;  %1323 = vmatprep.subr.bf16.mxu1 %v1366_v9  ;;  %v1419_v46 = vld [vmem:[%s1537_s25 + $0xf4] ss:$8 sps:$4 sm:$0xff]   ;;  %v1409_v47 = vld [vmem:[%s1537_s25 + $0x70] ss:$8 sps:$4 sm:$0xff]   ;;  %v1129_v49 = vld [vmem:[%s1542_s28] sm:$0xff]  }
  0x25   : > { %v1421_v48 = vld [vmem:[%s1537_s25 + $0xf0] ss:$8 sps:$4 sm:$0xff]   ;;  %v1199_v50 = vld [vmem:[%s1542_s28 + $0x40] sm:$0xff]   ;;  %v1130_v52 = vunpack.c.l.bf16 %v1129_v49  ;;  %v1131_v58 = vunpack.c.h.bf16 %v1129_v49  ;;  %v1192_v3 = vld [vmem:[%s1542_s28 + $0x8] sm:$0xff]   ;;  %s1491_s25 = smov [#allocation2]  }
  0x26   : > { %v1162_v55 = vunpack.c.l.bf16 %v1199_v50  ;;  %v1163_v63 = vunpack.c.h.bf16 %v1199_v50  ;;  %v1200_v7 = vld [vmem:[%s1542_s28 + $0x48] sm:$0xff]  }
  0x27   : > { %1216 = vmatpush3.bf16.msra.mxu0 %v1367_v10  ;;  %1331 = vmatpush3.bf16.msra.mxu1 %v1367_v10 }
  0x28   : > { %1217 = vmatprep.subr.bf16.mxu0 %v1368_v11  ;;  %1324 = vmatprep.subr.bf16.mxu1 %v1368_v11 }
  0x2b   : > { %1218 = vmatpush3.bf16.msra.mxu0 %v1369_v13  ;;  %1332 = vmatpush3.bf16.msra.mxu1 %v1369_v13  ;;  %v1134_v13 = vunpack.c.l.bf16 %v1192_v3 }
  0x2c   : > { %1219 = vmatprep.subr.bf16.mxu0 %v1370_v14  ;;  %1325 = vmatprep.subr.bf16.mxu1 %v1370_v14 }
  0x2f   : > { %1220 = vmatpush3.bf16.msra.mxu0 %v1371_v16  ;;  %1333 = vmatpush3.bf16.msra.mxu1 %v1371_v16  ;;  %v1166_v16 = vunpack.c.l.bf16 %v1200_v7 }
  0x30   : > { %1221 = vmatprep.subr.bf16.mxu0 %v1372_v17  ;;  %1326 = vmatprep.subr.bf16.mxu1 %v1372_v17 }
  0x33   : > { %1222 = vmatpush3.bf16.msra.mxu0 %v1373_v18  ;;  %1334 = vmatpush3.bf16.msra.mxu1 %v1373_v18 }
  0x36   : > { %674 = vmatmul.mubr.bf16.vlgmr.msra.gmra.mrb[0].mxu0 %v1374_v19  ;;  %738 = vmatmul.mubr.bf16.vlgmr.msra.gmra.mrb[0].mxu1 %v1386_v21 }
  0x37   : > { %681 = vmatprep.mubr.bf16.mxu0 %v1377_v20  ;;  %745 = vmatprep.mubr.bf16.mxu1 %v1392_v22  ;;  %v1135_v20 = vunpack.c.h.bf16 %v1192_v3 }
  0x3e   : > { %682 = vmatmul.mubr.bf16.gmra.mrb[4].mxu0 %v1379_v23  ;;  %746 = vmatmul.mubr.bf16.gmra.mrb[4].mxu1 %v1394_v25  ;;  %v1167_v25 = vunpack.c.h.bf16 %v1200_v7 }
  0x3f   : > { %689 = vmatprep.mubr.bf16.mxu0 %v1380_v24  ;;  %753 = vmatprep.mubr.bf16.mxu1 %v1398_v26 }
  0x46   : > { %690 = vmatmul.mubr.bf16.gmra.mrb[8].mxu0 %v1382_v27  ;;  %754 = vmatmul.mubr.bf16.gmra.mrb[8].mxu1 %v1400_v29  ;;  %v1193_v29 = vld [vmem:[%s1542_s28 + $0x10] sm:$0xff]  }
  0x47   : > { %697 = vmatprep.mubr.bf16.mxu0 %v1383_v28  ;;  %761 = vmatprep.mubr.bf16.mxu1 %v1404_v30 }
  0x4e   : > { %698 = vmatmul.mubr.bf16.gmra.mrb[12].mxu0 %v1385_v31  ;;  %762 = vmatmul.mubr.bf16.gmra.mrb[12].mxu1 %v1406_v33 }
  0x4f   : > { %705 = vmatprep.mubr.bf16.mxu0 %v1389_v32  ;;  %769 = vmatprep.mubr.bf16.mxu1 %v1410_v34 }
  0x56   : > { %706 = vmatmul.mubr.bf16.gmra.mrb[16].mxu0 %v1391_v35  ;;  %770 = vmatmul.mubr.bf16.gmra.mrb[16].mxu1 %v1412_v37  ;;  %v1201_v35 = vld [vmem:[%s1542_s28 + $0x50] sm:$0xff]  }
  0x57   : > { %713 = vmatprep.mubr.bf16.mxu0 %v1395_v36  ;;  %777 = vmatprep.mubr.bf16.mxu1 %v1413_v38 }
  0x5e   : > { %714 = vmatmul.mubr.bf16.gmra.mrb[20].mxu0 %v1397_v39  ;;  %778 = vmatmul.mubr.bf16.gmra.mrb[20].mxu1 %v1415_v41  ;;  %v1138_v41 = vunpack.c.l.bf16 %v1193_v29 }
  0x5f   : > { %721 = vmatprep.mubr.bf16.mxu0 %v1401_v40  ;;  %785 = vmatprep.mubr.bf16.mxu1 %v1416_v42 }
  0x66   : > { %722 = vmatmul.mubr.bf16.gmra.mrb[24].mxu0 %v1403_v43  ;;  %786 = vmatmul.mubr.bf16.gmra.mrb[24].mxu1 %v1418_v45 }
  0x67   : > { %729 = vmatprep.mubr.bf16.mxu0 %v1407_v44  ;;  %793 = vmatprep.mubr.bf16.mxu1 %v1419_v46  ;;  %v1170_v44 = vunpack.c.l.bf16 %v1201_v35 }
  0x6e   : > { %730 = vmatmul.mubr.bf16.gmra.mrb[28].mxu0 %v1409_v47  ;;  %794 = vmatmul.mubr.bf16.gmra.mrb[28].mxu1 %v1421_v48  ;;  %v1139_v48 = vunpack.c.h.bf16 %v1193_v29  ;;  %v1203_v29 = vld [vmem:[%s1542_s28 + $0x60] sm:$0xff]  }
 0x109   : > { %v1223_v51 = vpop.f32.mrb[0].mxu0  ;;  %v1271_v54 = vpop.f32.mrb[0].mxu1 }
 0x10a   : > { %v1224_v53 = vpop.f32.mrb[1].mxu0  ;;  %v1272_v59 = vpop.f32.mrb[1].mxu1 }
 0x10b   : > { %v1225_v56 = vadd.f32 %v1224_v53, %v1223_v51  ;;  %v1226_v57 = vpop.f32.mrb[2].mxu0  ;;  %v1273_v61 = vadd.f32 %v1272_v59, %v1271_v54  ;;  %v1274_v62 = vpop.f32.mrb[2].mxu1  ;;  %v1171_v53 = vunpack.c.h.bf16 %v1201_v35 }
 0x10c   : > { %v1227_v60 = vpop.f32.mrb[3].mxu0  ;;  %v1275_v2 = vpop.f32.mrb[3].mxu1 }
 0x10d   : > { %v676_v0 = vadd.f32 %v1225_v56, %v1130_v52  ;;  %v1228_v1 = vadd.f32 %v1227_v60, %v1226_v57  ;;  %v1633_v4 = vadd.f32 %v1273_v61, %v1162_v55  ;;  %v1276_v5 = vadd.f32 %v1275_v2, %v1274_v62  ;;  %v1194_v57 = vld [vmem:[%s1542_s28 + $0x18] sm:$0xff]  }
 0x10f   : > { %802 = vst [vmem:[%s1547_s6] sm:$0xff] %v676_v0  ;;  %v679_v6 = vadd.f32 %v1228_v1, %v1131_v58  ;;  %818 = vst [vmem:[%s1547_s6 + $0x80] sm:$0xff] %v1633_v4  ;;  %v1639_v8 = vadd.f32 %v1276_v5, %v1163_v63  ;;  %v875_v9 = vmul.f32 %v676_v0, %v676_v0  ;;  %v1202_v63 = vld [vmem:[%s1542_s28 + $0x58] sm:$0xff]  }
 0x111   : > { %803 = vst [vmem:[%s1547_s6 + $0x8] sm:$0xff] %v679_v6  ;;  %v835_v10 = vadd.f32 %v679_v6, %v676_v0  ;;  %v876_v11 = vmul.f32 %v679_v6, %v679_v6  ;;  %v1229_v12 = vpop.f32.mrb[4].mxu0  ;;  %819 = vst [vmem:[%s1547_s6 + $0x88] sm:$0xff] %v1639_v8  ;;  %v1277_v15 = vpop.f32.mrb[4].mxu1  ;;  %v1142_v6 = vunpack.c.l.bf16 %v1194_v57 }
 0x112   : > { %v1230_v14 = vpop.f32.mrb[5].mxu0  ;;  %v1278_v21 = vpop.f32.mrb[5].mxu1 }
 0x113   : > { %v907_v17 = vadd.f32 %v876_v11, %v875_v9  ;;  %v1231_v18 = vadd.f32 %v1230_v14, %v1229_v12  ;;  %v1232_v19 = vpop.f32.mrb[6].mxu0  ;;  %v1279_v23 = vadd.f32 %v1278_v21, %v1277_v15  ;;  %v1280_v24 = vpop.f32.mrb[6].mxu1  ;;  %v1143_v14 = vunpack.c.h.bf16 %v1194_v57 }
 0x114   : > { %v1233_v22 = vpop.f32.mrb[7].mxu0  ;;  %v1281_v28 = vpop.f32.mrb[7].mxu1 }
 0x115   : > { %v684_v26 = vadd.f32 %v1231_v18, %v1134_v13  ;;  %v1234_v27 = vadd.f32 %v1233_v22, %v1232_v19  ;;  %v1645_v30 = vadd.f32 %v1279_v23, %v1166_v16  ;;  %v1282_v31 = vadd.f32 %v1281_v28, %v1280_v24  ;;  %v1195_v23 = vld [vmem:[%s1542_s28 + $0x20] sm:$0xff]  }
 0x116   : > { %v1175_v19 = vunpack.c.h.bf16 %v1202_v63 }
 0x117   : > { %804 = vst [vmem:[%s1547_s6 + $0x10] sm:$0xff] %v684_v26  ;;  %v836_v32 = vadd.f32 %v835_v10, %v684_v26  ;;  %v877_v33 = vmul.f32 %v684_v26, %v684_v26  ;;  %v687_v34 = vadd.f32 %v1234_v27, %v1135_v20  ;;  %820 = vst [vmem:[%s1547_s6 + $0x90] sm:$0xff] %v1645_v30  ;;  %v1174_v10 = vunpack.c.l.bf16 %v1202_v63 }
 0x118   : > { %v1651_v36 = vadd.f32 %v1282_v31, %v1167_v25 }
 0x119   : > { %v908_v37 = vadd.f32 %v907_v17, %v877_v33  ;;  %805 = vst [vmem:[%s1547_s6 + $0x18] sm:$0xff] %v687_v34  ;;  %v837_v38 = vadd.f32 %v836_v32, %v687_v34  ;;  %v878_v39 = vmul.f32 %v687_v34, %v687_v34  ;;  %v1235_v40 = vpop.f32.mrb[8].mxu0  ;;  %v1283_v43 = vpop.f32.mrb[8].mxu1 }
 0x11a   : > { %v1236_v42 = vpop.f32.mrb[9].mxu0  ;;  %821 = vst [vmem:[%s1547_s6 + $0x98] sm:$0xff] %v1651_v36  ;;  %v1284_v49 = vpop.f32.mrb[9].mxu1 }
 0x11b   : > { %v909_v45 = vadd.f32 %v908_v37, %v878_v39  ;;  %v1237_v46 = vadd.f32 %v1236_v42, %v1235_v40  ;;  %v1238_v47 = vpop.f32.mrb[10].mxu0  ;;  %v1285_v51 = vadd.f32 %v1284_v49, %v1283_v43  ;;  %v1286_v52 = vpop.f32.mrb[10].mxu1  ;;  %v1146_v37 = vunpack.c.l.bf16 %v1195_v23 }
 0x11c   : > { %v1239_v50 = vpop.f32.mrb[11].mxu0  ;;  %v1287_v56 = vpop.f32.mrb[11].mxu1  ;;  %v1178_v40 = vunpack.c.l.bf16 %v1203_v29  ;;  %v1179_v49 = vunpack.c.h.bf16 %v1203_v29 }
 0x11d   : > { %v692_v54 = vadd.f32 %v1237_v46, %v1138_v41  ;;  %v1240_v55 = vadd.f32 %v1239_v50, %v1238_v47  ;;  %v1657_v58 = vadd.f32 %v1285_v51, %v1170_v44  ;;  %v1288_v59 = vadd.f32 %v1287_v56, %v1286_v52 }
 0x11e   : > { %v1147_v44 = vunpack.c.h.bf16 %v1195_v23 }
 0x11f   : > { %806 = vst [vmem:[%s1547_s6 + $0x20] sm:$0xff] %v692_v54  ;;  %v838_v60 = vadd.f32 %v837_v38, %v692_v54  ;;  %v879_v61 = vmul.f32 %v692_v54, %v692_v54  ;;  %v695_v62 = vadd.f32 %v1240_v55, %v1139_v48  ;;  %822 = vst [vmem:[%s1547_s6 + $0xa0] sm:$0xff] %v1657_v58 }
 0x120   : > { %v1663_v0 = vadd.f32 %v1288_v59, %v1171_v53  ;;  %v1196_v53 = vld [vmem:[%s1542_s28 + $0x28] sm:$0xff]  }
 0x121   : > { %v910_v1 = vadd.f32 %v909_v45, %v879_v61  ;;  %807 = vst [vmem:[%s1547_s6 + $0x28] sm:$0xff] %v695_v62  ;;  %v839_v2 = vadd.f32 %v838_v60, %v695_v62  ;;  %v880_v3 = vmul.f32 %v695_v62, %v695_v62  ;;  %v1241_v5 = vpop.f32.mrb[12].mxu0  ;;  %v1289_v9 = vpop.f32.mrb[12].mxu1  ;;  %v1204_v60 = vld [vmem:[%s1542_s28 + $0x68] sm:$0xff]  }
 0x122   : > { %v1242_v7 = vpop.f32.mrb[13].mxu0  ;;  %823 = vst [vmem:[%s1547_s6 + $0xa8] sm:$0xff] %v1663_v0  ;;  %v1290_v15 = vpop.f32.mrb[13].mxu1 }
 0x123   : > { %v911_v11 = vadd.f32 %v910_v1, %v880_v3  ;;  %v1243_v12 = vadd.f32 %v1242_v7, %v1241_v5  ;;  %v1244_v13 = vpop.f32.mrb[14].mxu0  ;;  %v1291_v17 = vadd.f32 %v1290_v15, %v1289_v9  ;;  %v1292_v18 = vpop.f32.mrb[14].mxu1  ;;  %v1150_v3 = vunpack.c.l.bf16 %v1196_v53 }
 0x124   : > { %v1245_v16 = vpop.f32.mrb[15].mxu0  ;;  %v1293_v22 = vpop.f32.mrb[15].mxu1  ;;  %v1182_v7 = vunpack.c.l.bf16 %v1204_v60 }
 0x125   : > { %v700_v20 = vadd.f32 %v1243_v12, %v1142_v6  ;;  %v1246_v21 = vadd.f32 %v1245_v16, %v1244_v13  ;;  %v1669_v24 = vadd.f32 %v1291_v17, %v1174_v10  ;;  %v1294_v25 = vadd.f32 %v1293_v22, %v1292_v18 }
 0x126   : > { %v1151_v12 = vunpack.c.h.bf16 %v1196_v53  ;;  %v1183_v17 = vunpack.c.h.bf16 %v1204_v60  ;;  %v1198_v53 = vld [vmem:[%s1542_s28 + $0x38] sm:$0xff]  }
 0x127   : > { %808 = vst [vmem:[%s1547_s6 + $0x30] sm:$0xff] %v700_v20  ;;  %v840_v26 = vadd.f32 %v839_v2, %v700_v20  ;;  %v881_v27 = vmul.f32 %v700_v20, %v700_v20  ;;  %v703_v28 = vadd.f32 %v1246_v21, %v1143_v14  ;;  %824 = vst [vmem:[%s1547_s6 + $0xb0] sm:$0xff] %v1669_v24  ;;  %v1197_v21 = vld [vmem:[%s1542_s28 + $0x30] sm:$0xff]  }
 0x128   : > { %v1675_v31 = vadd.f32 %v1294_v25, %v1175_v19 }
 0x129   : > { %v912_v32 = vadd.f32 %v911_v11, %v881_v27  ;;  %809 = vst [vmem:[%s1547_s6 + $0x38] sm:$0xff] %v703_v28  ;;  %v841_v33 = vadd.f32 %v840_v26, %v703_v28  ;;  %v882_v34 = vmul.f32 %v703_v28, %v703_v28  ;;  %v1247_v35 = vpop.f32.mrb[16].mxu0  ;;  %v1295_v39 = vpop.f32.mrb[16].mxu1  ;;  %v1205_v28 = vld [vmem:[%s1542_s28 + $0x70] sm:$0xff]  }
 0x12a   : > { %v1248_v38 = vpop.f32.mrb[17].mxu0  ;;  %825 = vst [vmem:[%s1547_s6 + $0xb8] sm:$0xff] %v1675_v31  ;;  %v1296_v45 = vpop.f32.mrb[17].mxu1 }
 0x12b   : > { %v913_v41 = vadd.f32 %v912_v32, %v882_v34  ;;  %v1249_v42 = vadd.f32 %v1248_v38, %v1247_v35  ;;  %v1250_v43 = vpop.f32.mrb[18].mxu0  ;;  %v1297_v47 = vadd.f32 %v1296_v45, %v1295_v39  ;;  %v1298_v48 = vpop.f32.mrb[18].mxu1 }
 0x12c   : > { %v1251_v46 = vpop.f32.mrb[19].mxu0  ;;  %v1299_v52 = vpop.f32.mrb[19].mxu1 }
 0x12d   : > { %v708_v50 = vadd.f32 %v1249_v42, %v1146_v37  ;;  %v1252_v51 = vadd.f32 %v1251_v46, %v1250_v43  ;;  %v1681_v54 = vadd.f32 %v1297_v47, %v1178_v40  ;;  %v1300_v55 = vadd.f32 %v1299_v52, %v1298_v48 }
 0x12e   : > { %v1154_v37 = vunpack.c.l.bf16 %v1197_v21  ;;  %v1186_v40 = vunpack.c.l.bf16 %v1205_v28 }
 0x12f   : > { %810 = vst [vmem:[%s1547_s6 + $0x40] sm:$0xff] %v708_v50  ;;  %v842_v56 = vadd.f32 %v841_v33, %v708_v50  ;;  %v883_v57 = vmul.f32 %v708_v50, %v708_v50  ;;  %v711_v59 = vadd.f32 %v1252_v51, %v1147_v44  ;;  %826 = vst [vmem:[%s1547_s6 + $0xc0] sm:$0xff] %v1681_v54  ;;  %v1155_v44 = vunpack.c.h.bf16 %v1197_v21 }
 0x130   : > { %v1687_v61 = vadd.f32 %v1300_v55, %v1179_v49  ;;  %v1187_v49 = vunpack.c.h.bf16 %v1205_v28 }
 0x131   : > { %v914_v62 = vadd.f32 %v913_v41, %v883_v57  ;;  %811 = vst [vmem:[%s1547_s6 + $0x48] sm:$0xff] %v711_v59  ;;  %v843_v63 = vadd.f32 %v842_v56, %v711_v59  ;;  %v884_v1 = vmul.f32 %v711_v59, %v711_v59  ;;  %v1253_v2 = vpop.f32.mrb[20].mxu0  ;;  %v1301_v6 = vpop.f32.mrb[20].mxu1 }
 0x132   : > { %v1254_v5 = vpop.f32.mrb[21].mxu0  ;;  %827 = vst [vmem:[%s1547_s6 + $0xc8] sm:$0xff] %v1687_v61  ;;  %v1302_v13 = vpop.f32.mrb[21].mxu1 }
 0x133   : > { %v915_v9 = vadd.f32 %v914_v62, %v884_v1  ;;  %v1255_v10 = vadd.f32 %v1254_v5, %v1253_v2  ;;  %v1256_v11 = vpop.f32.mrb[22].mxu0  ;;  %v1303_v15 = vadd.f32 %v1302_v13, %v1301_v6  ;;  %v1304_v16 = vpop.f32.mrb[22].mxu1  ;;  %v1206_v62 = vld [vmem:[%s1542_s28 + $0x78] sm:$0xff]   ;;  %v1158_v6 = vunpack.c.l.bf16 %v1198_v53  ;;  %s962_s28 = sshll.u32 %s1491_s25, 4  ;;  %s963_s28 = int_to_ptr.vmem [resolvable:$true] %s962_s28 }
 0x134   : > { %v1257_v14 = vpop.f32.mrb[23].mxu0  ;;  %v1305_v20 = vpop.f32.mrb[23].mxu1  ;;  %s1422_s22 = scalar_lea.vmem %s963_s28, 16  ;;  %s1428_s23 = scalar_lea.vmem %s963_s28, 32 }
 0x135   : > { %v716_v18 = vadd.f32 %v1255_v10, %v1150_v3  ;;  %v1258_v19 = vadd.f32 %v1257_v14, %v1256_v11  ;;  %v1693_v22 = vadd.f32 %v1303_v15, %v1182_v7  ;;  %v1306_v23 = vadd.f32 %v1305_v20, %v1304_v16  ;;  %p1423_p6 = scmp.ne.s32.totalorder %s963_s28, %s1422_s22  ;;  %p1429_p9 = scmp.lt.s32.totalorder %s963_s28, %s963_s28 }
 0x136   : > { %v1190_v10 = vunpack.c.l.bf16 %v1206_v62  ;;  %v1159_v14 = vunpack.c.h.bf16 %v1198_v53  ;;  %p1430_p10 = scmp.lt.s32.totalorder %s1428_s23, %s1422_s22 }
 0x137   : > { %812 = vst [vmem:[%s1547_s6 + $0x50] sm:$0xff] %v716_v18  ;;  %v844_v25 = vadd.f32 %v843_v63, %v716_v18  ;;  %v885_v26 = vmul.f32 %v716_v18, %v716_v18  ;;  %v719_v27 = vadd.f32 %v1258_v19, %v1151_v12  ;;  %828 = vst [vmem:[%s1547_s6 + $0xd0] sm:$0xff] %v1693_v22  ;;  %v1191_v19 = vunpack.c.h.bf16 %v1206_v62  ;;  %p1424_p7 = pnand %p1423_p6, %p1343_p5 }
 0x138   : > { %v1699_v29 = vadd.f32 %v1306_v23, %v1183_v17  ;;  %v899_v62 = vmul.f32 %v1681_v54, %v1681_v54  ;;  %p1431_p11 = por %p1430_p10, %p1429_p9 }
 0x139   : > { %v916_v32 = vadd.f32 %v915_v9, %v885_v26  ;;  %813 = vst [vmem:[%s1547_s6 + $0x58] sm:$0xff] %v719_v27  ;;  %v845_v33 = vadd.f32 %v844_v25, %v719_v27  ;;  %v886_v34 = vmul.f32 %v719_v27, %v719_v27  ;;  %v1259_v35 = vpop.f32.mrb[24].mxu0  ;;  %v1307_v39 = vpop.f32.mrb[24].mxu1  ;;  %p1425_p8 = pneg %p1424_p7 }
 0x13a   : > { %v1260_v38 = vpop.f32.mrb[25].mxu0  ;;  %829 = vst [vmem:[%s1547_s6 + $0xd8] sm:$0xff] %v1699_v29  ;;  %v1308_v45 = vpop.f32.mrb[25].mxu1 }
 0x13b   : > { %v917_v41 = vadd.f32 %v916_v32, %v886_v34  ;;  %v1261_v42 = vadd.f32 %v1260_v38, %v1259_v35  ;;  %v1262_v43 = vpop.f32.mrb[26].mxu0  ;;  %v1309_v47 = vadd.f32 %v1308_v45, %v1307_v39  ;;  %v1310_v48 = vpop.f32.mrb[26].mxu1  ;;  %v891_v38 = vmul.f32 %v1633_v4, %v1633_v4  ;;  %p1432_p12 = pnand %p1431_p11, %p1425_p8 }
 0x13c   : > { %v1263_v46 = vpop.f32.mrb[27].mxu0  ;;  %v1311_v52 = vpop.f32.mrb[27].mxu1 }
 0x13d   : > { %v724_v50 = vadd.f32 %v1261_v42, %v1154_v37  ;;  %v1264_v51 = vadd.f32 %v1263_v46, %v1262_v43  ;;  %v1705_v55 = vadd.f32 %v1309_v47, %v1186_v40  ;;  %v1312_v56 = vadd.f32 %v1311_v52, %v1310_v48 }
 0x13e   : > { %v894_v47 = vmul.f32 %v1651_v36, %v1651_v36 }
 0x13f   : > { %814 = vst [vmem:[%s1547_s6 + $0x60] sm:$0xff] %v724_v50  ;;  %v846_v57 = vadd.f32 %v845_v33, %v724_v50  ;;  %v887_v59 = vmul.f32 %v724_v50, %v724_v50  ;;  %v727_v60 = vadd.f32 %v1264_v51, %v1155_v44  ;;  %830 = vst [vmem:[%s1547_s6 + $0xe0] sm:$0xff] %v1705_v55 }
 0x140   : > { %v1711_v63 = vadd.f32 %v1312_v56, %v1187_v49  ;;  %v893_v44 = vmul.f32 %v1645_v30, %v1645_v30 }
 0x141   : > { %v918_v1 = vadd.f32 %v917_v41, %v887_v59  ;;  %815 = vst [vmem:[%s1547_s6 + $0x68] sm:$0xff] %v727_v60  ;;  %v847_v2 = vadd.f32 %v846_v57, %v727_v60  ;;  %v888_v3 = vmul.f32 %v727_v60, %v727_v60  ;;  %v1265_v5 = vpop.f32.mrb[28].mxu0  ;;  %v1313_v9 = vpop.f32.mrb[28].mxu1  ;;  %v892_v41 = vmul.f32 %v1639_v8, %v1639_v8 }
 0x142   : > { %v1266_v7 = vpop.f32.mrb[29].mxu0  ;;  %831 = vst [vmem:[%s1547_s6 + $0xe8] sm:$0xff] %v1711_v63  ;;  %v1314_v15 = vpop.f32.mrb[29].mxu1 }
 0x143   : > { %v919_v11 = vadd.f32 %v918_v1, %v888_v3  ;;  %v1267_v12 = vadd.f32 %v1266_v7, %v1265_v5  ;;  %v1268_v13 = vpop.f32.mrb[30].mxu0  ;;  %v1315_v17 = vadd.f32 %v1314_v15, %v1313_v9  ;;  %v1316_v18 = vpop.f32.mrb[30].mxu1  ;;  %v900_v3 = vmul.f32 %v1687_v61, %v1687_v61 }
 0x144   : > { %v1269_v16 = vpop.f32.mrb[31].mxu0  ;;  %v1317_v23 = vpop.f32.mrb[31].mxu1  ;;  %v902_v9 = vmul.f32 %v1699_v29, %v1699_v29 }
 0x145   : > { %v732_v20 = vadd.f32 %v1267_v12, %v1158_v6  ;;  %v1270_v21 = vadd.f32 %v1269_v16, %v1268_v13  ;;  %v796_v25 = vadd.f32 %v1315_v17, %v1190_v10  ;;  %v1318_v26 = vadd.f32 %v1317_v23, %v1316_v18 }
 0x146   : > { %v901_v6 = vmul.f32 %v1693_v22, %v1693_v22  ;;  %v904_v13 = vmul.f32 %v1711_v63, %v1711_v63 }
 0x147   : > { %816 = vst [vmem:[%s1547_s6 + $0x70] sm:$0xff] %v732_v20  ;;  %v848_v27 = vadd.f32 %v847_v2, %v732_v20  ;;  %v889_v28 = vmul.f32 %v732_v20, %v732_v20  ;;  %v735_v32 = vadd.f32 %v1270_v21, %v1159_v14  ;;  %832 = vst [vmem:[%s1547_s6 + $0xf0] sm:$0xff] %v796_v25 }
 0x148   : > { %v799_v33 = vadd.f32 %v1318_v26, %v1191_v19  ;;  %v905_v14 = vmul.f32 %v796_v25, %v796_v25 }
 0x149   : > { %v920_v34 = vadd.f32 %v919_v11, %v889_v28  ;;  %817 = vst [vmem:[%s1547_s6 + $0x78] sm:$0xff] %v735_v32  ;;  %v849_v35 = vadd.f32 %v848_v27, %v735_v32  ;;  %v890_v37 = vmul.f32 %v735_v32, %v735_v32  ;;  %v903_v11 = vmul.f32 %v1705_v55, %v1705_v55 }
 0x14a   : > { %833 = vst [vmem:[%s1547_s6 + $0xf8] sm:$0xff] %v799_v33  ;;  %v906_v18 = vmul.f32 %v799_v33, %v799_v33  ;;  %s1492_s6 = smov [#allocation4]  }
 0x14b   : > { %v850_v39 = vadd.f32 %v849_v35, %v1633_v4  ;;  %v921_v40 = vadd.f32 %v920_v34, %v890_v37  ;;  %v895_v4 = vmul.f32 %v1657_v58, %v1657_v58  ;;  %v834_v34 = vld [vmem:[#allocation2] sm:$0x1]  ;;  %v874_v35 = vld [vmem:[#allocation4] sm:$0x1]  ;;  %s973_s21 = sshll.u32 %s1492_s6, 4  ;;  %s1763_s21 = int_to_ptr.vmem [resolvable:$true] %s973_s21 }
 0x14d   : > { %v851_v42 = vadd.f32 %v850_v39, %v1639_v8  ;;  %v922_v43 = vadd.f32 %v921_v40, %v891_v38  ;;  %v896_v8 = vmul.f32 %v1663_v0, %v1663_v0 }
 0x14f   : > { %v852_v45 = vadd.f32 %v851_v42, %v1645_v30  ;;  %v923_v46 = vadd.f32 %v922_v43, %v892_v41  ;;  %v897_v30 = vmul.f32 %v1669_v24, %v1669_v24 }
 0x151   : > { %v853_v48 = vadd.f32 %v852_v45, %v1651_v36  ;;  %v924_v49 = vadd.f32 %v923_v46, %v893_v44  ;;  %v898_v36 = vmul.f32 %v1675_v31, %v1675_v31 }
 0x153   : > { %v925_v50 = vadd.f32 %v924_v49, %v894_v47  ;;  %v854_v51 = vadd.f32 %v853_v48, %v1657_v58 }
 0x155   : > { %v855_v52 = vadd.f32 %v854_v51, %v1663_v0  ;;  %v926_v53 = vadd.f32 %v925_v50, %v895_v4 }
 0x157   : > { %v856_v56 = vadd.f32 %v855_v52, %v1669_v24  ;;  %v927_v57 = vadd.f32 %v926_v53, %v896_v8 }
 0x159   : > { %v857_v59 = vadd.f32 %v856_v56, %v1675_v31  ;;  %v928_v60 = vadd.f32 %v927_v57, %v897_v30 }
 0x15b   : > { %v858_v58 = vadd.f32 %v857_v59, %v1681_v54  ;;  %v929_v1 = vadd.f32 %v928_v60, %v898_v36 }
 0x15d   : > { %v930_v0 = vadd.f32 %v929_v1, %v899_v62  ;;  %v859_v2 = vadd.f32 %v858_v58, %v1687_v61 }
 0x15f   : > { %v931_v24 = vadd.f32 %v930_v0, %v900_v3  ;;  %v860_v5 = vadd.f32 %v859_v2, %v1693_v22 }
 0x161   : > { %v932_v31 = vadd.f32 %v931_v24, %v901_v6  ;;  %v861_v7 = vadd.f32 %v860_v5, %v1699_v29 }
 0x163   : > { %v933_v54 = vadd.f32 %v932_v31, %v902_v9  ;;  %v862_v10 = vadd.f32 %v861_v7, %v1705_v55 }
 0x165   : > { %v934_v12 = vadd.f32 %v933_v54, %v903_v11  ;;  %v863_v61 = vadd.f32 %v862_v10, %v1711_v63 }
 0x167   : > { %v935_v22 = vadd.f32 %v934_v12, %v904_v13  ;;  %v864_v15 = vadd.f32 %v863_v61, %v796_v25 }
 0x169   : > { %v936_v16 = vadd.f32 %v935_v22, %v905_v14  ;;  %v865_v17 = vadd.f32 %v864_v15, %v799_v33 }
 0x16b   : > { %v866_v29 = vrot.slane %v865_v17, 4  ;;  %v937_v19 = vadd.f32 %v936_v16, %v906_v18 }
 0x16d   : > { %v867_v20 = vadd.f32 %v866_v29, %v865_v17  ;;  %v938_v21 = vrot.slane %v937_v19, 4 }
 0x16f   : > { %v868_v23 = vrot.slane %v867_v20, 2  ;;  %v939_v26 = vadd.f32 %v938_v21, %v937_v19 }
 0x171   : > { %v869_v55 = vadd.f32 %v868_v23, %v867_v20  ;;  %v940_v27 = vrot.slane %v939_v26, 2 }
 0x173   : > { %v870_v28 = vrot.slane %v869_v55, 1  ;;  %v941_v32 = vadd.f32 %v940_v27, %v939_v26 }
 0x175   : > { %v871_v63 = vadd.f32 %v870_v28, %v869_v55  ;;  %v942_v25 = vrot.slane %v941_v32, 1 }
 0x177   : > { %v872_v33 = vadd.f32 %v871_v63, %v834_v34  ;;  %v943_v37 = vadd.f32 %v942_v25, %v941_v32 }
 0x179   : > { %873 = vst [vmem:[#allocation2] sm:$0x1] %v872_v33  ;;  %v944_v38 = vadd.f32 %v943_v37, %v874_v35 }
 0x17a   : > { %1435 = shalt.err (!%p1432_p12)
}
 0x17b   : > { %s1436_s27 = scalar_lea.hbm %s1822_s4, 16 }
 0x17c   : > { %p1437_p13 = scmp.ne.s32.totalorder %s1822_s4, %s1436_s27  ;;  %p1442_p2 = scmp.lt.u32.totalorder %s1436_s27, %s1822_s4 }
 0x17e   : > { %p1438_p0 = pnand %p1437_p13, %p1343_p5 }
 0x180   : > { %p1439_p1 = pneg %p1438_p0 }
 0x182   : > { %p1444_p3 = pnand %p1442_p2, %p1439_p1 }
 0x184   : > { %1447 = shalt.err (!%p1444_p3)
}
 0x185   : > { %1336 = dma.vmem_to_hbm [thread:$0]  (%p1343_p5), %s963_s28, 16, %s1822_s4, [#allocation3]   ;;  %945 = vst [vmem:[#allocation4] sm:$0x1] %v944_v38 }
 0x186   : > { %s1448_s11 = scalar_lea.vmem %s1763_s21, 16  ;;  %s1454_s12 = scalar_lea.vmem %s1763_s21, 32 }
 0x187   : > { %p1449_p4 = scmp.ne.s32.totalorder %s1763_s21, %s1448_s11  ;;  %p1455_p8 = scmp.lt.s32.totalorder %s1763_s21, %s1763_s21 }
 0x188   : > { %p1456_p9 = scmp.lt.s32.totalorder %s1454_s12, %s1448_s11 }
 0x189   : > { %p1450_p6 = pnand %p1449_p4, %p1343_p5 }
 0x18a   : > { %p1457_p10 = por %p1456_p9, %p1455_p8 }
 0x18b   : > { %p1451_p7 = pneg %p1450_p6 }
 0x18d   : > { %p1458_p11 = pnand %p1457_p10, %p1451_p7 }
 0x18f   : > { %1461 = shalt.err (!%p1458_p11)
}
 0x190   : > { %s1462_s15 = scalar_lea.hbm %s1823_s5, 16 }
 0x191   : > { %p1463_p12 = scmp.ne.s32.totalorder %s1823_s5, %s1462_s15  ;;  %p1468_p1 = scmp.lt.u32.totalorder %s1462_s15, %s1823_s5 }
 0x193   : > { %p1464_p13 = pnand %p1463_p12, %p1343_p5 }
 0x195   : > { %p1465_p0 = pneg %p1464_p13 }
 0x197   : > { %p1470_p2 = pnand %p1468_p1, %p1465_p0 }
 0x199   : > { %1473 = shalt.err (!%p1470_p2)
}
 0x19a   : > { %1338 = dma.vmem_to_hbm [thread:$0]  (%p1343_p5), %s1763_s21, 16, %s1823_s5, [#allocation5]  }
 0x19b   : > { %1479 = dma.done.wait (%p1343_p5), [#allocation3], 16  }
 0x19c   : > { %1481 = vsyncadd (%p1343_p5), [#allocation3], 4294967280 }
 0x19d   : > { %1483 = dma.done.wait (%p1343_p5), [#allocation5], 16  }
 0x19e   : > { %1485 = vsyncadd (%p1343_p5), [#allocation5], 4294967280 }
 0x19f PF: > { %s18_s18 = sadd.s32 1, %s1488_s18  }
 0x1a0   : > { %p15_p3 = scmp.ge.s32.totalorder %s18_s18, 6  }
 0x1a2   :  { %17 = sbr.rel (!%p15_p3) target bundleno = 2 (0x2), region = 86 }
 0x1a9   :  { %998 = vsyncpa [#allocation3], 1 }
 0x1aa   :  { %1000 = vsyncpa [#allocation3 + $0x1], 1 }
 0x1ab   :  { %1001 = vsyncpa [#allocation5], 1 }

</bundles_post_ra>
